<compile_context>
chip_gen: v7x
topology: tpu7x:2x2x1
jax: 0.10.0
libtpu: 0.0.40
codegen_flags: <defaults>
</compile_context>

<pallas_src>
from functools import partial

import jax
import jax.numpy as jnp
from jax.experimental import pallas as pl
from jax.experimental.pallas import tpu as pltpu

_VMEM_LIMIT_BYTES = 32 * 1024 * 1024  # safe on v5e/v6e/v7x; size per-gen in prod.


def _round_up(x, m):
    return ((x + m - 1) // m) * m


def _pick_row_tile(h, target):
    t = min(h, max(1, target))
    while h % t:
        t -= 1
    return t


# ---------------------------------------------------------------------------
# Kernel 1: ConvTranspose2d(k=2, s=2) as a tiled matmul + bias.
# With kernel==stride==2 there is no overlap:
#   out[n, 2i+di, 2j+dj, co] = sum_ci x[n, i, j, ci] * W[ci, co, di, dj] + b[co]
# so it is exactly  x_flat(M, Ci) @ W_r(Ci, 4*Co) + b  followed by a scatter
# (reshape/transpose done by XLA).
# ---------------------------------------------------------------------------
def _matmul_bias_kernel(x_ref, w_ref, b_ref, o_ref):
    acc = jnp.dot(x_ref[...], w_ref[...], preferred_element_type=jnp.float32)
    o_ref[...] = (acc + b_ref[...]).astype(o_ref.dtype)


def conv_transpose_2x2_s2(x_nhwc, w_pt, b, *, compute_dtype=jnp.bfloat16, tm=512):
    """x_nhwc: (N,H,W,Ci); w_pt: PyTorch layout (Ci, Co, 2, 2); b: (Co,)."""
    N, H, W, Ci = x_nhwc.shape
    Co = w_pt.shape[1]
    # (Ci, Co, 2, 2) -> (Ci, di, dj, Co) -> (Ci, 4*Co)
    w_r = jnp.transpose(w_pt, (0, 2, 3, 1)).reshape(Ci, 4 * Co).astype(compute_dtype)
    b_tiled = jnp.tile(b, (4,)).reshape(1, 4 * Co).astype(jnp.float32)

    M = N * H * W
    x_flat = x_nhwc.reshape(M, Ci).astype(compute_dtype)
    TM = min(tm, _round_up(M, 8))          # row tile (multiple of 8)
    Mp = _round_up(M, TM)
    if Mp != M:
        x_flat = jnp.pad(x_flat, ((0, Mp - M), (0, 0)))

    out = pl.pallas_call(
        _matmul_bias_kernel,
        grid=(pl.cdiv(Mp, TM),),
        out_shape=jax.ShapeDtypeStruct((Mp, 4 * Co), compute_dtype),
        in_specs=[
            pl.BlockSpec((TM, Ci), lambda i: (i, 0)),
            pl.BlockSpec((Ci, 4 * Co), lambda i: (0, 0)),
            pl.BlockSpec((1, 4 * Co), lambda i: (0, 0)),
        ],
        out_specs=pl.BlockSpec((TM, 4 * Co), lambda i: (i, 0)),
        compiler_params=pltpu.CompilerParams(
            dimension_semantics=("parallel",),
            vmem_limit_bytes=_VMEM_LIMIT_BYTES),
    )(x_flat, w_r, b_tiled)

    out = out[:M].reshape(N, H, W, 2, 2, Co)
    out = jnp.transpose(out, (0, 1, 3, 2, 4, 5)).reshape(N, 2 * H, 2 * W, Co)
    return out


# ---------------------------------------------------------------------------
# Kernel 2: fused (multi-input) conv3x3 (pad=1, stride=1, no bias) + folded-BN
# shift + ReLU. Grid over (batch, row-tiles). Each program gets a (TH+2)-row
# halo'd window per input, already padded along W to Wp (multiple of 8) so the
# (TH, Wp, C) -> (TH*Wp, C) flatten is sublane-aligned (no relayout).
# The dx shift is applied once per dx with a single slice of the partial sum.
# ---------------------------------------------------------------------------
def _conv3x3_bn_relu_kernel(*args, n_in, TH, W, Wp):
    x_refs = args[:n_in]
    w_refs = args[n_in:2 * n_in]
    shift_ref = args[2 * n_in]
    o_ref = args[2 * n_in + 1]
    Co = o_ref.shape[-1]
    M = TH * Wp

    # Hoist the three dy-shifted, flattened row blocks per input (leading-axis
    # slices only; flatten is aligned because Wp % 8 == 0).
    row_blocks = []
    for x_ref in x_refs:
        c = x_ref.shape[-1]
        row_blocks.append(
            [x_ref[0, 0, dy:dy + TH, :, :].reshape(M, c) for dy in range(3)])

    acc = jnp.zeros((TH, W, Co), jnp.float32)
    for dx in range(3):
        part = jnp.zeros((M, Co), jnp.float32)
        for dy in range(3):
            for i in range(n_in):
                part = part + jnp.dot(row_blocks[i][dy], w_refs[i][dy, dx],
                                      preferred_element_type=jnp.float32)
        part = part.reshape(TH, Wp, Co)
        acc = acc + part[:, dx:dx + W, :]     # one shift-slice per dx (3 total)

    y = jnp.maximum(acc + shift_ref[...], 0.0)  # BN scale already in weights
    o_ref[...] = y.reshape(o_ref.shape).astype(o_ref.dtype)


def _pad_and_window(x, th, wp):
    """(N,H,W,C) -> overlapping row windows (N, H//th, th+2, wp, C), zero-padded."""
    N, H, W, C = x.shape
    xpad = jnp.pad(x, ((0, 0), (1, 1), (1, wp - W - 1), (0, 0)))
    t_steps = H // th
    return jnp.stack([xpad[:, t * th: t * th + th + 2] for t in range(t_steps)], axis=1)


def conv3x3_bn_relu(xs, w_oihw, gamma, beta, mean, var, *, eps=1e-5,
                    compute_dtype=jnp.bfloat16, out_dtype=jnp.float32,
                    row_tile=32):
    """xs: list of NHWC inputs whose channels are (virtually) concatenated.
    w_oihw: PyTorch conv weight (Co, sum(Ci), 3, 3). BN applied in inference mode."""
    N, H, W, _ = xs[0].shape
    Co = w_oihw.shape[0]

    # Fold BN scale into the conv weights; keep only the shift for the kernel.
    inv_std = 1.0 / jnp.sqrt(var + eps)
    scale = gamma * inv_std
    shift = (beta - mean * scale).reshape(1, Co).astype(jnp.float32)
    w_hwio = jnp.transpose(w_oihw, (2, 3, 1, 0)) * scale          # (3,3,Ci,Co)

    # Split the weight along the input-channel axis to match the input list
    # (this is how the concat is fused away).
    cs = [x.shape[-1] for x in xs]
    offs = [0]
    for c in cs:
        offs.append(offs[-1] + c)
    w_parts = [w_hwio[:, :, offs[i]:offs[i + 1], :].astype(compute_dtype)
               for i in range(len(xs))]

    TH = _pick_row_tile(H, row_tile)
    T = H // TH
    Wp = _round_up(W + 2, 8)
    wins = [_pad_and_window(x.astype(compute_dtype), TH, Wp) for x in xs]

    n_in = len(xs)
    kernel = partial(_conv3x3_bn_relu_kernel, n_in=n_in, TH=TH, W=W, Wp=Wp)
    in_specs = (
        [pl.BlockSpec((1, 1, TH + 2, Wp, c), lambda n, t: (n, t, 0, 0, 0)) for c in cs]
        + [pl.BlockSpec((3, 3, c, Co), lambda n, t: (0, 0, 0, 0)) for c in cs]
        + [pl.BlockSpec((1, Co), lambda n, t: (0, 0))]
    )
    out = pl.pallas_call(
        kernel,
        grid=(N, T),
        out_shape=jax.ShapeDtypeStruct((N, H, W, Co), out_dtype),
        in_specs=in_specs,
        out_specs=pl.BlockSpec((1, TH, W, Co), lambda n, t: (n, t, 0, 0)),
        compiler_params=pltpu.CompilerParams(
            dimension_semantics=("parallel", "parallel"),
            vmem_limit_bytes=_VMEM_LIMIT_BYTES),
    )(*wins, *w_parts, shift)
    return out


# ---------------------------------------------------------------------------
# Full decoder block forward (NCHW in / NCHW out, like the PyTorch module).
# ---------------------------------------------------------------------------
def decoder_block_forward(x_nchw, low_nchw, p, *, compute_dtype=jnp.bfloat16,
                          row_tile=32):
    x = jnp.transpose(x_nchw, (0, 2, 3, 1))
    low = jnp.transpose(low_nchw, (0, 2, 3, 1))

    up = conv_transpose_2x2_s2(x, p["up_w"], p["up_b"],
                               compute_dtype=compute_dtype)       # (N,2H,2W,Chigh)

    # torch.cat((up, low_feat), dim=1) is fused into the first conv: the conv
    # weight is split along Ci and both inputs are fed to the same kernel.
    h = conv3x3_bn_relu([up, low], p["c1_w"],
                        p["bn1_g"], p["bn1_b"], p["bn1_m"], p["bn1_v"],
                        compute_dtype=compute_dtype, out_dtype=compute_dtype,
                        row_tile=row_tile)
    h = conv3x3_bn_relu([h], p["c2_w"],
                        p["bn2_g"], p["bn2_b"], p["bn2_m"], p["bn2_v"],
                        compute_dtype=compute_dtype, out_dtype=jnp.float32,
                        row_tile=row_tile)
    return jnp.transpose(h, (0, 3, 1, 2))                          # back to NCHW


# ---------------------------------------------------------------------------
# Pure-JAX reference (no Pallas) for the correctness check.
# ---------------------------------------------------------------------------
def _reference_forward(x_nchw, low_nchw, p, eps=1e-5):
    x = jnp.transpose(x_nchw, (0, 2, 3, 1))
    low = jnp.transpose(low_nchw, (0, 2, 3, 1))
    N, H, W, Ci = x.shape
    Co = p["up_w"].shape[1]
    up = jnp.einsum("nhwc,cokl->nhkwlo", x, p["up_w"])
    up = up.reshape(N, 2 * H, 2 * W, Co) + p["up_b"]
    cat = jnp.concatenate([up, low], axis=-1)

    def conv_bn_relu(z, w_oihw, g, b, m, v):
        w = jnp.transpose(w_oihw, (2, 3, 1, 0))
        y = jax.lax.conv_general_dilated(
            z, w, window_strides=(1, 1), padding="SAME",
            dimension_numbers=("NHWC", "HWIO", "NHWC"))
        y = (y - m) / jnp.sqrt(v + eps) * g + b
        return jnp.maximum(y, 0.0)

    h = conv_bn_relu(cat, p["c1_w"], p["bn1_g"], p["bn1_b"], p["bn1_m"], p["bn1_v"])
    h = conv_bn_relu(h, p["c2_w"], p["bn2_g"], p["bn2_b"], p["bn2_m"], p["bn2_v"])
    return jnp.transpose(h, (0, 3, 1, 2))


def make_params(key, c_high, c_low, c_out):
    ks = jax.random.split(key, 8)
    c_in = c_high + c_low
    return {
        "up_w": 0.1 * jax.random.normal(ks[0], (c_high, c_high, 2, 2), jnp.float32),
        "up_b": 0.1 * jax.random.normal(ks[1], (c_high,), jnp.float32),
        "c1_w": 0.1 * jax.random.normal(ks[2], (c_out, c_in, 3, 3), jnp.float32),
        "c2_w": 0.1 * jax.random.normal(ks[3], (c_out, c_out, 3, 3), jnp.float32),
        "bn1_g": 1.0 + 0.1 * jax.random.normal(ks[4], (c_out,), jnp.float32),
        "bn1_b": 0.1 * jax.random.normal(ks[5], (c_out,), jnp.float32),
        "bn1_m": jnp.zeros((c_out,), jnp.float32),
        "bn1_v": jnp.ones((c_out,), jnp.float32),
        "bn2_g": 1.0 + 0.1 * jax.random.normal(ks[6], (c_out,), jnp.float32),
        "bn2_b": 0.1 * jax.random.normal(ks[7], (c_out,), jnp.float32),
        "bn2_m": jnp.zeros((c_out,), jnp.float32),
        "bn2_v": jnp.ones((c_out,), jnp.float32),
    }


if __name__ == "__main__":
    key = jax.random.PRNGKey(0)
    k_x, k_low, k_p = jax.random.split(key, 3)

    N, C_HIGH, C_LOW, C_OUT = 2, 8, 4, 8
    H = W = 8  # x spatial; low_feat spatial is 2H x 2W

    x = jax.random.normal(k_x, (N, C_HIGH, H, W), jnp.float32)            # NCHW
    low_feat = jax.random.normal(k_low, (N, C_LOW, 2 * H, 2 * W), jnp.float32)
    params = make_params(k_p, C_HIGH, C_LOW, C_OUT)

    ref = jax.block_until_ready(_reference_forward(x, low_feat, params))

    # f32 compute path: tight check against the reference.
    fwd_f32 = jax.jit(partial(decoder_block_forward,
                              compute_dtype=jnp.float32, row_tile=8))
    out_f32 = jax.block_until_ready(fwd_f32(x, low_feat, params))
    assert out_f32.shape == (N, C_OUT, 2 * H, 2 * W), out_f32.shape
    assert jnp.allclose(out_f32, ref, rtol=1e-4, atol=1e-4), \
        float(jnp.max(jnp.abs(out_f32 - ref)))

    # bf16 compute path (f32 accumulation): looser check.
    fwd_bf16 = jax.jit(partial(decoder_block_forward,
                               compute_dtype=jnp.bfloat16, row_tile=8))
    out_bf16 = jax.block_until_ready(fwd_bf16(x, low_feat, params))
    assert out_bf16.shape == (N, C_OUT, 2 * H, 2 * W), out_bf16.shape
    assert jnp.allclose(out_bf16, ref, rtol=5e-2, atol=5e-2), \
        float(jnp.max(jnp.abs(out_bf16 - ref)))

    print("KERNEL_OK")
</pallas_src>

<mosaic_0001>
module attributes {stable_mosaic.version = 11 : i64} {
  func.func @_matmul_bias_kernel(%arg0: i32, %arg1: memref<128x8xf32, #tpu.memory_space<vmem>>, %arg2: memref<8x32xf32, #tpu.memory_space<vmem>>, %arg3: memref<1x32xf32, #tpu.memory_space<vmem>>, %arg4: memref<128x32xf32, #tpu.memory_space<vmem>>) attributes {dimension_semantics = [#tpu.dimension_semantics<parallel>], iteration_bounds = array<i64: 1>, scalar_prefetch = 0 : i64, scratch_operands = 0 : i64, tpu.core_type = #tpu.core_type<tc>, window_params = [{transform_indices = @transform_0, window_bounds = array<i64: 128, 8>}, {pipeline_mode = #tpu.pipeline_mode<synchronous>, transform_indices = @transform_1, window_bounds = array<i64: 8, 32>}, {pipeline_mode = #tpu.pipeline_mode<synchronous>, transform_indices = @transform_2, window_bounds = array<i64: 1, 32>}, {transform_indices = @transform_3, window_bounds = array<i64: 128, 32>}]} {
    %c0 = arith.constant 0 : index
    %c0_0 = arith.constant 0 : index
    %0 = vector.load %arg1[%c0, %c0_0] : memref<128x8xf32, #tpu.memory_space<vmem>>, vector<128x8xf32>
    %c0_1 = arith.constant 0 : index
    %c0_2 = arith.constant 0 : index
    %1 = vector.load %arg2[%c0_1, %c0_2] : memref<8x32xf32, #tpu.memory_space<vmem>>, vector<8x32xf32>
    %cst = arith.constant dense<0.000000e+00> : vector<128x32xf32>
    %2 = tpu.matmul %0, %1, %cst {dimension_numbers = #tpu.dot_dimension_numbers<[1], [0], [0], [1], [0, 0, 1, 1], [], []>} : vector<128x8xf32>, vector<8x32xf32>, vector<128x32xf32> -> vector<128x32xf32>
    %c0_3 = arith.constant 0 : index
    %c0_4 = arith.constant 0 : index
    %3 = vector.load %arg3[%c0_3, %c0_4] : memref<1x32xf32, #tpu.memory_space<vmem>>, vector<1x32xf32>
    %4 = vector.broadcast %3 : vector<1x32xf32> to vector<128x32xf32>
    %5 = arith.addf %2, %4 : vector<128x32xf32>
    %c0_5 = arith.constant 0 : index
    %c0_6 = arith.constant 0 : index
    %6 = vector.load %arg4[%c0_5, %c0_6] : memref<128x32xf32, #tpu.memory_space<vmem>>, vector<128x32xf32>
    tpu.vector_store %arg4[%c0_5, %c0_6], %5 {strides = array<i32>} : memref<128x32xf32, #tpu.memory_space<vmem>>, vector<128x32xf32>,
    return
  }
  func.func @transform_0(%arg0: i32) -> (i32, i32) {
    %c0_i32 = arith.constant 0 : i32
    %c0_i32_0 = arith.constant 0 : i32
    return %arg0, %c0_i32 : i32, i32
  }
  func.func @transform_1(%arg0: i32) -> (i32, i32) {
    %c0_i32 = arith.constant 0 : i32
    %c0_i32_0 = arith.constant 0 : i32
    %c0_i32_1 = arith.constant 0 : i32
    return %c0_i32, %c0_i32_0 : i32, i32
  }
  func.func @transform_2(%arg0: i32) -> (i32, i32) {
    %c0_i32 = arith.constant 0 : i32
    %c0_i32_0 = arith.constant 0 : i32
    %c0_i32_1 = arith.constant 0 : i32
    return %c0_i32, %c0_i32_0 : i32, i32
  }
  func.func @transform_3(%arg0: i32) -> (i32, i32) {
    %c0_i32 = arith.constant 0 : i32
    %c0_i32_0 = arith.constant 0 : i32
    return %arg0, %c0_i32 : i32, i32
  }
}

module attributes {stable_mosaic.version = 11 : i64} {
  func.func @_conv3x3_bn_relu_kernel(%arg0: i32, %arg1: i32, %arg2: memref<1x1x10x24x8xf32, #tpu.memory_space<vmem>>, %arg3: memref<1x1x10x24x4xf32, #tpu.memory_space<vmem>>, %arg4: memref<3x3x8x8xf32, #tpu.memory_space<vmem>>, %arg5: memref<3x3x4x8xf32, #tpu.memory_space<vmem>>, %arg6: memref<1x8xf32, #tpu.memory_space<vmem>>, %arg7: memref<1x8x16x8xf32, #tpu.memory_space<vmem>>) attributes {dimension_semantics = [#tpu.dimension_semantics<parallel>, #tpu.dimension_semantics<parallel>], iteration_bounds = array<i64: 2, 2>, scalar_prefetch = 0 : i64, scratch_operands = 0 : i64, tpu.core_type = #tpu.core_type<tc>, window_params = [{transform_indices = @transform_0, window_bounds = array<i64: 1, 1, 10, 24, 8>}, {transform_indices = @transform_1, window_bounds = array<i64: 1, 1, 10, 24, 4>}, {pipeline_mode = #tpu.pipeline_mode<synchronous>, transform_indices = @transform_2, window_bounds = array<i64: 3, 3, 8, 8>}, {pipeline_mode = #tpu.pipeline_mode<synchronous>, transform_indices = @transform_3, window_bounds = array<i64: 3, 3, 4, 8>}, {pipeline_mode = #tpu.pipeline_mode<synchronous>, transform_indices = @transform_4, window_bounds = array<i64: 1, 8>}, {transform_indices = @transform_5, window_bounds = array<i64: 1, 8, 16, 8>}]} {
    %c0 = arith.constant 0 : index
    %c0_0 = arith.constant 0 : index
    %c0_1 = arith.constant 0 : index
    %c0_2 = arith.constant 0 : index
    %c0_3 = arith.constant 0 : index
    %0 = vector.load %arg2[%c0, %c0_0, %c0_1, %c0_2, %c0_3] : memref<1x1x10x24x8xf32, #tpu.memory_space<vmem>>, vector<1x1x8x24x8xf32>
    %1 = vector.shape_cast %0 : vector<1x1x8x24x8xf32> to vector<8x24x8xf32>
    %2 = vector.shape_cast %1 : vector<8x24x8xf32> to vector<192x8xf32>
    %c0_4 = arith.constant 0 : index
    %c0_5 = arith.constant 0 : index
    %c1 = arith.constant 1 : index
    %c0_6 = arith.constant 0 : index
    %c0_7 = arith.constant 0 : index
    %3 = vector.load %arg2[%c0_4, %c0_5, %c1, %c0_6, %c0_7] : memref<1x1x10x24x8xf32, #tpu.memory_space<vmem>>, vector<1x1x8x24x8xf32>
    %4 = vector.shape_cast %3 : vector<1x1x8x24x8xf32> to vector<8x24x8xf32>
    %5 = vector.shape_cast %4 : vector<8x24x8xf32> to vector<192x8xf32>
    %c0_8 = arith.constant 0 : index
    %c0_9 = arith.constant 0 : index
    %c2 = arith.constant 2 : index
    %c0_10 = arith.constant 0 : index
    %c0_11 = arith.constant 0 : index
    %6 = vector.load %arg2[%c0_8, %c0_9, %c2, %c0_10, %c0_11] : memref<1x1x10x24x8xf32, #tpu.memory_space<vmem>>, vector<1x1x8x24x8xf32>
    %7 = vector.shape_cast %6 : vector<1x1x8x24x8xf32> to vector<8x24x8xf32>
    %8 = vector.shape_cast %7 : vector<8x24x8xf32> to vector<192x8xf32>
    %c0_12 = arith.constant 0 : index
    %c0_13 = arith.constant 0 : index
    %c0_14 = arith.constant 0 : index
    %c0_15 = arith.constant 0 : index
    %c0_16 = arith.constant 0 : index
    %9 = vector.load %arg3[%c0_12, %c0_13, %c0_14, %c0_15, %c0_16] : memref<1x1x10x24x4xf32, #tpu.memory_space<vmem>>, vector<1x1x8x24x4xf32>
    %10 = vector.shape_cast %9 : vector<1x1x8x24x4xf32> to vector<8x24x4xf32>
    %11 = vector.shape_cast %10 : vector<8x24x4xf32> to vector<192x4xf32>
    %c0_17 = arith.constant 0 : index
    %c0_18 = arith.constant 0 : index
    %c1_19 = arith.constant 1 : index
    %c0_20 = arith.constant 0 : index
    %c0_21 = arith.constant 0 : index
    %12 = vector.load %arg3[%c0_17, %c0_18, %c1_19, %c0_20, %c0_21] : memref<1x1x10x24x4xf32, #tpu.memory_space<vmem>>, vector<1x1x8x24x4xf32>
    %13 = vector.shape_cast %12 : vector<1x1x8x24x4xf32> to vector<8x24x4xf32>
    %14 = vector.shape_cast %13 : vector<8x24x4xf32> to vector<192x4xf32>
    %c0_22 = arith.constant 0 : index
    %c0_23 = arith.constant 0 : index
    %c2_24 = arith.constant 2 : index
    %c0_25 = arith.constant 0 : index
    %c0_26 = arith.constant 0 : index
    %15 = vector.load %arg3[%c0_22, %c0_23, %c2_24, %c0_25, %c0_26] : memref<1x1x10x24x4xf32, #tpu.memory_space<vmem>>, vector<1x1x8x24x4xf32>
    %16 = vector.shape_cast %15 : vector<1x1x8x24x4xf32> to vector<8x24x4xf32>
    %17 = vector.shape_cast %16 : vector<8x24x4xf32> to vector<192x4xf32>
    %cst = arith.constant 0.000000e+00 : f32
    %18 = vector.broadcast %cst : f32 to vector<8x16x8xf32>
    %cst_27 = arith.constant 0.000000e+00 : f32
    %19 = vector.broadcast %cst_27 : f32 to vector<192x8xf32>
    %c0_28 = arith.constant 0 : index
    %c0_29 = arith.constant 0 : index
    %c0_30 = arith.constant 0 : index
    %c0_31 = arith.constant 0 : index
    %20 = vector.load %arg4[%c0_28, %c0_29, %c0_30, %c0_31] : memref<3x3x8x8xf32, #tpu.memory_space<vmem>>, vector<1x1x8x8xf32>
    %21 = vector.shape_cast %20 : vector<1x1x8x8xf32> to vector<8x8xf32>
    %cst_32 = arith.constant dense<0.000000e+00> : vector<192x8xf32>
    %22 = tpu.matmul %2, %21, %cst_32 {dimension_numbers = #tpu.dot_dimension_numbers<[1], [0], [0], [1], [0, 0, 1, 1], [], []>} : vector<192x8xf32>, vector<8x8xf32>, vector<192x8xf32> -> vector<192x8xf32>
    %23 = arith.addf %19, %22 : vector<192x8xf32>
    %c0_33 = arith.constant 0 : index
    %c0_34 = arith.constant 0 : index
    %c0_35 = arith.constant 0 : index
    %c0_36 = arith.constant 0 : index
    %24 = vector.load %arg5[%c0_33, %c0_34, %c0_35, %c0_36] : memref<3x3x4x8xf32, #tpu.memory_space<vmem>>, vector<1x1x4x8xf32>
    %25 = vector.shape_cast %24 : vector<1x1x4x8xf32> to vector<4x8xf32>
    %cst_37 = arith.constant dense<0.000000e+00> : vector<192x8xf32>
    %26 = tpu.matmul %11, %25, %cst_37 {dimension_numbers = #tpu.dot_dimension_numbers<[1], [0], [0], [1], [0, 0, 1, 1], [], []>} : vector<192x4xf32>, vector<4x8xf32>, vector<192x8xf32> -> vector<192x8xf32>
    %27 = arith.addf %23, %26 : vector<192x8xf32>
    %c1_38 = arith.constant 1 : index
    %c0_39 = arith.constant 0 : index
    %c0_40 = arith.constant 0 : index
    %c0_41 = arith.constant 0 : index
    %28 = vector.load %arg4[%c1_38, %c0_39, %c0_40, %c0_41] : memref<3x3x8x8xf32, #tpu.memory_space<vmem>>, vector<1x1x8x8xf32>
    %29 = vector.shape_cast %28 : vector<1x1x8x8xf32> to vector<8x8xf32>
    %cst_42 = arith.constant dense<0.000000e+00> : vector<192x8xf32>
    %30 = tpu.matmul %5, %29, %cst_42 {dimension_numbers = #tpu.dot_dimension_numbers<[1], [0], [0], [1], [0, 0, 1, 1], [], []>} : vector<192x8xf32>, vector<8x8xf32>, vector<192x8xf32> -> vector<192x8xf32>
    %31 = arith.addf %27, %30 : vector<192x8xf32>
    %c1_43 = arith.constant 1 : index
    %c0_44 = arith.constant 0 : index
    %c0_45 = arith.constant 0 : index
    %c0_46 = arith.constant 0 : index
    %32 = vector.load %arg5[%c1_43, %c0_44, %c0_45, %c0_46] : memref<3x3x4x8xf32, #tpu.memory_space<vmem>>, vector<1x1x4x8xf32>
    %33 = vector.shape_cast %32 : vector<1x1x4x8xf32> to vector<4x8xf32>
    %cst_47 = arith.constant dense<0.000000e+00> : vector<192x8xf32>
    %34 = tpu.matmul %14, %33, %cst_47 {dimension_numbers = #tpu.dot_dimension_numbers<[1], [0], [0], [1], [0, 0, 1, 1], [], []>} : vector<192x4xf32>, vector<4x8xf32>, vector<192x8xf32> -> vector<192x8xf32>
    %35 = arith.addf %31, %34 : vector<192x8xf32>
    %c2_48 = arith.constant 2 : index
    %c0_49 = arith.constant 0 : index
    %c0_50 = arith.constant 0 : index
    %c0_51 = arith.constant 0 : index
    %36 = vector.load %arg4[%c2_48, %c0_49, %c0_50, %c0_51] : memref<3x3x8x8xf32, #tpu.memory_space<vmem>>, vector<1x1x8x8xf32>
    %37 = vector.shape_cast %36 : vector<1x1x8x8xf32> to vector<8x8xf32>
    %cst_52 = arith.constant dense<0.000000e+00> : vector<192x8xf32>
    %38 = tpu.matmul %8, %37, %cst_52 {dimension_numbers = #tpu.dot_dimension_numbers<[1], [0], [0], [1], [0, 0, 1, 1], [], []>} : vector<192x8xf32>, vector<8x8xf32>, vector<192x8xf32> -> vector<192x8xf32>
    %39 = arith.addf %35, %38 : vector<192x8xf32>
    %c2_53 = arith.constant 2 : index
    %c0_54 = arith.constant 0 : index
    %c0_55 = arith.constant 0 : index
    %c0_56 = arith.constant 0 : index
    %40 = vector.load %arg5[%c2_53, %c0_54, %c0_55, %c0_56] : memref<3x3x4x8xf32, #tpu.memory_space<vmem>>, vector<1x1x4x8xf32>
    %41 = vector.shape_cast %40 : vector<1x1x4x8xf32> to vector<4x8xf32>
    %cst_57 = arith.constant dense<0.000000e+00> : vector<192x8xf32>
    %42 = tpu.matmul %17, %41, %cst_57 {dimension_numbers = #tpu.dot_dimension_numbers<[1], [0], [0], [1], [0, 0, 1, 1], [], []>} : vector<192x4xf32>, vector<4x8xf32>, vector<192x8xf32> -> vector<192x8xf32>
    %43 = arith.addf %39, %42 : vector<192x8xf32>
    %44 = vector.shape_cast %43 : vector<192x8xf32> to vector<8x24x8xf32>
    %45 = vector.extract_strided_slice %44 {offsets = [0, 0, 0], sizes = [8, 16, 8], strides = [1, 1, 1]} : vector<8x24x8xf32> to vector<8x16x8xf32>
    %46 = arith.addf %18, %45 : vector<8x16x8xf32>
    %cst_58 = arith.constant 0.000000e+00 : f32
    %47 = vector.broadcast %cst_58 : f32 to vector<192x8xf32>
    %c0_59 = arith.constant 0 : index
    %c1_60 = arith.constant 1 : index
    %c0_61 = arith.constant 0 : index
    %c0_62 = arith.constant 0 : index
    %48 = vector.load %arg4[%c0_59, %c1_60, %c0_61, %c0_62] : memref<3x3x8x8xf32, #tpu.memory_space<vmem>>, vector<1x1x8x8xf32>
    %49 = vector.shape_cast %48 : vector<1x1x8x8xf32> to vector<8x8xf32>
    %cst_63 = arith.constant dense<0.000000e+00> : vector<192x8xf32>
    %50 = tpu.matmul %2, %49, %cst_63 {dimension_numbers = #tpu.dot_dimension_numbers<[1], [0], [0], [1], [0, 0, 1, 1], [], []>} : vector<192x8xf32>, vector<8x8xf32>, vector<192x8xf32> -> vector<192x8xf32>
    %51 = arith.addf %47, %50 : vector<192x8xf32>
    %c0_64 = arith.constant 0 : index
    %c1_65 = arith.constant 1 : index
    %c0_66 = arith.constant 0 : index
    %c0_67 = arith.constant 0 : index
    %52 = vector.load %arg5[%c0_64, %c1_65, %c0_66, %c0_67] : memref<3x3x4x8xf32, #tpu.memory_space<vmem>>, vector<1x1x4x8xf32>
    %53 = vector.shape_cast %52 : vector<1x1x4x8xf32> to vector<4x8xf32>
    %cst_68 = arith.constant dense<0.000000e+00> : vector<192x8xf32>
    %54 = tpu.matmul %11, %53, %cst_68 {dimension_numbers = #tpu.dot_dimension_numbers<[1], [0], [0], [1], [0, 0, 1, 1], [], []>} : vector<192x4xf32>, vector<4x8xf32>, vector<192x8xf32> -> vector<192x8xf32>
    %55 = arith.addf %51, %54 : vector<192x8xf32>
    %c1_69 = arith.constant 1 : index
    %c1_70 = arith.constant 1 : index
    %c0_71 = arith.constant 0 : index
    %c0_72 = arith.constant 0 : index
    %56 = vector.load %arg4[%c1_69, %c1_70, %c0_71, %c0_72] : memref<3x3x8x8xf32, #tpu.memory_space<vmem>>, vector<1x1x8x8xf32>
    %57 = vector.shape_cast %56 : vector<1x1x8x8xf32> to vector<8x8xf32>
    %cst_73 = arith.constant dense<0.000000e+00> : vector<192x8xf32>
    %58 = tpu.matmul %5, %57, %cst_73 {dimension_numbers = #tpu.dot_dimension_numbers<[1], [0], [0], [1], [0, 0, 1, 1], [], []>} : vector<192x8xf32>, vector<8x8xf32>, vector<192x8xf32> -> vector<192x8xf32>
    %59 = arith.addf %55, %58 : vector<192x8xf32>
    %c1_74 = arith.constant 1 : index
    %c1_75 = arith.constant 1 : index
    %c0_76 = arith.constant 0 : index
    %c0_77 = arith.constant 0 : index
    %60 = vector.load %arg5[%c1_74, %c1_75, %c0_76, %c0_77] : memref<3x3x4x8xf32, #tpu.memory_space<vmem>>, vector<1x1x4x8xf32>
    %61 = vector.shape_cast %60 : vector<1x1x4x8xf32> to vector<4x8xf32>
    %cst_78 = arith.constant dense<0.000000e+00> : vector<192x8xf32>
    %62 = tpu.matmul %14, %61, %cst_78 {dimension_numbers = #tpu.dot_dimension_numbers<[1], [0], [0], [1], [0, 0, 1, 1], [], []>} : vector<192x4xf32>, vector<4x8xf32>, vector<192x8xf32> -> vector<192x8xf32>
    %63 = arith.addf %59, %62 : vector<192x8xf32>
    %c2_79 = arith.constant 2 : index
    %c1_80 = arith.constant 1 : index
    %c0_81 = arith.constant 0 : index
    %c0_82 = arith.constant 0 : index
    %64 = vector.load %arg4[%c2_79, %c1_80, %c0_81, %c0_82] : memref<3x3x8x8xf32, #tpu.memory_space<vmem>>, vector<1x1x8x8xf32>
    %65 = vector.shape_cast %64 : vector<1x1x8x8xf32> to vector<8x8xf32>
    %cst_83 = arith.constant dense<0.000000e+00> : vector<192x8xf32>
    %66 = tpu.matmul %8, %65, %cst_83 {dimension_numbers = #tpu.dot_dimension_numbers<[1], [0], [0], [1], [0, 0, 1, 1], [], []>} : vector<192x8xf32>, vector<8x8xf32>, vector<192x8xf32> -> vector<192x8xf32>
    %67 = arith.addf %63, %66 : vector<192x8xf32>
    %c2_84 = arith.constant 2 : index
    %c1_85 = arith.constant 1 : index
    %c0_86 = arith.constant 0 : index
    %c0_87 = arith.constant 0 : index
    %68 = vector.load %arg5[%c2_84, %c1_85, %c0_86, %c0_87] : memref<3x3x4x8xf32, #tpu.memory_space<vmem>>, vector<1x1x4x8xf32>
    %69 = vector.shape_cast %68 : vector<1x1x4x8xf32> to vector<4x8xf32>
    %cst_88 = arith.constant dense<0.000000e+00> : vector<192x8xf32>
    %70 = tpu.matmul %17, %69, %cst_88 {dimension_numbers = #tpu.dot_dimension_numbers<[1], [0], [0], [1], [0, 0, 1, 1], [], []>} : vector<192x4xf32>, vector<4x8xf32>, vector<192x8xf32> -> vector<192x8xf32>
    %71 = arith.addf %67, %70 : vector<192x8xf32>
    %72 = vector.shape_cast %71 : vector<192x8xf32> to vector<8x24x8xf32>
    %73 = vector.extract_strided_slice %72 {offsets = [0, 1, 0], sizes = [8, 16, 8], strides = [1, 1, 1]} : vector<8x24x8xf32> to vector<8x16x8xf32>
    %74 = arith.addf %46, %73 : vector<8x16x8xf32>
    %cst_89 = arith.constant 0.000000e+00 : f32
    %75 = vector.broadcast %cst_89 : f32 to vector<192x8xf32>
    %c0_90 = arith.constant 0 : index
    %c2_91 = arith.constant 2 : index
    %c0_92 = arith.constant 0 : index
    %c0_93 = arith.constant 0 : index
    %76 = vector.load %arg4[%c0_90, %c2_91, %c0_92, %c0_93] : memref<3x3x8x8xf32, #tpu.memory_space<vmem>>, vector<1x1x8x8xf32>
    %77 = vector.shape_cast %76 : vector<1x1x8x8xf32> to vector<8x8xf32>
    %cst_94 = arith.constant dense<0.000000e+00> : vector<192x8xf32>
    %78 = tpu.matmul %2, %77, %cst_94 {dimension_numbers = #tpu.dot_dimension_numbers<[1], [0], [0], [1], [0, 0, 1, 1], [], []>} : vector<192x8xf32>, vector<8x8xf32>, vector<192x8xf32> -> vector<192x8xf32>
    %79 = arith.addf %75, %78 : vector<192x8xf32>
    %c0_95 = arith.constant 0 : index
    %c2_96 = arith.constant 2 : index
    %c0_97 = arith.constant 0 : index
    %c0_98 = arith.constant 0 : index
    %80 = vector.load %arg5[%c0_95, %c2_96, %c0_97, %c0_98] : memref<3x3x4x8xf32, #tpu.memory_space<vmem>>, vector<1x1x4x8xf32>
    %81 = vector.shape_cast %80 : vector<1x1x4x8xf32> to vector<4x8xf32>
    %cst_99 = arith.constant dense<0.000000e+00> : vector<192x8xf32>
    %82 = tpu.matmul %11, %81, %cst_99 {dimension_numbers = #tpu.dot_dimension_numbers<[1], [0], [0], [1], [0, 0, 1, 1], [], []>} : vector<192x4xf32>, vector<4x8xf32>, vector<192x8xf32> -> vector<192x8xf32>
    %83 = arith.addf %79, %82 : vector<192x8xf32>
    %c1_100 = arith.constant 1 : index
    %c2_101 = arith.constant 2 : index
    %c0_102 = arith.constant 0 : index
    %c0_103 = arith.constant 0 : index
    %84 = vector.load %arg4[%c1_100, %c2_101, %c0_102, %c0_103] : memref<3x3x8x8xf32, #tpu.memory_space<vmem>>, vector<1x1x8x8xf32>
    %85 = vector.shape_cast %84 : vector<1x1x8x8xf32> to vector<8x8xf32>
    %cst_104 = arith.constant dense<0.000000e+00> : vector<192x8xf32>
    %86 = tpu.matmul %5, %85, %cst_104 {dimension_numbers = #tpu.dot_dimension_numbers<[1], [0], [0], [1], [0, 0, 1, 1], [], []>} : vector<192x8xf32>, vector<8x8xf32>, vector<192x8xf32> -> vector<192x8xf32>
    %87 = arith.addf %83, %86 : vector<192x8xf32>
    %c1_105 = arith.constant 1 : index
    %c2_106 = arith.constant 2 : index
    %c0_107 = arith.constant 0 : index
    %c0_108 = arith.constant 0 : index
    %88 = vector.load %arg5[%c1_105, %c2_106, %c0_107, %c0_108] : memref<3x3x4x8xf32, #tpu.memory_space<vmem>>, vector<1x1x4x8xf32>
    %89 = vector.shape_cast %88 : vector<1x1x4x8xf32> to vector<4x8xf32>
    %cst_109 = arith.constant dense<0.000000e+00> : vector<192x8xf32>
    %90 = tpu.matmul %14, %89, %cst_109 {dimension_numbers = #tpu.dot_dimension_numbers<[1], [0], [0], [1], [0, 0, 1, 1], [], []>} : vector<192x4xf32>, vector<4x8xf32>, vector<192x8xf32> -> vector<192x8xf32>
    %91 = arith.addf %87, %90 : vector<192x8xf32>
    %c2_110 = arith.constant 2 : index
    %c2_111 = arith.constant 2 : index
    %c0_112 = arith.constant 0 : index
    %c0_113 = arith.constant 0 : index
    %92 = vector.load %arg4[%c2_110, %c2_111, %c0_112, %c0_113] : memref<3x3x8x8xf32, #tpu.memory_space<vmem>>, vector<1x1x8x8xf32>
    %93 = vector.shape_cast %92 : vector<1x1x8x8xf32> to vector<8x8xf32>
    %cst_114 = arith.constant dense<0.000000e+00> : vector<192x8xf32>
    %94 = tpu.matmul %8, %93, %cst_114 {dimension_numbers = #tpu.dot_dimension_numbers<[1], [0], [0], [1], [0, 0, 1, 1], [], []>} : vector<192x8xf32>, vector<8x8xf32>, vector<192x8xf32> -> vector<192x8xf32>
    %95 = arith.addf %91, %94 : vector<192x8xf32>
    %c2_115 = arith.constant 2 : index
    %c2_116 = arith.constant 2 : index
    %c0_117 = arith.constant 0 : index
    %c0_118 = arith.constant 0 : index
    %96 = vector.load %arg5[%c2_115, %c2_116, %c0_117, %c0_118] : memref<3x3x4x8xf32, #tpu.memory_space<vmem>>, vector<1x1x4x8xf32>
    %97 = vector.shape_cast %96 : vector<1x1x4x8xf32> to vector<4x8xf32>
    %cst_119 = arith.constant dense<0.000000e+00> : vector<192x8xf32>
    %98 = tpu.matmul %17, %97, %cst_119 {dimension_numbers = #tpu.dot_dimension_numbers<[1], [0], [0], [1], [0, 0, 1, 1], [], []>} : vector<192x4xf32>, vector<4x8xf32>, vector<192x8xf32> -> vector<192x8xf32>
    %99 = arith.addf %95, %98 : vector<192x8xf32>
    %100 = vector.shape_cast %99 : vector<192x8xf32> to vector<8x24x8xf32>
    %101 = vector.extract_strided_slice %100 {offsets = [0, 2, 0], sizes = [8, 16, 8], strides = [1, 1, 1]} : vector<8x24x8xf32> to vector<8x16x8xf32>
    %102 = arith.addf %74, %101 : vector<8x16x8xf32>
    %c0_120 = arith.constant 0 : index
    %c0_121 = arith.constant 0 : index
    %103 = vector.load %arg6[%c0_120, %c0_121] : memref<1x8xf32, #tpu.memory_space<vmem>>, vector<1x8xf32>
    %104 = vector.shape_cast %103 : vector<1x8xf32> to vector<1x1x8xf32>
    %105 = vector.broadcast %104 : vector<1x1x8xf32> to vector<8x16x8xf32>
    %106 = arith.addf %102, %105 : vector<8x16x8xf32>
    %cst_122 = arith.constant 0.000000e+00 : f32
    %107 = vector.broadcast %cst_122 : f32 to vector<8x16x8xf32>
    %108 = arith.maximumf %106, %107 : vector<8x16x8xf32>
    %109 = vector.shape_cast %108 : vector<8x16x8xf32> to vector<1x8x16x8xf32>
    %c0_123 = arith.constant 0 : index
    %c0_124 = arith.constant 0 : index
    %c0_125 = arith.constant 0 : index
    %c0_126 = arith.constant 0 : index
    %110 = vector.load %arg7[%c0_123, %c0_124, %c0_125, %c0_126] : memref<1x8x16x8xf32, #tpu.memory_space<vmem>>, vector<1x8x16x8xf32>
    tpu.vector_store %arg7[%c0_123, %c0_124, %c0_125, %c0_126], %109 {strides = array<i32>} : memref<1x8x16x8xf32, #tpu.memory_space<vmem>>, vector<1x8x16x8xf32>,
    return
  }
  func.func @transform_0(%arg0: i32, %arg1: i32) -> (i32, i32, i32, i32, i32) {
    %c0_i32 = arith.constant 0 : i32
    %c0_i32_0 = arith.constant 0 : i32
    %c0_i32_1 = arith.constant 0 : i32
    %c0_i32_2 = arith.constant 0 : i32
    return %arg0, %arg1, %c0_i32, %c0_i32_0, %c0_i32_1 : i32, i32, i32, i32, i32
  }
  func.func @transform_1(%arg0: i32, %arg1: i32) -> (i32, i32, i32, i32, i32) {
    %c0_i32 = arith.constant 0 : i32
    %c0_i32_0 = arith.constant 0 : i32
    %c0_i32_1 = arith.constant 0 : i32
    %c0_i32_2 = arith.constant 0 : i32
    return %arg0, %arg1, %c0_i32, %c0_i32_0, %c0_i32_1 : i32, i32, i32, i32, i32
  }
  func.func @transform_2(%arg0: i32, %arg1: i32) -> (i32, i32, i32, i32) {
    %c0_i32 = arith.constant 0 : i32
    %c0_i32_0 = arith.constant 0 : i32
    %c0_i32_1 = arith.constant 0 : i32
    %c0_i32_2 = arith.constant 0 : i32
    %c0_i32_3 = arith.constant 0 : i32
    return %c0_i32, %c0_i32_0, %c0_i32_1, %c0_i32_2 : i32, i32, i32, i32
  }
  func.func @transform_3(%arg0: i32, %arg1: i32) -> (i32, i32, i32, i32) {
    %c0_i32 = arith.constant 0 : i32
    %c0_i32_0 = arith.constant 0 : i32
    %c0_i32_1 = arith.constant 0 : i32
    %c0_i32_2 = arith.constant 0 : i32
    %c0_i32_3 = arith.constant 0 : i32
    return %c0_i32, %c0_i32_0, %c0_i32_1, %c0_i32_2 : i32, i32, i32, i32
  }
  func.func @transform_4(%arg0: i32, %arg1: i32) -> (i32, i32) {
    %c0_i32 = arith.constant 0 : i32
    %c0_i32_0 = arith.constant 0 : i32
    %c0_i32_1 = arith.constant 0 : i32
    return %c0_i32, %c0_i32_0 : i32, i32
  }
  func.func @transform_5(%arg0: i32, %arg1: i32) -> (i32, i32, i32, i32) {
    %c0_i32 = arith.constant 0 : i32
    %c0_i32_0 = arith.constant 0 : i32
    %c0_i32_1 = arith.constant 0 : i32
    return %arg0, %arg1, %c0_i32, %c0_i32_0 : i32, i32, i32, i32
  }
}

module attributes {stable_mosaic.version = 11 : i64} {
  func.func @_conv3x3_bn_relu_kernel(%arg0: i32, %arg1: i32, %arg2: memref<1x1x10x24x8xf32, #tpu.memory_space<vmem>>, %arg3: memref<3x3x8x8xf32, #tpu.memory_space<vmem>>, %arg4: memref<1x8xf32, #tpu.memory_space<vmem>>, %arg5: memref<1x8x16x8xf32, #tpu.memory_space<vmem>>) attributes {dimension_semantics = [#tpu.dimension_semantics<parallel>, #tpu.dimension_semantics<parallel>], iteration_bounds = array<i64: 2, 2>, scalar_prefetch = 0 : i64, scratch_operands = 0 : i64, tpu.core_type = #tpu.core_type<tc>, window_params = [{transform_indices = @transform_0, window_bounds = array<i64: 1, 1, 10, 24, 8>}, {pipeline_mode = #tpu.pipeline_mode<synchronous>, transform_indices = @transform_1, window_bounds = array<i64: 3, 3, 8, 8>}, {pipeline_mode = #tpu.pipeline_mode<synchronous>, transform_indices = @transform_2, window_bounds = array<i64: 1, 8>}, {transform_indices = @transform_3, window_bounds = array<i64: 1, 8, 16, 8>}]} {
    %c0 = arith.constant 0 : index
    %c0_0 = arith.constant 0 : index
    %c0_1 = arith.constant 0 : index
    %c0_2 = arith.constant 0 : index
    %c0_3 = arith.constant 0 : index
    %0 = vector.load %arg2[%c0, %c0_0, %c0_1, %c0_2, %c0_3] : memref<1x1x10x24x8xf32, #tpu.memory_space<vmem>>, vector<1x1x8x24x8xf32>
    %1 = vector.shape_cast %0 : vector<1x1x8x24x8xf32> to vector<8x24x8xf32>
    %2 = vector.shape_cast %1 : vector<8x24x8xf32> to vector<192x8xf32>
    %c0_4 = arith.constant 0 : index
    %c0_5 = arith.constant 0 : index
    %c1 = arith.constant 1 : index
    %c0_6 = arith.constant 0 : index
    %c0_7 = arith.constant 0 : index
    %3 = vector.load %arg2[%c0_4, %c0_5, %c1, %c0_6, %c0_7] : memref<1x1x10x24x8xf32, #tpu.memory_space<vmem>>, vector<1x1x8x24x8xf32>
    %4 = vector.shape_cast %3 : vector<1x1x8x24x8xf32> to vector<8x24x8xf32>
    %5 = vector.shape_cast %4 : vector<8x24x8xf32> to vector<192x8xf32>
    %c0_8 = arith.constant 0 : index
    %c0_9 = arith.constant 0 : index
    %c2 = arith.constant 2 : index
    %c0_10 = arith.constant 0 : index
    %c0_11 = arith.constant 0 : index
    %6 = vector.load %arg2[%c0_8, %c0_9, %c2, %c0_10, %c0_11] : memref<1x1x10x24x8xf32, #tpu.memory_space<vmem>>, vector<1x1x8x24x8xf32>
    %7 = vector.shape_cast %6 : vector<1x1x8x24x8xf32> to vector<8x24x8xf32>
    %8 = vector.shape_cast %7 : vector<8x24x8xf32> to vector<192x8xf32>
    %cst = arith.constant 0.000000e+00 : f32
    %9 = vector.broadcast %cst : f32 to vector<8x16x8xf32>
    %cst_12 = arith.constant 0.000000e+00 : f32
    %10 = vector.broadcast %cst_12 : f32 to vector<192x8xf32>
    %c0_13 = arith.constant 0 : index
    %c0_14 = arith.constant 0 : index
    %c0_15 = arith.constant 0 : index
    %c0_16 = arith.constant 0 : index
    %11 = vector.load %arg3[%c0_13, %c0_14, %c0_15, %c0_16] : memref<3x3x8x8xf32, #tpu.memory_space<vmem>>, vector<1x1x8x8xf32>
    %12 = vector.shape_cast %11 : vector<1x1x8x8xf32> to vector<8x8xf32>
    %cst_17 = arith.constant dense<0.000000e+00> : vector<192x8xf32>
    %13 = tpu.matmul %2, %12, %cst_17 {dimension_numbers = #tpu.dot_dimension_numbers<[1], [0], [0], [1], [0, 0, 1, 1], [], []>} : vector<192x8xf32>, vector<8x8xf32>, vector<192x8xf32> -> vector<192x8xf32>
    %14 = arith.addf %10, %13 : vector<192x8xf32>
    %c1_18 = arith.constant 1 : index
    %c0_19 = arith.constant 0 : index
    %c0_20 = arith.constant 0 : index
    %c0_21 = arith.constant 0 : index
    %15 = vector.load %arg3[%c1_18, %c0_19, %c0_20, %c0_21] : memref<3x3x8x8xf32, #tpu.memory_space<vmem>>, vector<1x1x8x8xf32>
    %16 = vector.shape_cast %15 : vector<1x1x8x8xf32> to vector<8x8xf32>
    %cst_22 = arith.constant dense<0.000000e+00> : vector<192x8xf32>
    %17 = tpu.matmul %5, %16, %cst_22 {dimension_numbers = #tpu.dot_dimension_numbers<[1], [0], [0], [1], [0, 0, 1, 1], [], []>} : vector<192x8xf32>, vector<8x8xf32>, vector<192x8xf32> -> vector<192x8xf32>
    %18 = arith.addf %14, %17 : vector<192x8xf32>
    %c2_23 = arith.constant 2 : index
    %c0_24 = arith.constant 0 : index
    %c0_25 = arith.constant 0 : index
    %c0_26 = arith.constant 0 : index
    %19 = vector.load %arg3[%c2_23, %c0_24, %c0_25, %c0_26] : memref<3x3x8x8xf32, #tpu.memory_space<vmem>>, vector<1x1x8x8xf32>
    %20 = vector.shape_cast %19 : vector<1x1x8x8xf32> to vector<8x8xf32>
    %cst_27 = arith.constant dense<0.000000e+00> : vector<192x8xf32>
    %21 = tpu.matmul %8, %20, %cst_27 {dimension_numbers = #tpu.dot_dimension_numbers<[1], [0], [0], [1], [0, 0, 1, 1], [], []>} : vector<192x8xf32>, vector<8x8xf32>, vector<192x8xf32> -> vector<192x8xf32>
    %22 = arith.addf %18, %21 : vector<192x8xf32>
    %23 = vector.shape_cast %22 : vector<192x8xf32> to vector<8x24x8xf32>
    %24 = vector.extract_strided_slice %23 {offsets = [0, 0, 0], sizes = [8, 16, 8], strides = [1, 1, 1]} : vector<8x24x8xf32> to vector<8x16x8xf32>
    %25 = arith.addf %9, %24 : vector<8x16x8xf32>
    %cst_28 = arith.constant 0.000000e+00 : f32
    %26 = vector.broadcast %cst_28 : f32 to vector<192x8xf32>
    %c0_29 = arith.constant 0 : index
    %c1_30 = arith.constant 1 : index
    %c0_31 = arith.constant 0 : index
    %c0_32 = arith.constant 0 : index
    %27 = vector.load %arg3[%c0_29, %c1_30, %c0_31, %c0_32] : memref<3x3x8x8xf32, #tpu.memory_space<vmem>>, vector<1x1x8x8xf32>
    %28 = vector.shape_cast %27 : vector<1x1x8x8xf32> to vector<8x8xf32>
    %cst_33 = arith.constant dense<0.000000e+00> : vector<192x8xf32>
    %29 = tpu.matmul %2, %28, %cst_33 {dimension_numbers = #tpu.dot_dimension_numbers<[1], [0], [0], [1], [0, 0, 1, 1], [], []>} : vector<192x8xf32>, vector<8x8xf32>, vector<192x8xf32> -> vector<192x8xf32>
    %30 = arith.addf %26, %29 : vector<192x8xf32>
    %c1_34 = arith.constant 1 : index
    %c1_35 = arith.constant 1 : index
    %c0_36 = arith.constant 0 : index
    %c0_37 = arith.constant 0 : index
    %31 = vector.load %arg3[%c1_34, %c1_35, %c0_36, %c0_37] : memref<3x3x8x8xf32, #tpu.memory_space<vmem>>, vector<1x1x8x8xf32>
    %32 = vector.shape_cast %31 : vector<1x1x8x8xf32> to vector<8x8xf32>
    %cst_38 = arith.constant dense<0.000000e+00> : vector<192x8xf32>
    %33 = tpu.matmul %5, %32, %cst_38 {dimension_numbers = #tpu.dot_dimension_numbers<[1], [0], [0], [1], [0, 0, 1, 1], [], []>} : vector<192x8xf32>, vector<8x8xf32>, vector<192x8xf32> -> vector<192x8xf32>
    %34 = arith.addf %30, %33 : vector<192x8xf32>
    %c2_39 = arith.constant 2 : index
    %c1_40 = arith.constant 1 : index
    %c0_41 = arith.constant 0 : index
    %c0_42 = arith.constant 0 : index
    %35 = vector.load %arg3[%c2_39, %c1_40, %c0_41, %c0_42] : memref<3x3x8x8xf32, #tpu.memory_space<vmem>>, vector<1x1x8x8xf32>
    %36 = vector.shape_cast %35 : vector<1x1x8x8xf32> to vector<8x8xf32>
    %cst_43 = arith.constant dense<0.000000e+00> : vector<192x8xf32>
    %37 = tpu.matmul %8, %36, %cst_43 {dimension_numbers = #tpu.dot_dimension_numbers<[1], [0], [0], [1], [0, 0, 1, 1], [], []>} : vector<192x8xf32>, vector<8x8xf32>, vector<192x8xf32> -> vector<192x8xf32>
    %38 = arith.addf %34, %37 : vector<192x8xf32>
    %39 = vector.shape_cast %38 : vector<192x8xf32> to vector<8x24x8xf32>
    %40 = vector.extract_strided_slice %39 {offsets = [0, 1, 0], sizes = [8, 16, 8], strides = [1, 1, 1]} : vector<8x24x8xf32> to vector<8x16x8xf32>
    %41 = arith.addf %25, %40 : vector<8x16x8xf32>
    %cst_44 = arith.constant 0.000000e+00 : f32
    %42 = vector.broadcast %cst_44 : f32 to vector<192x8xf32>
    %c0_45 = arith.constant 0 : index
    %c2_46 = arith.constant 2 : index
    %c0_47 = arith.constant 0 : index
    %c0_48 = arith.constant 0 : index
    %43 = vector.load %arg3[%c0_45, %c2_46, %c0_47, %c0_48] : memref<3x3x8x8xf32, #tpu.memory_space<vmem>>, vector<1x1x8x8xf32>
    %44 = vector.shape_cast %43 : vector<1x1x8x8xf32> to vector<8x8xf32>
    %cst_49 = arith.constant dense<0.000000e+00> : vector<192x8xf32>
    %45 = tpu.matmul %2, %44, %cst_49 {dimension_numbers = #tpu.dot_dimension_numbers<[1], [0], [0], [1], [0, 0, 1, 1], [], []>} : vector<192x8xf32>, vector<8x8xf32>, vector<192x8xf32> -> vector<192x8xf32>
    %46 = arith.addf %42, %45 : vector<192x8xf32>
    %c1_50 = arith.constant 1 : index
    %c2_51 = arith.constant 2 : index
    %c0_52 = arith.constant 0 : index
    %c0_53 = arith.constant 0 : index
    %47 = vector.load %arg3[%c1_50, %c2_51, %c0_52, %c0_53] : memref<3x3x8x8xf32, #tpu.memory_space<vmem>>, vector<1x1x8x8xf32>
    %48 = vector.shape_cast %47 : vector<1x1x8x8xf32> to vector<8x8xf32>
    %cst_54 = arith.constant dense<0.000000e+00> : vector<192x8xf32>
    %49 = tpu.matmul %5, %48, %cst_54 {dimension_numbers = #tpu.dot_dimension_numbers<[1], [0], [0], [1], [0, 0, 1, 1], [], []>} : vector<192x8xf32>, vector<8x8xf32>, vector<192x8xf32> -> vector<192x8xf32>
    %50 = arith.addf %46, %49 : vector<192x8xf32>
    %c2_55 = arith.constant 2 : index
    %c2_56 = arith.constant 2 : index
    %c0_57 = arith.constant 0 : index
    %c0_58 = arith.constant 0 : index
    %51 = vector.load %arg3[%c2_55, %c2_56, %c0_57, %c0_58] : memref<3x3x8x8xf32, #tpu.memory_space<vmem>>, vector<1x1x8x8xf32>
    %52 = vector.shape_cast %51 : vector<1x1x8x8xf32> to vector<8x8xf32>
    %cst_59 = arith.constant dense<0.000000e+00> : vector<192x8xf32>
    %53 = tpu.matmul %8, %52, %cst_59 {dimension_numbers = #tpu.dot_dimension_numbers<[1], [0], [0], [1], [0, 0, 1, 1], [], []>} : vector<192x8xf32>, vector<8x8xf32>, vector<192x8xf32> -> vector<192x8xf32>
    %54 = arith.addf %50, %53 : vector<192x8xf32>
    %55 = vector.shape_cast %54 : vector<192x8xf32> to vector<8x24x8xf32>
    %56 = vector.extract_strided_slice %55 {offsets = [0, 2, 0], sizes = [8, 16, 8], strides = [1, 1, 1]} : vector<8x24x8xf32> to vector<8x16x8xf32>
    %57 = arith.addf %41, %56 : vector<8x16x8xf32>
    %c0_60 = arith.constant 0 : index
    %c0_61 = arith.constant 0 : index
    %58 = vector.load %arg4[%c0_60, %c0_61] : memref<1x8xf32, #tpu.memory_space<vmem>>, vector<1x8xf32>
    %59 = vector.shape_cast %58 : vector<1x8xf32> to vector<1x1x8xf32>
    %60 = vector.broadcast %59 : vector<1x1x8xf32> to vector<8x16x8xf32>
    %61 = arith.addf %57, %60 : vector<8x16x8xf32>
    %cst_62 = arith.constant 0.000000e+00 : f32
    %62 = vector.broadcast %cst_62 : f32 to vector<8x16x8xf32>
    %63 = arith.maximumf %61, %62 : vector<8x16x8xf32>
    %64 = vector.shape_cast %63 : vector<8x16x8xf32> to vector<1x8x16x8xf32>
    %c0_63 = arith.constant 0 : index
    %c0_64 = arith.constant 0 : index
    %c0_65 = arith.constant 0 : index
    %c0_66 = arith.constant 0 : index
    %65 = vector.load %arg5[%c0_63, %c0_64, %c0_65, %c0_66] : memref<1x8x16x8xf32, #tpu.memory_space<vmem>>, vector<1x8x16x8xf32>
    tpu.vector_store %arg5[%c0_63, %c0_64, %c0_65, %c0_66], %64 {strides = array<i32>} : memref<1x8x16x8xf32, #tpu.memory_space<vmem>>, vector<1x8x16x8xf32>,
    return
  }
  func.func @transform_0(%arg0: i32, %arg1: i32) -> (i32, i32, i32, i32, i32) {
    %c0_i32 = arith.constant 0 : i32
    %c0_i32_0 = arith.constant 0 : i32
    %c0_i32_1 = arith.constant 0 : i32
    %c0_i32_2 = arith.constant 0 : i32
    return %arg0, %arg1, %c0_i32, %c0_i32_0, %c0_i32_1 : i32, i32, i32, i32, i32
  }
  func.func @transform_1(%arg0: i32, %arg1: i32) -> (i32, i32, i32, i32) {
    %c0_i32 = arith.constant 0 : i32
    %c0_i32_0 = arith.constant 0 : i32
    %c0_i32_1 = arith.constant 0 : i32
    %c0_i32_2 = arith.constant 0 : i32
    %c0_i32_3 = arith.constant 0 : i32
    return %c0_i32, %c0_i32_0, %c0_i32_1, %c0_i32_2 : i32, i32, i32, i32
  }
  func.func @transform_2(%arg0: i32, %arg1: i32) -> (i32, i32) {
    %c0_i32 = arith.constant 0 : i32
    %c0_i32_0 = arith.constant 0 : i32
    %c0_i32_1 = arith.constant 0 : i32
    return %c0_i32, %c0_i32_0 : i32, i32
  }
  func.func @transform_3(%arg0: i32, %arg1: i32) -> (i32, i32, i32, i32) {
    %c0_i32 = arith.constant 0 : i32
    %c0_i32_0 = arith.constant 0 : i32
    %c0_i32_1 = arith.constant 0 : i32
    return %arg0, %arg1, %c0_i32, %c0_i32_0 : i32, i32, i32, i32
  }
}

</mosaic_0001>

<bundles_post_ra>
// kernel: tile.8
= control target key start
LH: loop header
LB: loop body
LE: loop exit
PB: predicated region body
PF: predicated region fallthrough
CT: control target
= control target key end

     0   :  { %s22_s0 = inlined_call_operand.vmem [shape: f32[8], index: 0, kind: input, shape index: {}]   ;;  %s23_s1 = inlined_call_operand.vmem [shape: f32[4,8], index: 1, kind: output, shape index: {}]  }
   0x1   :  { %v4_v0 = vld [vmem:[%s22_s0] ss:$0 sm:$0xff] }
   0x2   :  { %5 = vst [vmem:[%s23_s1] sm:$0xf] %v4_v0 }

// kernel: tile.9
= control target key start
LH: loop header
LB: loop body
LE: loop exit
PB: predicated region body
PF: predicated region fallthrough
CT: control target
= control target key end

     0   :  { %vm7_vm0 = vcmask 64512   ;;  %s37_s8 = smov 8   ;;  %s38_s9 = smov 16   ;;  %vm13_vm1 = vcmask 261312   ;;  %vm19_vm2 = vcmask 195712   ;;  %vm25_vm3 = vcmask 130112   ;;  %s55_s0 = inlined_call_operand.vmem [shape: f32[4,8], index: 0, kind: input, shape index: {}]   ;;  %s56_s1 = inlined_call_operand.vmem [shape: f32[1,32], index: 1, kind: output, shape index: {}]  }
   0x1   :  { %v4_v0 = vld [vmem:[%s55_s0] sm:$0xf]  ;;  %s36_s0 = smov 24  }
   0x2   :  { %5 = vst [vmem:[#allocation1] sm:$0xf] %v4_v0 }
   0x9   :  { %v10_v1 = vld [vmem:[#allocation1 + $0x3] sm:$0x1]   ;;  %v22_v2 = vld [vmem:[#allocation1 + $0x1] sm:$0x1]   ;;  %v6_v3 = vld [vmem:[#allocation1] sm:$0x1]  }
   0xa   :  { %11 = vrot.lane.b32.xlu0 %v10_v1, %s36_s0  ;;  %23 = vrot.lane.b32.xlu1 %v22_v2, %s37_s8  ;;  %v16_v4 = vld [vmem:[#allocation1 + $0x2] sm:$0x1]   ;;  %8 = vst.msk [vmem:[#allocation0] sm:$0x1] %vm7_vm0, %v6_v3  }
   0xe   :  { %17 = vrot.lane.b32.xlu0 %v16_v4, %s38_s9 }
  0x7c   :  { %v12_v5 = vpop.permute.xlu0 %11   ;;  %v24_v6 = vpop.permute.xlu1 %23  }
  0x7d   :  { %14 = vst.msk [vmem:[#allocation0] sm:$0x1] %vm13_vm1, %v12_v5  }
  0x80   :  { %v18_v7 = vpop.permute.xlu0 %17  }
  0x81   :  { %20 = vst.msk [vmem:[#allocation0] sm:$0x1] %vm19_vm2, %v18_v7  }
  0x82   :  { %26 = vst.msk [vmem:[#allocation0] sm:$0x1] %vm25_vm3, %v24_v6  }
  0x89   :  { %v30_v8 = vld [vmem:[#allocation0] sm:$0x1] }
  0x8a   :  { %32 = vst [vmem:[%s56_s1] sm:$0x1] %v30_v8 }

// kernel: decoder_block_forward.3
= control target key start
LH: loop header
LB: loop body
LE: loop exit
PB: predicated region body
PF: predicated region fallthrough
CT: control target
= control target key end

     0   :  { %vm38_vm0 = vcmask 64512   ;;  %vm232_vm1 = vcmask 261120   ;;  %s469_s1 = inlined_call_operand.vmem [shape: f32[8,32], index: 1, kind: input, shape index: {}]   ;;  %s470_s0 = inlined_call_operand.vmem [shape: f32[128,8], index: 0, kind: input, shape index: {}]   ;;  %s471_s2 = inlined_call_operand.vmem [shape: f32[1,32], index: 2, kind: input, shape index: {}]   ;;  %s472_s3 = inlined_call_operand.vmem [shape: f32[128,32], index: 3, kind: output, shape index: {}]  }
   0x1   :  { %v30_v0 = vld [vmem:[%s469_s1] sm:$0xff]  ;;  %v15_v3 = vld [vmem:[%s470_s0 + $0x8] sm:$0xff]  ;;  %v16_v5 = vld [vmem:[%s470_s0 + $0x10] sm:$0xff] }
   0x2   :  { %v14_v1 = vld [vmem:[%s470_s0] sm:$0xff]  ;;  %287 = vmatprep.subr.mxu0 %v30_v0  ;;  %313 = vmatprep.subr.mxu1 %v30_v0  ;;  %v23_v4 = vld [vmem:[%s470_s0 + $0x48] sm:$0xff]  ;;  %v24_v6 = vld [vmem:[%s470_s0 + $0x50] sm:$0xff] }
   0x3   :  { %v22_v2 = vld [vmem:[%s470_s0 + $0x40] sm:$0xff]  ;;  %288 = vmatpush3.msra.mxu0 %v30_v0  ;;  %314 = vmatpush3.msra.mxu1 %v30_v0  ;;  %v17_v7 = vld [vmem:[%s470_s0 + $0x18] sm:$0xff]  ;;  %v19_v11 = vld [vmem:[%s470_s0 + $0x28] sm:$0xff] }
   0x4   :  { %289 = vmatprep.mubr.msk.f32.mxu0 %vm38_vm0, %v14_v1  ;;  %301 = vmatprep.mubr.msk.f32.mxu1 %vm38_vm0, %v22_v2  ;;  %v25_v8 = vld [vmem:[%s470_s0 + $0x58] sm:$0xff]  ;;  %v18_v9 = vld [vmem:[%s470_s0 + $0x20] sm:$0xff]  ;;  %v27_v12 = vld [vmem:[%s470_s0 + $0x68] sm:$0xff] }
   0x5   :  { %290 = vmatmul.mubr.msk.f32.vlgmr.msra.gmra.mrb[0].mxu0 %vm38_vm0, %v15_v3  ;;  %302 = vmatmul.mubr.msk.f32.vlgmr.msra.gmra.mrb[0].mxu1 %vm38_vm0, %v23_v4  ;;  %v26_v10 = vld [vmem:[%s470_s0 + $0x60] sm:$0xff]  ;;  %v20_v13 = vld [vmem:[%s470_s0 + $0x30] sm:$0xff]  ;;  %v21_v15 = vld [vmem:[%s470_s0 + $0x38] sm:$0xff] }
   0x6   :  { %292 = vmatprep.mubr.msk.f32.mxu0 %vm38_vm0, %v16_v5  ;;  %304 = vmatprep.mubr.msk.f32.mxu1 %vm38_vm0, %v24_v6  ;;  %v28_v14 = vld [vmem:[%s470_s0 + $0x70] sm:$0xff]  ;;  %v29_v16 = vld [vmem:[%s470_s0 + $0x78] sm:$0xff]  ;;  %v253_v17 = vld [vmem:[%s471_s2] ss:$0 sm:$0xff] }
   0x9   :  { %293 = vmatmul.mubr.msk.f32.gmra.mrb[2].mxu0 %vm38_vm0, %v17_v7  ;;  %305 = vmatmul.mubr.msk.f32.gmra.mrb[2].mxu1 %vm38_vm0, %v25_v8 }
   0xa   :  { %295 = vmatprep.mubr.msk.f32.mxu0 %vm38_vm0, %v18_v9  ;;  %307 = vmatprep.mubr.msk.f32.mxu1 %vm38_vm0, %v26_v10 }
   0xd   :  { %296 = vmatmul.mubr.msk.f32.gmra.mrb[4].mxu0 %vm38_vm0, %v19_v11  ;;  %308 = vmatmul.mubr.msk.f32.gmra.mrb[4].mxu1 %vm38_vm0, %v27_v12 }
   0xe   :  { %298 = vmatprep.mubr.msk.f32.mxu0 %vm38_vm0, %v20_v13  ;;  %310 = vmatprep.mubr.msk.f32.mxu1 %vm38_vm0, %v28_v14 }
  0x11   :  { %299 = vmatmul.mubr.msk.f32.gmra.mrb[6].mxu0 %vm38_vm0, %v21_v15  ;;  %311 = vmatmul.mubr.msk.f32.gmra.mrb[6].mxu1 %vm38_vm0, %v29_v16 }
  0xd8   :  { %v291_v18 = vpop.f32.mrb[0].mxu0  ;;  %v303_v19 = vpop.f32.mrb[0].mxu1 }
  0xd9   :  { %v159_v20 = vadd.f32 %v291_v18, %v253_v17  ;;  %v199_v21 = vadd.f32 %v303_v19, %v253_v17  ;;  %v153_v22 = vpop.f32.mrb[1].mxu0  ;;  %v193_v23 = vpop.f32.mrb[1].mxu1 }
  0xda   :  { %v154_v24 = vadd.f32 %v253_v17, %v153_v22  ;;  %v194_v25 = vadd.f32 %v253_v17, %v193_v23 }
  0xdb   :  { %234 = vst.msk [vmem:[%s472_s3 + $0x8] sm:$0xff] %vm232_vm1, %v159_v20  ;;  %242 = vst.msk [vmem:[%s472_s3 + $0x48] sm:$0xff] %vm232_vm1, %v199_v21 }
  0xdc   :  { %233 = vst.msk [vmem:[%s472_s3] sm:$0xff] %vm232_vm1, %v154_v24  ;;  %241 = vst.msk [vmem:[%s472_s3 + $0x40] sm:$0xff] %vm232_vm1, %v194_v25  ;;  %v294_v26 = vpop.f32.mrb[2].mxu0  ;;  %v306_v27 = vpop.f32.mrb[2].mxu1 }
  0xdd   :  { %v169_v28 = vadd.f32 %v294_v26, %v253_v17  ;;  %v209_v29 = vadd.f32 %v306_v27, %v253_v17  ;;  %v163_v30 = vpop.f32.mrb[3].mxu0  ;;  %v203_v31 = vpop.f32.mrb[3].mxu1 }
  0xde   :  { %v164_v32 = vadd.f32 %v253_v17, %v163_v30  ;;  %v204_v33 = vadd.f32 %v253_v17, %v203_v31 }
  0xdf   :  { %236 = vst.msk [vmem:[%s472_s3 + $0x18] sm:$0xff] %vm232_vm1, %v169_v28  ;;  %244 = vst.msk [vmem:[%s472_s3 + $0x58] sm:$0xff] %vm232_vm1, %v209_v29 }
  0xe0   :  { %235 = vst.msk [vmem:[%s472_s3 + $0x10] sm:$0xff] %vm232_vm1, %v164_v32  ;;  %243 = vst.msk [vmem:[%s472_s3 + $0x50] sm:$0xff] %vm232_vm1, %v204_v33  ;;  %v297_v34 = vpop.f32.mrb[4].mxu0  ;;  %v309_v35 = vpop.f32.mrb[4].mxu1 }
  0xe1   :  { %v179_v36 = vadd.f32 %v297_v34, %v253_v17  ;;  %v219_v37 = vadd.f32 %v309_v35, %v253_v17  ;;  %v173_v38 = vpop.f32.mrb[5].mxu0  ;;  %v213_v39 = vpop.f32.mrb[5].mxu1 }
  0xe2   :  { %v174_v40 = vadd.f32 %v253_v17, %v173_v38  ;;  %v214_v41 = vadd.f32 %v253_v17, %v213_v39 }
  0xe3   :  { %238 = vst.msk [vmem:[%s472_s3 + $0x28] sm:$0xff] %vm232_vm1, %v179_v36  ;;  %246 = vst.msk [vmem:[%s472_s3 + $0x68] sm:$0xff] %vm232_vm1, %v219_v37 }
  0xe4   :  { %237 = vst.msk [vmem:[%s472_s3 + $0x20] sm:$0xff] %vm232_vm1, %v174_v40  ;;  %245 = vst.msk [vmem:[%s472_s3 + $0x60] sm:$0xff] %vm232_vm1, %v214_v41  ;;  %v300_v42 = vpop.f32.mrb[6].mxu0  ;;  %v312_v43 = vpop.f32.mrb[6].mxu1 }
  0xe5   :  { %v189_v44 = vadd.f32 %v300_v42, %v253_v17  ;;  %v229_v45 = vadd.f32 %v312_v43, %v253_v17  ;;  %v183_v46 = vpop.f32.mrb[7].mxu0  ;;  %v223_v47 = vpop.f32.mrb[7].mxu1 }
  0xe6   :  { %v184_v48 = vadd.f32 %v253_v17, %v183_v46  ;;  %v224_v49 = vadd.f32 %v253_v17, %v223_v47 }
  0xe7   :  { %240 = vst.msk [vmem:[%s472_s3 + $0x38] sm:$0xff] %vm232_vm1, %v189_v44  ;;  %248 = vst.msk [vmem:[%s472_s3 + $0x78] sm:$0xff] %vm232_vm1, %v229_v45 }
  0xe8   :  { %239 = vst.msk [vmem:[%s472_s3 + $0x30] sm:$0xff] %vm232_vm1, %v184_v48  ;;  %247 = vst.msk [vmem:[%s472_s3 + $0x70] sm:$0xff] %vm232_vm1, %v224_v49 }

// kernel: decoder_block_forward.5
= control target key start
LH: loop header
LB: loop body
LE: loop exit
PB: predicated region body
PF: predicated region fallthrough
CT: control target
= control target key end

     0   :  { %s3655_s12 = smov 0   ;;  %s3657_s13 = smov 0   ;;  %s4409_s0 = inlined_call_operand.vmem [shape: f32[2,2,10,24,8], index: 0, kind: input, shape index: {}]   ;;  %s4410_s1 = inlined_call_operand.vmem [shape: f32[3,3,8,8], index: 1, kind: input, shape index: {}]   ;;  %s4411_s2 = inlined_call_operand.vmem [shape: f32[1,8], index: 2, kind: input, shape index: {}]   ;;  %s4412_s3 = inlined_call_operand.vmem [shape: f32[2,16,16,8], index: 3, kind: output, shape index: {}]  }
   0x1   :  { %s3659_s14 = smov 0   ;;  %s3661_s15 = smov 0  }
   0x2   :  { %s3663_s16 = smov 0  }
   0x3 LB: > { %s22_s17 = sadd.s32 1, %s3625_s14  ;;  %s25_s18 = sadd.s32 1, %s3629_s15  ;;  %s3633_s16 = sphi %s3663_s16, %s13_s16   ;;  %s3629_s15 = sphi %s3661_s15, %s4416_s15   ;;  %s3625_s14 = sphi %s3659_s14, %s4415_s14   ;;  %s3621_s13 = sphi %s3657_s13, %s4414_s13   ;;  %s3617_s12 = sphi %s3655_s12, %s4413_s12  }
   0x4   : > { %p23_p0 = scmp.ge.s32.totalorder %s22_s17, 2  ;;  %p2591_p1 = scmp.ge.s32.totalorder %s3633_s16, 1 }
   0x5   : > { %p157_p2 = scmp.lt.s32.totalorder %s3633_s16, 5 }
   0x6   : > { %s4418_s17 = smov (%p23_p0, %s22_s17), 0  ;;  %s4420_s18 = smov (!%p23_p0, %s25_s18), %s3629_s15 }
   0x7   : > { %p158_p3 = pnand %p2591_p1, %p157_p2  ;;  %p27_p4 = scmp.ge.s32.totalorder %s4420_s18, 2 }
   0x8   : > { %v2645_v0 = vld [vmem:[%s4410_s1 + $0x18] sm:$0xff] (!%p158_p3)  ;;  %v284_v1 = vld [vmem:[%s4410_s1] sm:$0xff] (!%p158_p3)  ;;  %p190_p5 = scmp.lt.s32.totalorder (!%p158_p3), %s3621_s13, 1  ;;  %p192_p6 = scmp.lt.s32.totalorder (!%p158_p3), %s3617_s12, 1  ;;  %v2694_v2 = vld [vmem:[%s4410_s1 + $0x30] sm:$0xff] (!%p158_p3)  ;;  %vm287_vm0 = vcmask (!%p158_p3), 64512  }
   0x9   : > { %s4422_s18 = smov (%p27_p4, %s4420_s18), 0  ;;  %161 = sbr.rel (%p158_p3) target bundleno = 463 (0x1cf), region = 32 }
   0xa   : > { %3097 = vmatprep.subr.mxu1 (!%p158_p3), %v2645_v0  ;;  %3135 = vmatprep.subr.mxu0 (!%p158_p3), %v284_v1  ;;  %v2795_v9 = vld [vmem:[%s4410_s1 + $0x28] sm:$0xff] (!%p158_p3)  ;;  %v3738_v10 = vld [vmem:[%s4410_s1 + $0x20] sm:$0xff] (!%p158_p3)  ;;  %v3824_v23 = vld [vmem:[%s4410_s1 + $0x10] sm:$0xff] (!%p158_p3)  ;;  %vm1678_vm1 = vcmask (!%p158_p3), 1046528   ;;  %vm2360_vm2 = vcmask (!%p158_p3), 1045504  }
   0xb   : > { %3098 = vmatpush3.msra.mxu1 (!%p158_p3), %v2645_v0  ;;  %3136 = vmatpush3.msra.mxu0 (!%p158_p3), %v284_v1  ;;  %v2719_v33 = vld [vmem:[%s4410_s1 + $0x8] sm:$0xff] (!%p158_p3)  ;;  %v2769_v37 = vld [vmem:[%s4410_s1 + $0x38] sm:$0xff] (!%p158_p3)  ;;  %v2844_v38 = vld [vmem:[%s4410_s1 + $0x40] sm:$0xff] (!%p158_p3) }
   0xc   : > { %3439 = vmatprep.subr.mxu1 (!%p158_p3), %v284_v1  ;;  %3173 = vmatprep.subr.mxu0 (!%p158_p3), %v2694_v2 }
  0x10   : > { %s4424_s13 = smov (!%p190_p5, %s3621_s13), 1 }
  0x11   : > { %s193_s25 = scalar_select %p192_p6, %s3617_s12, 1 }
  0x12   : > { %s3554_s26 = smul.u32 60, %s4424_s13 }
  0x13   : > { %s3553_s27 = smul.u32 30, %s193_s25  ;;  %s2593_s25 = sshll.u32 %s3617_s12, 3 }
  0x14   : > { %p202_p7 = scmp.lt.s32.totalorder %s2593_s25, 15 }
  0x15   : > { %s196_s28 = sadd.s32 %s3554_s26, %s3553_s27  ;;  %s2595_s27 = sshll.u32 %s4424_s13, 5 }
  0x16   : > { %s2592_s29 = sshll.u32 %s196_s28, 3  ;;  %s4426_s25 = smov (!%p202_p7, %s2593_s25), 15 }
  0x17   : > { %s3704_s5 = scalar_lea.vmem %s4409_s0, %s2592_s29  ;;  %s2594_s26 = sshll.u32 %s4426_s25, 1 }
  0x18   : > { %v3707_v3 = vld [vmem:[%s3704_s5 + $0x18] sm:$0xff]  ;;  %v3710_v4 = vld [vmem:[%s3704_s5] sm:$0xff]  ;;  %v3720_v6 = vld [vmem:[%s3704_s5 + $0x8] sm:$0xff]  ;;  %s206_s28 = sadd.s32 %s2595_s27, %s2594_s26 }
  0x19   : > { %v3713_v5 = vld [vmem:[%s3704_s5 + $0x20] sm:$0xff]  ;;  %3099 = vmatprep.mubr.msk.f32.mxu1 %vm287_vm0, %v3707_v3  ;;  %3137 = vmatprep.mubr.msk.f32.mxu0 %vm287_vm0, %v3710_v4  ;;  %v3723_v7 = vld [vmem:[%s3704_s5 + $0x28] sm:$0xff]  ;;  %v3726_v8 = vld [vmem:[%s3704_s5 + $0x10] sm:$0xff]  ;;  %s2596_s13 = sshll.u32 %s206_s28, 3 }
  0x1a   : > { %3100 = vmatmul.mubr.msk.f32.vlgmr.msra.gmra.mrb[0].mxu1 %vm287_vm0, %v3713_v5  ;;  %3138 = vmatmul.mubr.msk.f32.vlgmr.msra.gmra.mrb[0].mxu0 %vm287_vm0, %v3720_v6  ;;  %v3741_v11 = vld [vmem:[%s3704_s5 + $0x30] sm:$0xff]  ;;  %v3748_v12 = vld [vmem:[%s3704_s5 + $0x38] sm:$0xff]  ;;  %v3760_v13 = vld [vmem:[%s3704_s5 + $0x40] sm:$0xff] }
  0x1b   : > { %3440 = vmatpush3.msra.mxu1 %v284_v1  ;;  %3174 = vmatpush3.msra.mxu0 %v2694_v2  ;;  %v3763_v14 = vld [vmem:[%s3704_s5 + $0x48] sm:$0xff]  ;;  %v3774_v15 = vld [vmem:[%s3704_s5 + $0x50] sm:$0xff]  ;;  %v3777_v16 = vld [vmem:[%s3704_s5 + $0x58] sm:$0xff] }
  0x1c   : > { %3102 = vmatprep.mubr.msk.f32.mxu1 %vm287_vm0, %v3723_v7  ;;  %3140 = vmatprep.mubr.msk.f32.mxu0 %vm287_vm0, %v3726_v8  ;;  %v3788_v17 = vld [vmem:[%s3704_s5 + $0x60] sm:$0xff]  ;;  %v3791_v18 = vld [vmem:[%s3704_s5 + $0x68] sm:$0xff]  ;;  %v3802_v19 = vld [vmem:[%s3704_s5 + $0x70] sm:$0xff] }
  0x1d   : > { %3325 = vmatprep.subr.mxu0 %v2795_v9  ;;  %3211 = vmatprep.subr.mxu1 %v3738_v10  ;;  %v3805_v20 = vld [vmem:[%s3704_s5 + $0x78] sm:$0xff]  ;;  %v3816_v21 = vld [vmem:[%s3704_s5 + $0x80] sm:$0xff]  ;;  %v3819_v22 = vld [vmem:[%s3704_s5 + $0x88] sm:$0xff] }
  0x1e   : > { %3103 = vmatmul.mubr.msk.f32.gmra.mrb[2].mxu1 %vm287_vm0, %v3741_v11  ;;  %3141 = vmatmul.mubr.msk.f32.gmra.mrb[2].mxu0 %vm287_vm0, %v3707_v3  ;;  %v3833_v24 = vld [vmem:[%s3704_s5 + $0x90] sm:$0xff]  ;;  %v3838_v25 = vld [vmem:[%s3704_s5 + $0x98] sm:$0xff]  ;;  %v3850_v26 = vld [vmem:[%s3704_s5 + $0xa0] sm:$0xff] }
  0x1f   : > { %3105 = vmatprep.mubr.msk.f32.mxu1 %vm287_vm0, %v3748_v12  ;;  %3143 = vmatprep.mubr.msk.f32.mxu0 %vm287_vm0, %v3713_v5  ;;  %v3853_v27 = vld [vmem:[%s3704_s5 + $0xa8] sm:$0xff]  ;;  %v3864_v28 = vld [vmem:[%s3704_s5 + $0xb0] sm:$0xff]  ;;  %v3867_v29 = vld [vmem:[%s3704_s5 + $0xb8] sm:$0xff] }
  0x20   : > { %v3878_v30 = vld [vmem:[%s3704_s5 + $0xc0] sm:$0xff]  ;;  %v3881_v31 = vld [vmem:[%s3704_s5 + $0xc8] sm:$0xff]  ;;  %v3892_v32 = vld [vmem:[%s3704_s5 + $0xd0] sm:$0xff] }
  0x21   : > { %v3939_v34 = vld [vmem:[%s3704_s5 + $0xd8] sm:$0xff]  ;;  %v3942_v35 = vld [vmem:[%s3704_s5 + $0xe0] sm:$0xff]  ;;  %v3953_v36 = vld [vmem:[%s3704_s5 + $0xe8] sm:$0xff]  ;;  %s4303_s5 = scalar_lea.vmem %s4412_s3, %s2596_s13 }
  0x22   : > { %3106 = vmatmul.mubr.msk.f32.gmra.mrb[4].mxu1 %vm287_vm0, %v3760_v13  ;;  %3144 = vmatmul.mubr.msk.f32.gmra.mrb[4].mxu0 %vm287_vm0, %v3723_v7 }
  0x23   : > { %3108 = vmatprep.mubr.msk.f32.mxu1 %vm287_vm0, %v3763_v14  ;;  %3146 = vmatprep.mubr.msk.f32.mxu0 %vm287_vm0, %v3741_v11 }
  0x26   : > { %3109 = vmatmul.mubr.msk.f32.gmra.mrb[6].mxu1 %vm287_vm0, %v3774_v15  ;;  %3147 = vmatmul.mubr.msk.f32.gmra.mrb[6].mxu0 %vm287_vm0, %v3748_v12 }
  0x27   : > { %3111 = vmatprep.mubr.msk.f32.mxu1 %vm287_vm0, %v3777_v16  ;;  %3149 = vmatprep.mubr.msk.f32.mxu0 %vm287_vm0, %v3760_v13 }
  0x2a   : > { %3112 = vmatmul.mubr.msk.f32.gmra.mrb[8].mxu1 %vm287_vm0, %v3788_v17  ;;  %3150 = vmatmul.mubr.msk.f32.gmra.mrb[8].mxu0 %vm287_vm0, %v3763_v14 }
  0x2b   : > { %3114 = vmatprep.mubr.msk.f32.mxu1 %vm287_vm0, %v3791_v18  ;;  %3152 = vmatprep.mubr.msk.f32.mxu0 %vm287_vm0, %v3774_v15 }
  0x2e   : > { %3115 = vmatmul.mubr.msk.f32.gmra.mrb[10].mxu1 %vm287_vm0, %v3802_v19  ;;  %3153 = vmatmul.mubr.msk.f32.gmra.mrb[10].mxu0 %vm287_vm0, %v3777_v16 }
  0x2f   : > { %3117 = vmatprep.mubr.msk.f32.mxu1 %vm287_vm0, %v3805_v20  ;;  %3175 = vmatprep.mubr.msk.f32.mxu0 %vm287_vm0, %v3741_v11 }
  0x32   : > { %3118 = vmatmul.mubr.msk.f32.gmra.mrb[12].mxu1 %vm287_vm0, %v3816_v21  ;;  %3176 = vmatmul.mubr.msk.f32.vlgmr.msra.gmra.mrb[0].mxu0 %vm287_vm0, %v3748_v12 }
  0x33   : > { %3326 = vmatpush3.msra.mxu0 %v2795_v9  ;;  %3120 = vmatprep.mubr.msk.f32.mxu1 %vm287_vm0, %v3819_v22 }
  0x34   : > { %3178 = vmatprep.mubr.msk.f32.mxu0 %vm287_vm0, %v3760_v13  ;;  %3363 = vmatprep.subr.mxu0 %v3824_v23 }
  0x36   : > { %3121 = vmatmul.mubr.msk.f32.gmra.mrb[14].mxu1 %vm287_vm0, %v3833_v24  ;;  %3179 = vmatmul.mubr.msk.f32.gmra.mrb[12].mxu0 %vm287_vm0, %v3763_v14 }
  0x37   : > { %3123 = vmatprep.mubr.msk.f32.mxu1 %vm287_vm0, %v3838_v25  ;;  %3181 = vmatprep.mubr.msk.f32.mxu0 %vm287_vm0, %v3774_v15 }
  0x3a   : > { %3124 = vmatmul.mubr.msk.f32.gmra.mrb[16].mxu1 %vm287_vm0, %v3850_v26  ;;  %3182 = vmatmul.mubr.msk.f32.gmra.mrb[14].mxu0 %vm287_vm0, %v3777_v16 }
  0x3b   : > { %3126 = vmatprep.mubr.msk.f32.mxu1 %vm287_vm0, %v3853_v27  ;;  %3184 = vmatprep.mubr.msk.f32.mxu0 %vm287_vm0, %v3788_v17 }
  0x3e   : > { %3127 = vmatmul.mubr.msk.f32.gmra.mrb[18].mxu1 %vm287_vm0, %v3864_v28  ;;  %3185 = vmatmul.mubr.msk.f32.gmra.mrb[6].mxu0 %vm287_vm0, %v3791_v18 }
  0x3f   : > { %3129 = vmatprep.mubr.msk.f32.mxu1 %vm287_vm0, %v3867_v29  ;;  %3187 = vmatprep.mubr.msk.f32.mxu0 %vm287_vm0, %v3802_v19 }
  0x42   : > { %3130 = vmatmul.mubr.msk.f32.gmra.mrb[20].mxu1 %vm287_vm0, %v3878_v30  ;;  %3188 = vmatmul.mubr.msk.f32.gmra.mrb[16].mxu0 %vm287_vm0, %v3805_v20 }
  0x43   : > { %3132 = vmatprep.mubr.msk.f32.mxu1 %vm287_vm0, %v3881_v31  ;;  %3190 = vmatprep.mubr.msk.f32.mxu0 %vm287_vm0, %v3816_v21 }
  0x46   : > { %3133 = vmatmul.mubr.msk.f32.gmra.mrb[22].mxu1 %vm287_vm0, %v3892_v32  ;;  %3191 = vmatmul.mubr.msk.f32.gmra.mrb[18].mxu0 %vm287_vm0, %v3819_v22 }
  0x47   : > { %3155 = vmatprep.mubr.msk.f32.mxu1 %vm287_vm0, %v3788_v17  ;;  %3193 = vmatprep.mubr.msk.f32.mxu0 %vm287_vm0, %v3833_v24 }
  0x4a   : > { %3156 = vmatmul.mubr.msk.f32.vlgmr.msra.gmra.mrb[12].mxu1 %vm287_vm0, %v3791_v18  ;;  %3194 = vmatmul.mubr.msk.f32.gmra.mrb[20].mxu0 %vm287_vm0, %v3838_v25 }
  0x4b   : > { %3212 = vmatpush3.msra.mxu1 %v3738_v10  ;;  %3158 = vmatprep.mubr.msk.f32.mxu1 %vm287_vm0, %v3802_v19 }
  0x4c   : > { %3196 = vmatprep.mubr.msk.f32.mxu0 %vm287_vm0, %v3850_v26  ;;  %3249 = vmatprep.subr.mxu1 %v2719_v33 }
  0x4e   : > { %3159 = vmatmul.mubr.msk.f32.gmra.mrb[24].mxu1 %vm287_vm0, %v3805_v20  ;;  %3197 = vmatmul.mubr.msk.f32.gmra.mrb[22].mxu0 %vm287_vm0, %v3853_v27 }
  0x4f   : > { %3161 = vmatprep.mubr.msk.f32.mxu1 %vm287_vm0, %v3816_v21  ;;  %3199 = vmatprep.mubr.msk.f32.mxu0 %vm287_vm0, %v3864_v28 }
  0x52   : > { %3162 = vmatmul.mubr.msk.f32.gmra.mrb[26].mxu1 %vm287_vm0, %v3819_v22  ;;  %3200 = vmatmul.mubr.msk.f32.gmra.mrb[24].mxu0 %vm287_vm0, %v3867_v29 }
  0x53   : > { %3164 = vmatprep.mubr.msk.f32.mxu1 %vm287_vm0, %v3833_v24  ;;  %3202 = vmatprep.mubr.msk.f32.mxu0 %vm287_vm0, %v3878_v30 }
  0x56   : > { %3165 = vmatmul.mubr.msk.f32.gmra.mrb[18].mxu1 %vm287_vm0, %v3838_v25  ;;  %3203 = vmatmul.mubr.msk.f32.gmra.mrb[26].mxu0 %vm287_vm0, %v3881_v31 }
  0x57   : > { %3167 = vmatprep.mubr.msk.f32.mxu1 %vm287_vm0, %v3850_v26  ;;  %3205 = vmatprep.mubr.msk.f32.mxu0 %vm287_vm0, %v3892_v32 }
  0x5a   : > { %3168 = vmatmul.mubr.msk.f32.gmra.mrb[28].mxu1 %vm287_vm0, %v3853_v27  ;;  %3206 = vmatmul.mubr.msk.f32.gmra.mrb[28].mxu0 %vm287_vm0, %v3939_v34 }
  0x5b   : > { %3170 = vmatprep.mubr.msk.f32.mxu1 %vm287_vm0, %v3864_v28  ;;  %3208 = vmatprep.mubr.msk.f32.mxu0 %vm287_vm0, %v3942_v35 }
  0x5e   : > { %3171 = vmatmul.mubr.msk.f32.gmra.mrb[30].mxu1 %vm287_vm0, %v3867_v29  ;;  %3209 = vmatmul.mubr.msk.f32.gmra.mrb[30].mxu0 %vm287_vm0, %v3953_v36 }
  0x5f   : > { %3213 = vmatprep.mubr.msk.f32.mxu1 %vm287_vm0, %v3707_v3  ;;  %3327 = vmatprep.mubr.msk.f32.mxu0 %vm287_vm0, %v3707_v3 }
  0x62   : > { %3214 = vmatmul.mubr.msk.f32.vlgmr.msra.gmra.mrb[32].mxu1 %vm287_vm0, %v3713_v5  ;;  %3328 = vmatmul.mubr.msk.f32.vlgmr.msra.gmra.mrb[32].mxu0 %vm287_vm0, %v3713_v5 }
  0x63   : > { %3250 = vmatpush3.msra.mxu1 %v2719_v33  ;;  %3364 = vmatpush3.msra.mxu0 %v3824_v23 }
  0x64   : > { %3216 = vmatprep.mubr.msk.f32.mxu1 %vm287_vm0, %v3723_v7  ;;  %3330 = vmatprep.mubr.msk.f32.mxu0 %vm287_vm0, %v3723_v7 }
  0x65   : > { %3287 = vmatprep.subr.mxu1 %v2769_v37  ;;  %3401 = vmatprep.subr.mxu0 %v2844_v38 }
  0x66   : > { %3217 = vmatmul.mubr.msk.f32.gmra.mrb[34].mxu1 %vm287_vm0, %v3741_v11  ;;  %3331 = vmatmul.mubr.msk.f32.gmra.mrb[34].mxu0 %vm287_vm0, %v3741_v11 }
  0x67   : > { %3219 = vmatprep.mubr.msk.f32.mxu1 %vm287_vm0, %v3748_v12  ;;  %3333 = vmatprep.mubr.msk.f32.mxu0 %vm287_vm0, %v3748_v12 }
  0x6a   : > { %3220 = vmatmul.mubr.msk.f32.gmra.mrb[36].mxu1 %vm287_vm0, %v3760_v13  ;;  %3334 = vmatmul.mubr.msk.f32.gmra.mrb[36].mxu0 %vm287_vm0, %v3760_v13 }
  0x6b   : > { %3222 = vmatprep.mubr.msk.f32.mxu1 %vm287_vm0, %v3763_v14  ;;  %3336 = vmatprep.mubr.msk.f32.mxu0 %vm287_vm0, %v3763_v14 }
  0x6e   : > { %3223 = vmatmul.mubr.msk.f32.gmra.mrb[38].mxu1 %vm287_vm0, %v3774_v15  ;;  %3337 = vmatmul.mubr.msk.f32.gmra.mrb[38].mxu0 %vm287_vm0, %v3774_v15 }
  0x6f   : > { %3225 = vmatprep.mubr.msk.f32.mxu1 %vm287_vm0, %v3777_v16  ;;  %3339 = vmatprep.mubr.msk.f32.mxu0 %vm287_vm0, %v3777_v16 }
  0x72   : > { %3226 = vmatmul.mubr.msk.f32.gmra.mrb[40].mxu1 %vm287_vm0, %v3788_v17  ;;  %3340 = vmatmul.mubr.msk.f32.gmra.mrb[40].mxu0 %vm287_vm0, %v3788_v17 }
  0x73   : > { %3228 = vmatprep.mubr.msk.f32.mxu1 %vm287_vm0, %v3791_v18  ;;  %3342 = vmatprep.mubr.msk.f32.mxu0 %vm287_vm0, %v3791_v18 }
  0x76   : > { %3229 = vmatmul.mubr.msk.f32.gmra.mrb[42].mxu1 %vm287_vm0, %v3802_v19  ;;  %3343 = vmatmul.mubr.msk.f32.gmra.mrb[42].mxu0 %vm287_vm0, %v3802_v19 }
  0x77   : > { %3231 = vmatprep.mubr.msk.f32.mxu1 %vm287_vm0, %v3805_v20  ;;  %3345 = vmatprep.mubr.msk.f32.mxu0 %vm287_vm0, %v3805_v20 }
  0x7a   : > { %3232 = vmatmul.mubr.msk.f32.gmra.mrb[44].mxu1 %vm287_vm0, %v3816_v21  ;;  %3346 = vmatmul.mubr.msk.f32.gmra.mrb[44].mxu0 %vm287_vm0, %v3816_v21 }
  0x7b   : > { %3234 = vmatprep.mubr.msk.f32.mxu1 %vm287_vm0, %v3819_v22  ;;  %3348 = vmatprep.mubr.msk.f32.mxu0 %vm287_vm0, %v3819_v22 }
  0x7e   : > { %3235 = vmatmul.mubr.msk.f32.gmra.mrb[46].mxu1 %vm287_vm0, %v3833_v24  ;;  %3349 = vmatmul.mubr.msk.f32.gmra.mrb[46].mxu0 %vm287_vm0, %v3833_v24 }
  0x7f   : > { %3237 = vmatprep.mubr.msk.f32.mxu1 %vm287_vm0, %v3838_v25  ;;  %3351 = vmatprep.mubr.msk.f32.mxu0 %vm287_vm0, %v3838_v25 }
  0x82   : > { %3238 = vmatmul.mubr.msk.f32.gmra.mrb[48].mxu1 %vm287_vm0, %v3850_v26  ;;  %3352 = vmatmul.mubr.msk.f32.gmra.mrb[48].mxu0 %vm287_vm0, %v3850_v26 }
  0x83   : > { %3240 = vmatprep.mubr.msk.f32.mxu1 %vm287_vm0, %v3853_v27  ;;  %3354 = vmatprep.mubr.msk.f32.mxu0 %vm287_vm0, %v3853_v27 }
  0x86   : > { %3241 = vmatmul.mubr.msk.f32.gmra.mrb[50].mxu1 %vm287_vm0, %v3864_v28  ;;  %3355 = vmatmul.mubr.msk.f32.gmra.mrb[50].mxu0 %vm287_vm0, %v3864_v28 }
  0x87   : > { %3243 = vmatprep.mubr.msk.f32.mxu1 %vm287_vm0, %v3867_v29  ;;  %3357 = vmatprep.mubr.msk.f32.mxu0 %vm287_vm0, %v3867_v29 }
  0x8a   : > { %3244 = vmatmul.mubr.msk.f32.gmra.mrb[52].mxu1 %vm287_vm0, %v3878_v30  ;;  %3358 = vmatmul.mubr.msk.f32.gmra.mrb[52].mxu0 %vm287_vm0, %v3878_v30 }
  0x8b   : > { %3246 = vmatprep.mubr.msk.f32.mxu1 %vm287_vm0, %v3881_v31  ;;  %3360 = vmatprep.mubr.msk.f32.mxu0 %vm287_vm0, %v3881_v31 }
  0x8e   : > { %3247 = vmatmul.mubr.msk.f32.gmra.mrb[54].mxu1 %vm287_vm0, %v3892_v32  ;;  %3361 = vmatmul.mubr.msk.f32.gmra.mrb[54].mxu0 %vm287_vm0, %v3892_v32 }
  0x8f   : > { %3251 = vmatprep.mubr.msk.f32.mxu1 %vm287_vm0, %v3710_v4  ;;  %3365 = vmatprep.mubr.msk.f32.mxu0 %vm287_vm0, %v3710_v4 }
  0x92   : > { %3252 = vmatmul.mubr.msk.f32.vlgmr.msra.gmra.mrb[32].mxu1 %vm287_vm0, %v3720_v6  ;;  %3366 = vmatmul.mubr.msk.f32.vlgmr.msra.gmra.mrb[32].mxu0 %vm287_vm0, %v3720_v6 }
  0x93   : > { %3288 = vmatpush3.msra.mxu1 %v2769_v37  ;;  %3402 = vmatpush3.msra.mxu0 %v2844_v38 }
  0x94   : > { %3254 = vmatprep.mubr.msk.f32.mxu1 %vm287_vm0, %v3726_v8  ;;  %3368 = vmatprep.mubr.msk.f32.mxu0 %vm287_vm0, %v3726_v8 }
  0x96   : > { %3255 = vmatmul.mubr.msk.f32.gmra.mrb[34].mxu1 %vm287_vm0, %v3707_v3  ;;  %3369 = vmatmul.mubr.msk.f32.gmra.mrb[34].mxu0 %vm287_vm0, %v3707_v3 }
  0x97   : > { %3257 = vmatprep.mubr.msk.f32.mxu1 %vm287_vm0, %v3713_v5  ;;  %3371 = vmatprep.mubr.msk.f32.mxu0 %vm287_vm0, %v3713_v5 }
  0x9a   : > { %3258 = vmatmul.mubr.msk.f32.gmra.mrb[36].mxu1 %vm287_vm0, %v3723_v7  ;;  %3372 = vmatmul.mubr.msk.f32.gmra.mrb[36].mxu0 %vm287_vm0, %v3723_v7 }
  0x9b   : > { %3260 = vmatprep.mubr.msk.f32.mxu1 %vm287_vm0, %v3741_v11  ;;  %3374 = vmatprep.mubr.msk.f32.mxu0 %vm287_vm0, %v3741_v11 }
  0x9e   : > { %3261 = vmatmul.mubr.msk.f32.gmra.mrb[38].mxu1 %vm287_vm0, %v3748_v12  ;;  %3375 = vmatmul.mubr.msk.f32.gmra.mrb[38].mxu0 %vm287_vm0, %v3748_v12 }
  0x9f   : > { %3263 = vmatprep.mubr.msk.f32.mxu1 %vm287_vm0, %v3760_v13  ;;  %3377 = vmatprep.mubr.msk.f32.mxu0 %vm287_vm0, %v3760_v13 }
  0xa2   : > { %3264 = vmatmul.mubr.msk.f32.gmra.mrb[40].mxu1 %vm287_vm0, %v3763_v14  ;;  %3378 = vmatmul.mubr.msk.f32.gmra.mrb[40].mxu0 %vm287_vm0, %v3763_v14 }
  0xa3   : > { %3266 = vmatprep.mubr.msk.f32.mxu1 %vm287_vm0, %v3774_v15  ;;  %3380 = vmatprep.mubr.msk.f32.mxu0 %vm287_vm0, %v3774_v15 }
  0xa6   : > { %3267 = vmatmul.mubr.msk.f32.gmra.mrb[42].mxu1 %vm287_vm0, %v3777_v16  ;;  %3381 = vmatmul.mubr.msk.f32.gmra.mrb[42].mxu0 %vm287_vm0, %v3777_v16 }
  0xa7   : > { %3269 = vmatprep.mubr.msk.f32.mxu1 %vm287_vm0, %v3788_v17  ;;  %3383 = vmatprep.mubr.msk.f32.mxu0 %vm287_vm0, %v3788_v17 }
  0xaa   : > { %3270 = vmatmul.mubr.msk.f32.gmra.mrb[44].mxu1 %vm287_vm0, %v3791_v18  ;;  %3384 = vmatmul.mubr.msk.f32.gmra.mrb[44].mxu0 %vm287_vm0, %v3791_v18 }
  0xab   : > { %3272 = vmatprep.mubr.msk.f32.mxu1 %vm287_vm0, %v3802_v19  ;;  %3386 = vmatprep.mubr.msk.f32.mxu0 %vm287_vm0, %v3802_v19 }
  0xae   : > { %3273 = vmatmul.mubr.msk.f32.gmra.mrb[46].mxu1 %vm287_vm0, %v3805_v20  ;;  %3387 = vmatmul.mubr.msk.f32.gmra.mrb[46].mxu0 %vm287_vm0, %v3805_v20 }
  0xaf   : > { %3275 = vmatprep.mubr.msk.f32.mxu1 %vm287_vm0, %v3816_v21  ;;  %3389 = vmatprep.mubr.msk.f32.mxu0 %vm287_vm0, %v3816_v21 }
  0xb2   : > { %3276 = vmatmul.mubr.msk.f32.gmra.mrb[48].mxu1 %vm287_vm0, %v3819_v22  ;;  %3390 = vmatmul.mubr.msk.f32.gmra.mrb[48].mxu0 %vm287_vm0, %v3819_v22 }
  0xb3   : > { %3278 = vmatprep.mubr.msk.f32.mxu1 %vm287_vm0, %v3833_v24  ;;  %3392 = vmatprep.mubr.msk.f32.mxu0 %vm287_vm0, %v3833_v24 }
  0xb6   : > { %3279 = vmatmul.mubr.msk.f32.gmra.mrb[50].mxu1 %vm287_vm0, %v3838_v25  ;;  %3393 = vmatmul.mubr.msk.f32.gmra.mrb[50].mxu0 %vm287_vm0, %v3838_v25 }
  0xb7   : > { %3281 = vmatprep.mubr.msk.f32.mxu1 %vm287_vm0, %v3850_v26  ;;  %3395 = vmatprep.mubr.msk.f32.mxu0 %vm287_vm0, %v3850_v26 }
  0xba   : > { %3282 = vmatmul.mubr.msk.f32.gmra.mrb[52].mxu1 %vm287_vm0, %v3853_v27  ;;  %3396 = vmatmul.mubr.msk.f32.gmra.mrb[52].mxu0 %vm287_vm0, %v3853_v27 }
  0xbb   : > { %3284 = vmatprep.mubr.msk.f32.mxu1 %vm287_vm0, %v3864_v28  ;;  %3398 = vmatprep.mubr.msk.f32.mxu0 %vm287_vm0, %v3864_v28 }
  0xbe   : > { %3285 = vmatmul.mubr.msk.f32.gmra.mrb[54].mxu1 %vm287_vm0, %v3867_v29  ;;  %3399 = vmatmul.mubr.msk.f32.gmra.mrb[54].mxu0 %vm287_vm0, %v3867_v29 }
  0xbf   : > { %3289 = vmatprep.mubr.msk.f32.mxu1 %vm287_vm0, %v3741_v11  ;;  %3403 = vmatprep.mubr.msk.f32.mxu0 %vm287_vm0, %v3741_v11 }
  0xc2   : > { %3290 = vmatmul.mubr.msk.f32.vlgmr.msra.gmra.mrb[32].mxu1 %vm287_vm0, %v3748_v12  ;;  %3404 = vmatmul.mubr.msk.f32.vlgmr.msra.gmra.mrb[32].mxu0 %vm287_vm0, %v3748_v12 }
  0xc3   : > { %3292 = vmatprep.mubr.msk.f32.mxu1 %vm287_vm0, %v3760_v13  ;;  %3406 = vmatprep.mubr.msk.f32.mxu0 %vm287_vm0, %v3760_v13 }
  0xc6   : > { %3293 = vmatmul.mubr.msk.f32.gmra.mrb[34].mxu1 %vm287_vm0, %v3763_v14  ;;  %3407 = vmatmul.mubr.msk.f32.gmra.mrb[34].mxu0 %vm287_vm0, %v3763_v14 }
  0xc7   : > { %3295 = vmatprep.mubr.msk.f32.mxu1 %vm287_vm0, %v3774_v15  ;;  %3409 = vmatprep.mubr.msk.f32.mxu0 %vm287_vm0, %v3774_v15 }
  0xca   : > { %3296 = vmatmul.mubr.msk.f32.gmra.mrb[36].mxu1 %vm287_vm0, %v3777_v16  ;;  %3410 = vmatmul.mubr.msk.f32.gmra.mrb[36].mxu0 %vm287_vm0, %v3777_v16 }
  0xcb   : > { %3298 = vmatprep.mubr.msk.f32.mxu1 %vm287_vm0, %v3788_v17  ;;  %3412 = vmatprep.mubr.msk.f32.mxu0 %vm287_vm0, %v3788_v17 }
  0xce   : > { %3299 = vmatmul.mubr.msk.f32.gmra.mrb[38].mxu1 %vm287_vm0, %v3791_v18  ;;  %3413 = vmatmul.mubr.msk.f32.gmra.mrb[38].mxu0 %vm287_vm0, %v3791_v18 }
  0xcf   : > { %3301 = vmatprep.mubr.msk.f32.mxu1 %vm287_vm0, %v3802_v19  ;;  %3415 = vmatprep.mubr.msk.f32.mxu0 %vm287_vm0, %v3802_v19 }
  0xd2   : > { %3302 = vmatmul.mubr.msk.f32.gmra.mrb[40].mxu1 %vm287_vm0, %v3805_v20  ;;  %3416 = vmatmul.mubr.msk.f32.gmra.mrb[40].mxu0 %vm287_vm0, %v3805_v20 }
  0xd3   : > { %3304 = vmatprep.mubr.msk.f32.mxu1 %vm287_vm0, %v3816_v21  ;;  %3418 = vmatprep.mubr.msk.f32.mxu0 %vm287_vm0, %v3816_v21 }
  0xd6   : > { %3305 = vmatmul.mubr.msk.f32.gmra.mrb[42].mxu1 %vm287_vm0, %v3819_v22  ;;  %3419 = vmatmul.mubr.msk.f32.gmra.mrb[42].mxu0 %vm287_vm0, %v3819_v22 }
  0xd7   : > { %3307 = vmatprep.mubr.msk.f32.mxu1 %vm287_vm0, %v3833_v24  ;;  %3421 = vmatprep.mubr.msk.f32.mxu0 %vm287_vm0, %v3833_v24 }
  0xda   : > { %3308 = vmatmul.mubr.msk.f32.gmra.mrb[44].mxu1 %vm287_vm0, %v3838_v25  ;;  %3422 = vmatmul.mubr.msk.f32.gmra.mrb[44].mxu0 %vm287_vm0, %v3838_v25 }
  0xdb   : > { %3310 = vmatprep.mubr.msk.f32.mxu1 %vm287_vm0, %v3850_v26  ;;  %3424 = vmatprep.mubr.msk.f32.mxu0 %vm287_vm0, %v3850_v26 }
  0xde   : > { %3311 = vmatmul.mubr.msk.f32.gmra.mrb[46].mxu1 %vm287_vm0, %v3853_v27  ;;  %3425 = vmatmul.mubr.msk.f32.gmra.mrb[46].mxu0 %vm287_vm0, %v3853_v27 }
  0xdf   : > { %3313 = vmatprep.mubr.msk.f32.mxu1 %vm287_vm0, %v3864_v28  ;;  %3427 = vmatprep.mubr.msk.f32.mxu0 %vm287_vm0, %v3864_v28 }
  0xe2   : > { %3314 = vmatmul.mubr.msk.f32.gmra.mrb[48].mxu1 %vm287_vm0, %v3867_v29  ;;  %3428 = vmatmul.mubr.msk.f32.gmra.mrb[48].mxu0 %vm287_vm0, %v3867_v29 }
  0xe3   : > { %3316 = vmatprep.mubr.msk.f32.mxu1 %vm287_vm0, %v3878_v30  ;;  %3430 = vmatprep.mubr.msk.f32.mxu0 %vm287_vm0, %v3878_v30 }
  0xe6   : > { %3317 = vmatmul.mubr.msk.f32.gmra.mrb[50].mxu1 %vm287_vm0, %v3881_v31  ;;  %3431 = vmatmul.mubr.msk.f32.gmra.mrb[50].mxu0 %vm287_vm0, %v3881_v31 }
  0xe7   : > { %3319 = vmatprep.mubr.msk.f32.mxu1 %vm287_vm0, %v3892_v32  ;;  %3433 = vmatprep.mubr.msk.f32.mxu0 %vm287_vm0, %v3892_v32 }
  0xea   : > { %3320 = vmatmul.mubr.msk.f32.gmra.mrb[52].mxu1 %vm287_vm0, %v3939_v34  ;;  %3434 = vmatmul.mubr.msk.f32.gmra.mrb[52].mxu0 %vm287_vm0, %v3939_v34 }
  0xeb   : > { %3322 = vmatprep.mubr.msk.f32.mxu1 %vm287_vm0, %v3942_v35  ;;  %3436 = vmatprep.mubr.msk.f32.mxu0 %vm287_vm0, %v3942_v35 }
  0xed   : > { %v3101_v39 = vpop.f32.mrb[0].mxu1 }
  0xee   : > { %v426_v40 = vpop.f32.mrb[1].mxu1  ;;  %3323 = vmatmul.mubr.msk.f32.gmra.mrb[54].mxu1 %vm287_vm0, %v3953_v36  ;;  %3437 = vmatmul.mubr.msk.f32.gmra.mrb[54].mxu0 %vm287_vm0, %v3953_v36 }
  0xf1   : > { %v3104_v41 = vpop.f32.mrb[2].mxu1  ;;  %v3142_v42 = vpop.f32.mrb[2].mxu0 }
  0xf2   : > { %v690_v43 = vadd.f32 %v3142_v42, %v3104_v41  ;;  %v436_v44 = vpop.f32.mrb[3].mxu1  ;;  %v685_v45 = vpop.f32.mrb[3].mxu0 }
  0xf5   : > { %v3107_v46 = vpop.f32.mrb[4].mxu1  ;;  %v3145_v47 = vpop.f32.mrb[4].mxu0 }
  0xf6   : > { %v445_v48 = vpop.f32.mrb[5].mxu1  ;;  %v694_v49 = vpop.f32.mrb[5].mxu0 }
  0xf7   : > { %v695_v50 = vadd.f32 %v694_v49, %v445_v48 }
  0xf9   : > { %v3110_v51 = vpop.f32.mrb[6].mxu1 }
  0xfa   : > { %v454_v52 = vpop.f32.mrb[7].mxu1 }
  0xfd   : > { %v3113_v53 = vpop.f32.mrb[8].mxu1  ;;  %v3151_v54 = vpop.f32.mrb[8].mxu0 }
  0xfe   : > { %v718_v55 = vadd.f32 %v3151_v54, %v3113_v53  ;;  %v464_v56 = vpop.f32.mrb[9].mxu1  ;;  %v713_v57 = vpop.f32.mrb[9].mxu0 }
 0x101   : > { %v3116_v58 = vpop.f32.mrb[10].mxu1  ;;  %v3154_v59 = vpop.f32.mrb[10].mxu0 }
 0x102   : > { %v473_v60 = vpop.f32.mrb[11].mxu1  ;;  %v722_v61 = vpop.f32.mrb[11].mxu0 }
 0x103   : > { %v723_v62 = vadd.f32 %v722_v61, %v473_v60 }
 0x105   : > { %v3177_v63 = vpop.f32.mrb[0].mxu0 }
 0x106   : > { %v4254_v0 = vadd.f32 %v3177_v63, %v3101_v39  ;;  %v926_v1 = vpop.f32.mrb[1].mxu0 }
 0x107   : > { %v4256_v2 = vadd.f32 %v926_v1, %v426_v40 }
 0x109   : > { %v3122_v3 = vpop.f32.mrb[14].mxu1  ;;  %v3180_v4 = vpop.f32.mrb[12].mxu0 }
 0x10a   : > { %v4258_v5 = vadd.f32 %v3180_v4, %v690_v43  ;;  %v492_v6 = vpop.f32.mrb[15].mxu1  ;;  %v936_v7 = vpop.f32.mrb[13].mxu0 }
 0x10d   : > { %v3125_v8 = vpop.f32.mrb[16].mxu1  ;;  %v3183_v9 = vpop.f32.mrb[14].mxu0 }
 0x10e   : > { %v501_v10 = vpop.f32.mrb[17].mxu1  ;;  %v945_v11 = vpop.f32.mrb[15].mxu0 }
 0x10f   : > { %v4260_v12 = vadd.f32 %v945_v11, %v695_v50 }
 0x111   : > { %v3186_v13 = vpop.f32.mrb[6].mxu0 }
 0x112   : > { %v4262_v14 = vadd.f32 %v3186_v13, %v3110_v51  ;;  %v954_v15 = vpop.f32.mrb[7].mxu0 }
 0x113   : > { %v4264_v16 = vadd.f32 %v954_v15, %v454_v52 }
 0x115   : > { %v3131_v17 = vpop.f32.mrb[20].mxu1  ;;  %v3189_v18 = vpop.f32.mrb[16].mxu0 }
 0x116   : > { %v4266_v19 = vadd.f32 %v3189_v18, %v718_v55  ;;  %v520_v20 = vpop.f32.mrb[21].mxu1  ;;  %v964_v21 = vpop.f32.mrb[17].mxu0 }
 0x117   : > { %v4294_v21 = vld [vmem:[%s4411_s2] ss:$0 sm:$0xff] }
 0x119   : > { %v3134_v22 = vpop.f32.mrb[22].mxu1  ;;  %v3192_v23 = vpop.f32.mrb[18].mxu0 }
 0x11a   : > { %v529_v24 = vpop.f32.mrb[23].mxu1  ;;  %v973_v25 = vpop.f32.mrb[19].mxu0 }
 0x11b   : > { %v4268_v26 = vadd.f32 %v973_v25, %v723_v62 }
 0x11d   : > { %v3157_v27 = vpop.f32.mrb[12].mxu1  ;;  %v3195_v28 = vpop.f32.mrb[20].mxu0 }
 0x11e   : > { %v4270_v29 = vadd.f32 %v3195_v28, %v3157_v27  ;;  %v731_v30 = vpop.f32.mrb[13].mxu1  ;;  %v982_v31 = vpop.f32.mrb[21].mxu0 }
 0x11f   : > { %v4272_v32 = vadd.f32 %v982_v31, %v731_v30 }
 0x121   : > { %v3160_v33 = vpop.f32.mrb[24].mxu1  ;;  %v3198_v34 = vpop.f32.mrb[22].mxu0 }
 0x122   : > { %v746_v35 = vadd.f32 %v3160_v33, %v3122_v3  ;;  %v741_v36 = vpop.f32.mrb[25].mxu1  ;;  %v992_v37 = vpop.f32.mrb[23].mxu0 }
 0x124   : > { %v4274_v38 = vadd.f32 %v3198_v34, %v746_v35 }
 0x125   : > { %v3163_v39 = vpop.f32.mrb[26].mxu1  ;;  %v3201_v40 = vpop.f32.mrb[24].mxu0 }
 0x126   : > { %v750_v41 = vpop.f32.mrb[27].mxu1  ;;  %v1001_v42 = vpop.f32.mrb[25].mxu0 }
 0x127   : > { %v751_v43 = vadd.f32 %v750_v41, %v501_v10 }
 0x129   : > { %v4276_v44 = vadd.f32 %v1001_v42, %v751_v43  ;;  %v3166_v45 = vpop.f32.mrb[18].mxu1  ;;  %v3204_v46 = vpop.f32.mrb[26].mxu0 }
 0x12a   : > { %v4278_v47 = vadd.f32 %v3204_v46, %v3166_v45  ;;  %v759_v48 = vpop.f32.mrb[19].mxu1  ;;  %v1010_v49 = vpop.f32.mrb[27].mxu0 }
 0x12b   : > { %v4280_v50 = vadd.f32 %v1010_v49, %v759_v48 }
 0x12d   : > { %v3169_v51 = vpop.f32.mrb[28].mxu1  ;;  %v3207_v52 = vpop.f32.mrb[28].mxu0 }
 0x12e   : > { %v774_v53 = vadd.f32 %v3169_v51, %v3131_v17  ;;  %v769_v54 = vpop.f32.mrb[29].mxu1  ;;  %v1020_v55 = vpop.f32.mrb[29].mxu0 }
 0x130   : > { %v4282_v56 = vadd.f32 %v3207_v52, %v774_v53 }
 0x131   : > { %v3172_v57 = vpop.f32.mrb[30].mxu1  ;;  %v3210_v58 = vpop.f32.mrb[30].mxu0 }
 0x132   : > { %v778_v59 = vpop.f32.mrb[31].mxu1  ;;  %v1029_v60 = vpop.f32.mrb[31].mxu0 }
 0x133   : > { %v779_v61 = vadd.f32 %v778_v59, %v529_v24 }
 0x135   : > { %v4284_v62 = vadd.f32 %v1029_v60, %v779_v61 }
 0x195   : > { %v3291_v63 = vpop.f32.mrb[32].mxu1  ;;  %v3405_v1 = vpop.f32.mrb[32].mxu0 }
 0x196   : > { %v1680_v3 = vrot.slane %v3291_v63, 1  ;;  %v2362_v4 = vrot.slane %v3405_v1, 2  ;;  %v1511_v6 = vpop.f32.mrb[33].mxu1  ;;  %v2193_v7 = vpop.f32.mrb[33].mxu0 }
 0x197   : > { %v1679_v8 = vrot.slane %v1511_v6, 1  ;;  %v2361_v9 = vrot.slane %v2193_v7, 2 }
 0x199   : > { %v1681_v10 = vsel %vm1678_vm1, %v1679_v8, %v1680_v3  ;;  %v2363_v11 = vsel %vm2360_vm2, %v2361_v9, %v2362_v4  ;;  %v3294_v13 = vpop.f32.mrb[34].mxu1  ;;  %v3408_v15 = vpop.f32.mrb[34].mxu0 }
 0x19a   : > { %v1735_v17 = vadd.f32 %v4256_v2, %v1681_v10  ;;  %v1521_v18 = vpop.f32.mrb[35].mxu1  ;;  %v2203_v20 = vpop.f32.mrb[35].mxu0  ;;  %v1684_v37 = vrot.slane %v3294_v13, 1  ;;  %v2366_v39 = vrot.slane %v3408_v15, 2 }
 0x19b   : > { %v1682_v22 = vrot.slane %v1521_v18, 1  ;;  %v2364_v23 = vrot.slane %v2203_v20, 2 }
 0x19c   : > { %v2417_v24 = vadd.f32 %v2363_v11, %v1735_v17 }
 0x19d   : > { %v1683_v25 = vsel %vm1678_vm1, %v1680_v3, %v1682_v22  ;;  %v2365_v27 = vsel %vm2360_vm2, %v2362_v4, %v2364_v23  ;;  %v3297_v28 = vpop.f32.mrb[36].mxu1  ;;  %v3411_v30 = vpop.f32.mrb[36].mxu0 }
 0x19e   : > { %v2440_v31 = vadd.f32 %v4294_v21, %v2417_v24  ;;  %v1736_v2 = vadd.f32 %v4254_v0, %v1683_v25  ;;  %v1687_v33 = vrot.slane %v3297_v28, 1  ;;  %v2369_v34 = vrot.slane %v3411_v30, 2  ;;  %v1531_v35 = vpop.f32.mrb[37].mxu1  ;;  %v2213_v36 = vpop.f32.mrb[37].mxu0 }
 0x19f   : > { %v1685_v40 = vrot.slane %v1531_v35, 1  ;;  %v2367_v41 = vrot.slane %v2213_v36, 2 }
 0x1a0   : > { %v2456_v42 = vmax.f32 %v2440_v31, 0.0  ;;  %v2418_v43 = vadd.f32 %v2365_v27, %v1736_v2 }
 0x1a1   : > { %v1686_v45 = vsel %vm1678_vm1, %v1684_v37, %v1685_v40  ;;  %v1688_v0 = vsel %vm1678_vm1, %v1685_v40, %v1687_v33  ;;  %v2368_v46 = vsel %vm2360_vm2, %v2366_v39, %v2367_v41  ;;  %v2370_v48 = vsel %vm2360_vm2, %v2367_v41, %v2369_v34  ;;  %v3300_v49 = vpop.f32.mrb[38].mxu1  ;;  %v3414_v51 = vpop.f32.mrb[38].mxu0 }
 0x1a2   : > { %2472 = vst.msk [vmem:[%s4303_s5] sm:$0xff] %vm287_vm0, %v2456_v42  ;;  %v2441_v52 = vadd.f32 %v4294_v21, %v2418_v43  ;;  %v1737_v53 = vadd.f32 %v1686_v45, %v4258_v5  ;;  %v1738_v54 = vadd.f32 %v1688_v0, %v4260_v12  ;;  %v1690_v55 = vrot.slane %v3300_v49, 1  ;;  %v1541_v57 = vpop.f32.mrb[39].mxu1  ;;  %v2223_v58 = vpop.f32.mrb[39].mxu0 }
 0x1a3   : > { %v2372_v59 = vrot.slane %v3414_v51, 2  ;;  %v1689_v60 = vrot.slane %v1541_v57, 1  ;;  %v2371_v61 = vrot.slane %v2223_v58, 2 }
 0x1a4   : > { %v2457_v63 = vmax.f32 %v2441_v52, 0.0  ;;  %v2419_v1 = vadd.f32 %v2368_v46, %v1737_v53  ;;  %v2420_v3 = vadd.f32 %v2370_v48, %v1738_v54 }
 0x1a5   : > { %v1691_v4 = vsel %vm1678_vm1, %v1689_v60, %v1690_v55  ;;  %v2373_v6 = vsel %vm2360_vm2, %v2371_v61, %v2372_v59  ;;  %v3303_v7 = vpop.f32.mrb[40].mxu1  ;;  %v3417_v8 = vpop.f32.mrb[40].mxu0 }
 0x1a6   : > { %2473 = vst.msk [vmem:[%s4303_s5 + $0x8] sm:$0xff] %vm287_vm0, %v2457_v63  ;;  %v2442_v5 = vadd.f32 %v4294_v21, %v2419_v1  ;;  %v2443_v12 = vadd.f32 %v4294_v21, %v2420_v3  ;;  %v1739_v9 = vadd.f32 %v4264_v16, %v1691_v4  ;;  %v1551_v10 = vpop.f32.mrb[41].mxu1  ;;  %v2233_v11 = vpop.f32.mrb[41].mxu0  ;;  %v1694_v33 = vrot.slane %v3303_v7, 1 }
 0x1a7   : > { %v1692_v13 = vrot.slane %v1551_v10, 1  ;;  %v2374_v15 = vrot.slane %v2233_v11, 2  ;;  %v2376_v34 = vrot.slane %v3417_v8, 2 }
 0x1a8   : > { %v2458_v17 = vmax.f32 %v2442_v5, 0.0  ;;  %v2459_v18 = vmax.f32 %v2443_v12, 0.0  ;;  %v2421_v20 = vadd.f32 %v2373_v6, %v1739_v9 }
 0x1a9   : > { %v1693_v22 = vsel %vm1678_vm1, %v1690_v55, %v1692_v13  ;;  %v2375_v23 = vsel %vm2360_vm2, %v2372_v59, %v2374_v15  ;;  %v3306_v24 = vpop.f32.mrb[42].mxu1  ;;  %v3420_v25 = vpop.f32.mrb[42].mxu0 }
 0x1aa   : > { %2474 = vst.msk [vmem:[%s4303_s5 + $0x10] sm:$0xff] %vm287_vm0, %v2458_v17  ;;  %2475 = vst.msk [vmem:[%s4303_s5 + $0x18] sm:$0xff] %vm287_vm0, %v2459_v18  ;;  %v2444_v27 = vadd.f32 %v4294_v21, %v2421_v20  ;;  %v1740_v16 = vadd.f32 %v4262_v14, %v1693_v22  ;;  %v1697_v28 = vrot.slane %v3306_v24, 1  ;;  %v2379_v30 = vrot.slane %v3420_v25, 2  ;;  %v1561_v31 = vpop.f32.mrb[43].mxu1  ;;  %v2243_v2 = vpop.f32.mrb[43].mxu0 }
 0x1ab   : > { %v1695_v35 = vrot.slane %v1561_v31, 1  ;;  %v2377_v36 = vrot.slane %v2243_v2, 2 }
 0x1ac   : > { %v2460_v37 = vmax.f32 %v2444_v27, 0.0  ;;  %v2422_v39 = vadd.f32 %v2375_v23, %v1740_v16 }
 0x1ad   : > { %v1696_v40 = vsel %vm1678_vm1, %v1694_v33, %v1695_v35  ;;  %v1698_v41 = vsel %vm1678_vm1, %v1695_v35, %v1697_v28  ;;  %v2378_v42 = vsel %vm2360_vm2, %v2376_v34, %v2377_v36  ;;  %v2380_v43 = vsel %vm2360_vm2, %v2377_v36, %v2379_v30  ;;  %v3309_v14 = vpop.f32.mrb[44].mxu1  ;;  %v3423_v45 = vpop.f32.mrb[44].mxu0 }
 0x1ae   : > { %2476 = vst.msk [vmem:[%s4303_s5 + $0x20] sm:$0xff] %vm287_vm0, %v2460_v37  ;;  %v2445_v0 = vadd.f32 %v4294_v21, %v2422_v39  ;;  %v1741_v46 = vadd.f32 %v1696_v40, %v4266_v19  ;;  %v1742_v48 = vadd.f32 %v1698_v41, %v4268_v26  ;;  %v1700_v49 = vrot.slane %v3309_v14, 1  ;;  %v1571_v51 = vpop.f32.mrb[45].mxu1  ;;  %v2253_v52 = vpop.f32.mrb[45].mxu0 }
 0x1af   : > { %v2382_v53 = vrot.slane %v3423_v45, 2  ;;  %v1699_v54 = vrot.slane %v1571_v51, 1  ;;  %v2381_v55 = vrot.slane %v2253_v52, 2 }
 0x1b0   : > { %v2461_v57 = vmax.f32 %v2445_v0, 0.0  ;;  %v2423_v58 = vadd.f32 %v2378_v42, %v1741_v46  ;;  %v2424_v59 = vadd.f32 %v2380_v43, %v1742_v48 }
 0x1b1   : > { %v1701_v60 = vsel %vm1678_vm1, %v1699_v54, %v1700_v49  ;;  %v2383_v61 = vsel %vm2360_vm2, %v2381_v55, %v2382_v53  ;;  %v3312_v63 = vpop.f32.mrb[46].mxu1  ;;  %v3426_v1 = vpop.f32.mrb[46].mxu0 }
 0x1b2   : > { %2477 = vst.msk [vmem:[%s4303_s5 + $0x28] sm:$0xff] %vm287_vm0, %v2461_v57  ;;  %v2446_v19 = vadd.f32 %v4294_v21, %v2423_v58  ;;  %v2447_v26 = vadd.f32 %v4294_v21, %v2424_v59  ;;  %v1743_v3 = vadd.f32 %v4272_v32, %v1701_v60  ;;  %v1581_v4 = vpop.f32.mrb[47].mxu1  ;;  %v2263_v6 = vpop.f32.mrb[47].mxu0  ;;  %v1704_v24 = vrot.slane %v3312_v63, 1 }
 0x1b3   : > { %v1702_v7 = vrot.slane %v1581_v4, 1  ;;  %v2384_v8 = vrot.slane %v2263_v6, 2  ;;  %v2386_v25 = vrot.slane %v3426_v1, 2 }
 0x1b4   : > { %v2462_v5 = vmax.f32 %v2446_v19, 0.0  ;;  %v2463_v12 = vmax.f32 %v2447_v26, 0.0  ;;  %v2425_v9 = vadd.f32 %v2383_v61, %v1743_v3 }
 0x1b5   : > { %v1703_v10 = vsel %vm1678_vm1, %v1700_v49, %v1702_v7  ;;  %v2385_v11 = vsel %vm2360_vm2, %v2382_v53, %v2384_v8  ;;  %v3315_v13 = vpop.f32.mrb[48].mxu1  ;;  %v3429_v15 = vpop.f32.mrb[48].mxu0 }
 0x1b6   : > { %2478 = vst.msk [vmem:[%s4303_s5 + $0x30] sm:$0xff] %vm287_vm0, %v2462_v5  ;;  %2479 = vst.msk [vmem:[%s4303_s5 + $0x38] sm:$0xff] %vm287_vm0, %v2463_v12  ;;  %v2448_v17 = vadd.f32 %v4294_v21, %v2425_v9  ;;  %v1744_v32 = vadd.f32 %v4270_v29, %v1703_v10  ;;  %v1707_v18 = vrot.slane %v3315_v13, 1  ;;  %v2389_v20 = vrot.slane %v3429_v15, 2  ;;  %v1591_v22 = vpop.f32.mrb[49].mxu1  ;;  %v2273_v23 = vpop.f32.mrb[49].mxu0 }
 0x1b7   : > { %v1705_v27 = vrot.slane %v1591_v22, 1  ;;  %v2387_v16 = vrot.slane %v2273_v23, 2 }
 0x1b8   : > { %v2464_v28 = vmax.f32 %v2448_v17, 0.0  ;;  %v2426_v30 = vadd.f32 %v2385_v11, %v1744_v32 }
 0x1b9   : > { %v1706_v31 = vsel %vm1678_vm1, %v1704_v24, %v1705_v27  ;;  %v1708_v2 = vsel %vm1678_vm1, %v1705_v27, %v1707_v18  ;;  %v2388_v33 = vsel %vm2360_vm2, %v2386_v25, %v2387_v16  ;;  %v2390_v34 = vsel %vm2360_vm2, %v2387_v16, %v2389_v20  ;;  %v3318_v29 = vpop.f32.mrb[50].mxu1  ;;  %v3432_v35 = vpop.f32.mrb[50].mxu0 }
 0x1ba   : > { %2480 = vst.msk [vmem:[%s4303_s5 + $0x40] sm:$0xff] %vm287_vm0, %v2464_v28  ;;  %v2449_v36 = vadd.f32 %v4294_v21, %v2426_v30  ;;  %v1745_v37 = vadd.f32 %v1706_v31, %v4274_v38  ;;  %v1746_v39 = vadd.f32 %v1708_v2, %v4276_v44  ;;  %v1710_v40 = vrot.slane %v3318_v29, 1  ;;  %v1601_v41 = vpop.f32.mrb[51].mxu1  ;;  %v2283_v42 = vpop.f32.mrb[51].mxu0 }
 0x1bb   : > { %v2392_v43 = vrot.slane %v3432_v35, 2  ;;  %v1709_v14 = vrot.slane %v1601_v41, 1  ;;  %v2391_v45 = vrot.slane %v2283_v42, 2 }
 0x1bc   : > { %v2465_v0 = vmax.f32 %v2449_v36, 0.0  ;;  %v2427_v46 = vadd.f32 %v2388_v33, %v1745_v37  ;;  %v2428_v48 = vadd.f32 %v2390_v34, %v1746_v39 }
 0x1bd   : > { %v1711_v49 = vsel %vm1678_vm1, %v1709_v14, %v1710_v40  ;;  %v2393_v51 = vsel %vm2360_vm2, %v2391_v45, %v2392_v43  ;;  %v3321_v52 = vpop.f32.mrb[52].mxu1  ;;  %v3435_v53 = vpop.f32.mrb[52].mxu0 }
 0x1be   : > { %2481 = vst.msk [vmem:[%s4303_s5 + $0x48] sm:$0xff] %vm287_vm0, %v2465_v0  ;;  %v2450_v38 = vadd.f32 %v4294_v21, %v2427_v46  ;;  %v2451_v44 = vadd.f32 %v4294_v21, %v2428_v48  ;;  %v1747_v54 = vadd.f32 %v4280_v50, %v1711_v49  ;;  %v1611_v55 = vpop.f32.mrb[53].mxu1  ;;  %v2293_v57 = vpop.f32.mrb[53].mxu0  ;;  %v1714_v12 = vrot.slane %v3321_v52, 1 }
 0x1bf   : > { %v1712_v58 = vrot.slane %v1611_v55, 1  ;;  %v2394_v59 = vrot.slane %v2293_v57, 2  ;;  %v2396_v9 = vrot.slane %v3435_v53, 2 }
 0x1c0   : > { %v2466_v60 = vmax.f32 %v2450_v38, 0.0  ;;  %v2467_v61 = vmax.f32 %v2451_v44, 0.0  ;;  %v2429_v63 = vadd.f32 %v2393_v51, %v1747_v54 }
 0x1c1   : > { %v1713_v1 = vsel %vm1678_vm1, %v1710_v40, %v1712_v58  ;;  %v2395_v19 = vsel %vm2360_vm2, %v2392_v43, %v2394_v59  ;;  %v3324_v26 = vpop.f32.mrb[54].mxu1  ;;  %v3438_v3 = vpop.f32.mrb[54].mxu0 }
 0x1c2   : > { %2482 = vst.msk [vmem:[%s4303_s5 + $0x50] sm:$0xff] %vm287_vm0, %v2466_v60  ;;  %2483 = vst.msk [vmem:[%s4303_s5 + $0x58] sm:$0xff] %vm287_vm0, %v2467_v61  ;;  %v2452_v4 = vadd.f32 %v4294_v21, %v2429_v63  ;;  %v1748_v50 = vadd.f32 %v4278_v47, %v1713_v1  ;;  %v1717_v6 = vrot.slane %v3324_v26, 1  ;;  %v2399_v7 = vrot.slane %v3438_v3, 2  ;;  %v1621_v8 = vpop.f32.mrb[55].mxu1  ;;  %v2303_v5 = vpop.f32.mrb[55].mxu0 }
 0x1c3   : > { %v1715_v10 = vrot.slane %v1621_v8, 1  ;;  %v2397_v11 = vrot.slane %v2303_v5, 2 }
 0x1c4   : > { %v2468_v13 = vmax.f32 %v2452_v4, 0.0  ;;  %v2430_v15 = vadd.f32 %v2395_v19, %v1748_v50 }
 0x1c5   : > { %v1716_v17 = vsel %vm1678_vm1, %v1714_v12, %v1715_v10  ;;  %v1718_v32 = vsel %vm1678_vm1, %v1715_v10, %v1717_v6  ;;  %v2398_v18 = vsel %vm2360_vm2, %v2396_v9, %v2397_v11  ;;  %v2400_v47 = vsel %vm2360_vm2, %v2397_v11, %v2399_v7 }
 0x1c6   : > { %2484 = vst.msk [vmem:[%s4303_s5 + $0x60] sm:$0xff] %vm287_vm0, %v2468_v13  ;;  %v2453_v20 = vadd.f32 %v4294_v21, %v2430_v15  ;;  %v1749_v22 = vadd.f32 %v1716_v17, %v4282_v56  ;;  %v1750_v23 = vadd.f32 %v1718_v32, %v4284_v62 }
 0x1c8   : > { %v2469_v24 = vmax.f32 %v2453_v20, 0.0  ;;  %v2431_v25 = vadd.f32 %v2398_v18, %v1749_v22  ;;  %v2432_v27 = vadd.f32 %v2400_v47, %v1750_v23 }
 0x1ca   : > { %2485 = vst.msk [vmem:[%s4303_s5 + $0x68] sm:$0xff] %vm287_vm0, %v2469_v24  ;;  %v2454_v16 = vadd.f32 %v4294_v21, %v2431_v25  ;;  %v2455_v28 = vadd.f32 %v4294_v21, %v2432_v27 }
 0x1cc   : > { %v2470_v30 = vmax.f32 %v2454_v16, 0.0  ;;  %v2471_v31 = vmax.f32 %v2455_v28, 0.0 }
 0x1ce   : > { %2486 = vst.msk [vmem:[%s4303_s5 + $0x70] sm:$0xff] %vm287_vm0, %v2470_v30  ;;  %2487 = vst.msk [vmem:[%s4303_s5 + $0x78] sm:$0xff] %vm287_vm0, %v2471_v31 }
 0x1cf PF: > { %s13_s16 = sadd.s32 1, %s3633_s16   ;;  %s4413_s12 = smov %s3625_s14 }
 0x1d0   : > { %p10_p8 = scmp.ge.s32.totalorder %s13_s16, 6   ;;  %s4414_s13 = smov %s3629_s15 }
 0x1d1   : > { %s4415_s14 = smov %s4418_s17  ;;  %s4416_s15 = smov %s4422_s18 }
 0x1d2   :  { %12 = sbr.rel (!%p10_p8) target bundleno = 3 (0x3), region = 72 }

// kernel: decoder_block_forward.4
= control target key start
LH: loop header
LB: loop body
LE: loop exit
PB: predicated region body
PF: predicated region fallthrough
CT: control target
= control target key end

     0   :  { %s6979_s18 = smov 0   ;;  %s6981_s19 = smov 0   ;;  %s8419_s0 = inlined_call_operand.vmem [shape: f32[2,2,10,24,8], index: 0, kind: input, shape index: {}]   ;;  %s8420_s1 = inlined_call_operand.vmem [shape: f32[2,2,10,24,4], index: 1, kind: input, shape index: {}]   ;;  %s8421_s2 = inlined_call_operand.vmem [shape: f32[3,3,8,8], index: 2, kind: input, shape index: {}]   ;;  %s8422_s3 = inlined_call_operand.vmem [shape: f32[3,3,4,8], index: 3, kind: input, shape index: {}]   ;;  %s8423_s4 = inlined_call_operand.vmem [shape: f32[1,8], index: 4, kind: input, shape index: {}]   ;;  %s8424_s5 = inlined_call_operand.vmem [shape: f32[2,16,16,8], index: 5, kind: output, shape index: {}]  }
   0x1   :  { %s6983_s20 = smov 0   ;;  %s6985_s21 = smov 0  }
   0x2   :  { %s6987_s22 = smov 0  }
   0x3 LB: > { %s24_s23 = sadd.s32 1, %s6939_s20  ;;  %s27_s24 = sadd.s32 1, %s6943_s21  ;;  %s6947_s22 = sphi %s6987_s22, %s15_s22   ;;  %s6943_s21 = sphi %s6985_s21, %s8482_s21   ;;  %s6939_s20 = sphi %s6983_s20, %s8481_s20   ;;  %s6935_s19 = sphi %s6981_s19, %s8480_s19   ;;  %s6931_s18 = sphi %s6979_s18, %s8479_s18  }
   0x4   : > { %p25_p0 = scmp.ge.s32.totalorder %s24_s23, 2  ;;  %p4869_p1 = scmp.ge.s32.totalorder %s6947_s22, 1 }
   0x5   : > { %p223_p2 = scmp.lt.s32.totalorder %s6947_s22, 5 }
   0x6   : > { %s8484_s23 = smov (%p25_p0, %s24_s23), 0  ;;  %s8486_s24 = smov (!%p25_p0, %s27_s24), %s6943_s21 }
   0x7   : > { %p224_p3 = pnand %p4869_p1, %p223_p2  ;;  %p29_p4 = scmp.ge.s32.totalorder %s8486_s24, 2 }
   0x9   : > { %s8488_s24 = smov (%p29_p4, %s8486_s24), 0  ;;  %227 = sbr.rel (%p224_p3) target bundleno = 681 (0x2a9), region = 40 }
  0x10   : > { %v447_v0 = vld [vmem:[%s8422_s3] sm:$0xf]  ;;  %vm521_vm0 = vcmask 1043456   ;;  %v5046_v1 = vld [vmem:[%s8422_s3 + $0xc] sm:$0xf]  ;;  %p269_p5 = scmp.lt.s32.totalorder %s6935_s19, 1 }
  0x11   : > { %5882 = vmatprep.subr.msk.mxu1 %vm521_vm0, %v447_v0  ;;  %5996 = vmatprep.subr.msk.mxu0 %vm521_vm0, %v5046_v1  ;;  %p271_p6 = scmp.lt.s32.totalorder %s6931_s18, 1  ;;  %v446_v2 = vld [vmem:[%s8421_s2] sm:$0xff]  ;;  %v5072_v3 = vld [vmem:[%s8421_s2 + $0x30] sm:$0xff]  ;;  %vm448_vm1 = vcmask 31744   ;;  %v7071_v10 = vld [vmem:[%s8421_s2 + $0x18] sm:$0xff]  ;;  %vm702_vm2 = vcmask 64512  }
  0x12   : > { %5883 = vmatpush3.msk.msra.mxu1 %vm521_vm0, %v447_v0  ;;  %s8490_s19 = smov (!%p269_p5, %s6935_s19), 1  ;;  %5997 = vmatpush3.msk.msra.mxu0 %vm521_vm0, %v5046_v1  ;;  %v7076_v11 = vld [vmem:[%s8422_s3 + $0x18] sm:$0xf]  ;;  %v7268_v39 = vld [vmem:[%s8422_s3 + $0x4] sm:$0xf]  ;;  %v5123_v1 = vld [vmem:[%s8421_s2 + $0x8] sm:$0xff] }
  0x13   : > { %s272_s8 = scalar_select %p271_p6, %s6931_s18, 1  ;;  %5920 = vmatprep.subr.mxu1 %v446_v2  ;;  %6034 = vmatprep.subr.mxu0 %v5072_v3  ;;  %v7273_v40 = vld [vmem:[%s8422_s3 + $0x8] sm:$0xf]  ;;  %vm3293_vm3 = vcmask 1046528   ;;  %vm4617_vm4 = vcmask 1045504  }
  0x14   : > { %s6847_s9 = smul.u32 60, %s8490_s19  ;;  %s4874_s13 = sshll.u32 %s8490_s19, 5 }
  0x15   : > { %s6846_s10 = smul.u32 30, %s272_s8 }
  0x17   : > { %s7032_s11 = sadd.s32 %s6847_s9, %s6846_s10 }
  0x18   : > { %s4870_s12 = sshll.u32 %s7032_s11, 3 }
  0x19   : > { %s7040_s15 = scalar_lea.vmem %s8420_s1, %s4870_s12  ;;  %s7222_s29 = scalar_lea.vmem %s8419_s0, %s4870_s12 }
  0x1a   : > { %v7043_v4 = vld [vmem:[%s7040_s15] sm:$0xff]  ;;  %v7046_v5 = vld [vmem:[%s7040_s15 + $0x18] sm:$0xff]  ;;  %v7049_v6 = vld [vmem:[%s7040_s15 + $0x8] sm:$0xff] }
  0x1b   : > { %5884 = vmatprep.mubr.msk.f32.mxu1 %vm448_vm1, %v7043_v4  ;;  %5998 = vmatprep.mubr.msk.f32.mxu0 %vm448_vm1, %v7046_v5  ;;  %v7056_v7 = vld [vmem:[%s7040_s15 + $0x20] sm:$0xff]  ;;  %v7059_v8 = vld [vmem:[%s7040_s15 + $0x10] sm:$0xff]  ;;  %v7062_v9 = vld [vmem:[%s7040_s15 + $0x28] sm:$0xff] }
  0x1c   : > { %5885 = vmatmul.mubr.msk.f32.vlgmr.msra.gmra.mrb[0].mxu1 %vm448_vm1, %v7049_v6  ;;  %5999 = vmatmul.mubr.msk.f32.vlgmr.msra.gmra.mrb[0].mxu0 %vm448_vm1, %v7056_v7  ;;  %v7079_v12 = vld [vmem:[%s7040_s15 + $0x30] sm:$0xff]  ;;  %v7086_v13 = vld [vmem:[%s7040_s15 + $0x38] sm:$0xff]  ;;  %v7100_v14 = vld [vmem:[%s7040_s15 + $0x40] sm:$0xff] }
  0x1d   : > { %5921 = vmatpush3.msra.mxu1 %v446_v2  ;;  %6035 = vmatpush3.msra.mxu0 %v5072_v3  ;;  %v7103_v15 = vld [vmem:[%s7040_s15 + $0x48] sm:$0xff]  ;;  %v7114_v16 = vld [vmem:[%s7040_s15 + $0x50] sm:$0xff]  ;;  %v7117_v17 = vld [vmem:[%s7040_s15 + $0x58] sm:$0xff] }
  0x1e   : > { %5887 = vmatprep.mubr.msk.f32.mxu1 %vm448_vm1, %v7059_v8  ;;  %6001 = vmatprep.mubr.msk.f32.mxu0 %vm448_vm1, %v7062_v9  ;;  %v7128_v18 = vld [vmem:[%s7040_s15 + $0x60] sm:$0xff]  ;;  %v7131_v19 = vld [vmem:[%s7040_s15 + $0x68] sm:$0xff]  ;;  %v7142_v20 = vld [vmem:[%s7040_s15 + $0x70] sm:$0xff] }
  0x1f   : > { %5958 = vmatprep.subr.mxu1 %v7071_v10  ;;  %6072 = vmatprep.subr.msk.mxu0 %vm521_vm0, %v7076_v11  ;;  %v7145_v21 = vld [vmem:[%s7040_s15 + $0x78] sm:$0xff]  ;;  %v7156_v22 = vld [vmem:[%s7040_s15 + $0x80] sm:$0xff]  ;;  %v7159_v23 = vld [vmem:[%s7040_s15 + $0x88] sm:$0xff] }
  0x20   : > { %5888 = vmatmul.mubr.msk.f32.gmra.mrb[2].mxu1 %vm448_vm1, %v7046_v5  ;;  %6002 = vmatmul.mubr.msk.f32.gmra.mrb[2].mxu0 %vm448_vm1, %v7079_v12  ;;  %v7170_v24 = vld [vmem:[%s7040_s15 + $0x90] sm:$0xff]  ;;  %v7173_v25 = vld [vmem:[%s7040_s15 + $0x98] sm:$0xff]  ;;  %v7184_v26 = vld [vmem:[%s7040_s15 + $0xa0] sm:$0xff] }
  0x21   : > { %5890 = vmatprep.mubr.msk.f32.mxu1 %vm448_vm1, %v7056_v7  ;;  %6004 = vmatprep.mubr.msk.f32.mxu0 %vm448_vm1, %v7086_v13  ;;  %v7187_v27 = vld [vmem:[%s7040_s15 + $0xa8] sm:$0xff]  ;;  %v7198_v28 = vld [vmem:[%s7040_s15 + $0xb0] sm:$0xff]  ;;  %v7201_v29 = vld [vmem:[%s7040_s15 + $0xb8] sm:$0xff] }
  0x22   : > { %v7212_v30 = vld [vmem:[%s7040_s15 + $0xc0] sm:$0xff]  ;;  %v7215_v31 = vld [vmem:[%s7040_s15 + $0xc8] sm:$0xff]  ;;  %v7233_v32 = vld [vmem:[%s7040_s15 + $0xd0] sm:$0xff] }
  0x23   : > { %v7236_v33 = vld [vmem:[%s7222_s29] sm:$0xff]  ;;  %v7239_v34 = vld [vmem:[%s7222_s29 + $0x30] sm:$0xff]  ;;  %v7250_v35 = vld [vmem:[%s7222_s29 + $0x8] sm:$0xff] }
  0x24   : > { %5891 = vmatmul.mubr.msk.f32.gmra.mrb[4].mxu1 %vm448_vm1, %v7062_v9  ;;  %6005 = vmatmul.mubr.msk.f32.gmra.mrb[4].mxu0 %vm448_vm1, %v7100_v14  ;;  %v7253_v36 = vld [vmem:[%s7222_s29 + $0x38] sm:$0xff]  ;;  %v7256_v37 = vld [vmem:[%s7222_s29 + $0x10] sm:$0xff]  ;;  %v7259_v38 = vld [vmem:[%s7222_s29 + $0x40] sm:$0xff] }
  0x25   : > { %5893 = vmatprep.mubr.msk.f32.mxu1 %vm448_vm1, %v7079_v12  ;;  %6007 = vmatprep.mubr.msk.f32.mxu0 %vm448_vm1, %v7103_v15  ;;  %v7279_v41 = vld [vmem:[%s7222_s29 + $0x18] sm:$0xff]  ;;  %v7282_v42 = vld [vmem:[%s7222_s29 + $0x48] sm:$0xff]  ;;  %v7289_v43 = vld [vmem:[%s7222_s29 + $0x20] sm:$0xff] }
  0x26   : > { %8449 = vst [vmem:[#allocation2_spill] sm:$0xff] %v7282_v42  ;;  %v7292_v44 = vld [vmem:[%s7222_s29 + $0x50] sm:$0xff]  ;;  %v7307_v45 = vld [vmem:[%s7222_s29 + $0x28] sm:$0xff]  ;;  %v7310_v46 = vld [vmem:[%s7222_s29 + $0x58] sm:$0xff] }
  0x27   : > { %v7313_v47 = vld [vmem:[%s7222_s29 + $0x60] sm:$0xff]  ;;  %v7324_v48 = vld [vmem:[%s7222_s29 + $0x68] sm:$0xff]  ;;  %v7327_v49 = vld [vmem:[%s7222_s29 + $0x70] sm:$0xff] }
  0x28   : > { %5894 = vmatmul.mubr.msk.f32.gmra.mrb[6].mxu1 %vm448_vm1, %v7086_v13  ;;  %6008 = vmatmul.mubr.msk.f32.gmra.mrb[6].mxu0 %vm448_vm1, %v7114_v16  ;;  %8450 = vst [vmem:[#allocation3_spill] sm:$0xff] %v7324_v48  ;;  %8451 = vst [vmem:[#allocation4_spill] sm:$0xff] %v7327_v49  ;;  %v7338_v50 = vld [vmem:[%s7222_s29 + $0x78] sm:$0xff]  ;;  %v7341_v51 = vld [vmem:[%s7222_s29 + $0x80] sm:$0xff] }
  0x29   : > { %5896 = vmatprep.mubr.msk.f32.mxu1 %vm448_vm1, %v7100_v14  ;;  %6010 = vmatprep.mubr.msk.f32.mxu0 %vm448_vm1, %v7117_v17  ;;  %8452 = vst [vmem:[#allocation5_spill] sm:$0xff] %v7338_v50  ;;  %v7352_v52 = vld [vmem:[%s7222_s29 + $0x88] sm:$0xff]  ;;  %v7355_v53 = vld [vmem:[%s7222_s29 + $0x90] sm:$0xff]  ;;  %v7366_v54 = vld [vmem:[%s7222_s29 + $0x98] sm:$0xff] }
  0x2a   : > { %v7369_v55 = vld [vmem:[%s7222_s29 + $0xa0] sm:$0xff]  ;;  %v7380_v56 = vld [vmem:[%s7222_s29 + $0xa8] sm:$0xff]  ;;  %v7383_v57 = vld [vmem:[%s7222_s29 + $0xb0] sm:$0xff] }
  0x2b   : > { %8453 = vst [vmem:[#allocation6_spill] sm:$0xff] %v7369_v55  ;;  %8454 = vst [vmem:[#allocation7_spill] sm:$0xff] %v7380_v56  ;;  %v7394_v58 = vld [vmem:[%s7222_s29 + $0xb8] sm:$0xff]  ;;  %v7397_v59 = vld [vmem:[%s7222_s29 + $0xc0] sm:$0xff] }
  0x2c   : > { %5897 = vmatmul.mubr.msk.f32.gmra.mrb[8].mxu1 %vm448_vm1, %v7103_v15  ;;  %6011 = vmatmul.mubr.msk.f32.gmra.mrb[8].mxu0 %vm448_vm1, %v7128_v18  ;;  %v7408_v60 = vld [vmem:[%s7222_s29 + $0xc8] sm:$0xff]  ;;  %v7411_v61 = vld [vmem:[%s7222_s29 + $0xd0] sm:$0xff]  ;;  %v7422_v62 = vld [vmem:[%s7222_s29 + $0xd8] sm:$0xff] }
  0x2d   : > { %5899 = vmatprep.mubr.msk.f32.mxu1 %vm448_vm1, %v7114_v16  ;;  %6013 = vmatprep.mubr.msk.f32.mxu0 %vm448_vm1, %v7131_v19  ;;  %8455 = vst [vmem:[#allocation8_spill] sm:$0xff] %v7422_v62  ;;  %v7425_v63 = vld [vmem:[%s7222_s29 + $0xe0] sm:$0xff]  ;;  %v7436_v0 = vld [vmem:[%s7222_s29 + $0xe8] sm:$0xff]  ;;  %v5276_v2 = vld [vmem:[%s8421_s2 + $0x10] sm:$0xff] }
  0x2e   : > { %8456 = vst [vmem:[#allocation9_spill] sm:$0xff] %v7425_v63  ;;  %8457 = vst [vmem:[#allocation10_spill] sm:$0xff] %v7436_v0  ;;  %v7537_v3 = vld [vmem:[%s7040_s15 + $0xd8] sm:$0xff] }
  0x2f   : > { %8458 = vst [vmem:[#allocation11_spill] sm:$0xff] %v7537_v3 }
  0x30   : > { %5900 = vmatmul.mubr.msk.f32.gmra.mrb[10].mxu1 %vm448_vm1, %v7117_v17  ;;  %6014 = vmatmul.mubr.msk.f32.gmra.mrb[10].mxu0 %vm448_vm1, %v7142_v20 }
  0x31   : > { %5902 = vmatprep.mubr.msk.f32.mxu1 %vm448_vm1, %v7128_v18  ;;  %6016 = vmatprep.mubr.msk.f32.mxu0 %vm448_vm1, %v7145_v21 }
  0x34   : > { %5903 = vmatmul.mubr.msk.f32.gmra.mrb[12].mxu1 %vm448_vm1, %v7131_v19  ;;  %6017 = vmatmul.mubr.msk.f32.gmra.mrb[12].mxu0 %vm448_vm1, %v7156_v22 }
  0x35   : > { %5905 = vmatprep.mubr.msk.f32.mxu1 %vm448_vm1, %v7142_v20  ;;  %6019 = vmatprep.mubr.msk.f32.mxu0 %vm448_vm1, %v7159_v23 }
  0x38   : > { %5906 = vmatmul.mubr.msk.f32.gmra.mrb[14].mxu1 %vm448_vm1, %v7145_v21  ;;  %6020 = vmatmul.mubr.msk.f32.gmra.mrb[14].mxu0 %vm448_vm1, %v7170_v24 }
  0x39   : > { %5908 = vmatprep.mubr.msk.f32.mxu1 %vm448_vm1, %v7156_v22  ;;  %6022 = vmatprep.mubr.msk.f32.mxu0 %vm448_vm1, %v7173_v25 }
  0x3c   : > { %5909 = vmatmul.mubr.msk.f32.gmra.mrb[16].mxu1 %vm448_vm1, %v7159_v23  ;;  %6023 = vmatmul.mubr.msk.f32.gmra.mrb[16].mxu0 %vm448_vm1, %v7184_v26 }
  0x3d   : > { %5911 = vmatprep.mubr.msk.f32.mxu1 %vm448_vm1, %v7170_v24  ;;  %6025 = vmatprep.mubr.msk.f32.mxu0 %vm448_vm1, %v7187_v27 }
  0x40   : > { %5912 = vmatmul.mubr.msk.f32.gmra.mrb[18].mxu1 %vm448_vm1, %v7173_v25  ;;  %6026 = vmatmul.mubr.msk.f32.gmra.mrb[18].mxu0 %vm448_vm1, %v7198_v28 }
  0x41   : > { %5914 = vmatprep.mubr.msk.f32.mxu1 %vm448_vm1, %v7184_v26  ;;  %6028 = vmatprep.mubr.msk.f32.mxu0 %vm448_vm1, %v7201_v29 }
  0x44   : > { %5915 = vmatmul.mubr.msk.f32.gmra.mrb[20].mxu1 %vm448_vm1, %v7187_v27  ;;  %6029 = vmatmul.mubr.msk.f32.gmra.mrb[20].mxu0 %vm448_vm1, %v7212_v30 }
  0x45   : > { %5917 = vmatprep.mubr.msk.f32.mxu1 %vm448_vm1, %v7198_v28  ;;  %6031 = vmatprep.mubr.msk.f32.mxu0 %vm448_vm1, %v7215_v31 }
  0x48   : > { %5918 = vmatmul.mubr.msk.f32.gmra.mrb[22].mxu1 %vm448_vm1, %v7201_v29  ;;  %6032 = vmatmul.mubr.msk.f32.gmra.mrb[22].mxu0 %vm448_vm1, %v7233_v32 }
  0x49   : > { %5922 = vmatprep.mubr.msk.f32.mxu1 %vm702_vm2, %v7236_v33  ;;  %6036 = vmatprep.mubr.msk.f32.mxu0 %vm702_vm2, %v7239_v34 }
  0x4c   : > { %5923 = vmatmul.mubr.msk.f32.vlgmr.msra.gmra.mrb[0].mxu1 %vm702_vm2, %v7250_v35  ;;  %6037 = vmatmul.mubr.msk.f32.vlgmr.msra.gmra.mrb[0].mxu0 %vm702_vm2, %v7253_v36 }
  0x4d   : > { %5959 = vmatpush3.msra.mxu1 %v7071_v10  ;;  %6073 = vmatpush3.msk.msra.mxu0 %vm521_vm0, %v7076_v11  ;;  %v7540_v10 = vld [vmem:[%s7040_s15 + $0xe0] sm:$0xff]  ;;  %v7551_v11 = vld [vmem:[%s7040_s15 + $0xe8] sm:$0xff] }
  0x4e   : > { %5925 = vmatprep.mubr.msk.f32.mxu1 %vm702_vm2, %v7256_v37  ;;  %6039 = vmatprep.mubr.msk.f32.mxu0 %vm702_vm2, %v7259_v38  ;;  %8459 = vst [vmem:[#allocation12_spill] sm:$0xff] %v7540_v10  ;;  %8460 = vst [vmem:[#allocation13_spill] sm:$0xff] %v7551_v11 }
  0x4f   : > { %6110 = vmatprep.subr.msk.mxu1 %vm521_vm0, %v7268_v39  ;;  %6338 = vmatprep.subr.msk.mxu0 %vm521_vm0, %v7273_v40 }
  0x50   : > { %5926 = vmatmul.mubr.msk.f32.gmra.mrb[24].mxu1 %vm702_vm2, %v7279_v41  ;;  %6040 = vmatmul.mubr.msk.f32.gmra.mrb[24].mxu0 %vm702_vm2, %v7282_v42 }
  0x51   : > { %5928 = vmatprep.mubr.msk.f32.mxu1 %vm702_vm2, %v7289_v43  ;;  %6042 = vmatprep.mubr.msk.f32.mxu0 %vm702_vm2, %v7292_v44 }
  0x54   : > { %5929 = vmatmul.mubr.msk.f32.gmra.mrb[26].mxu1 %vm702_vm2, %v7307_v45  ;;  %6043 = vmatmul.mubr.msk.f32.gmra.mrb[26].mxu0 %vm702_vm2, %v7310_v46 }
  0x55   : > { %5931 = vmatprep.mubr.msk.f32.mxu1 %vm702_vm2, %v7239_v34  ;;  %6045 = vmatprep.mubr.msk.f32.mxu0 %vm702_vm2, %v7313_v47 }
  0x58   : > { %5932 = vmatmul.mubr.msk.f32.gmra.mrb[6].mxu1 %vm702_vm2, %v7253_v36  ;;  %6046 = vmatmul.mubr.msk.f32.gmra.mrb[6].mxu0 %vm702_vm2, %v7324_v48 }
  0x59   : > { %5934 = vmatprep.mubr.msk.f32.mxu1 %vm702_vm2, %v7259_v38  ;;  %6048 = vmatprep.mubr.msk.f32.mxu0 %vm702_vm2, %v7327_v49 }
  0x5c   : > { %5935 = vmatmul.mubr.msk.f32.gmra.mrb[28].mxu1 %vm702_vm2, %v7282_v42  ;;  %6049 = vmatmul.mubr.msk.f32.gmra.mrb[28].mxu0 %vm702_vm2, %v7338_v50 }
  0x5d   : > { %5937 = vmatprep.mubr.msk.f32.mxu1 %vm702_vm2, %v7292_v44  ;;  %6051 = vmatprep.mubr.msk.f32.mxu0 %vm702_vm2, %v7341_v51 }
  0x60   : > { %5938 = vmatmul.mubr.msk.f32.gmra.mrb[30].mxu1 %vm702_vm2, %v7310_v46  ;;  %6052 = vmatmul.mubr.msk.f32.gmra.mrb[30].mxu0 %vm702_vm2, %v7352_v52 }
  0x61   : > { %5940 = vmatprep.mubr.msk.f32.mxu1 %vm702_vm2, %v7313_v47  ;;  %6054 = vmatprep.mubr.msk.f32.mxu0 %vm702_vm2, %v7355_v53 }
  0x64   : > { %5941 = vmatmul.mubr.msk.f32.gmra.mrb[12].mxu1 %vm702_vm2, %v7324_v48  ;;  %6055 = vmatmul.mubr.msk.f32.gmra.mrb[12].mxu0 %vm702_vm2, %v7366_v54 }
  0x65   : > { %5943 = vmatprep.mubr.msk.f32.mxu1 %vm702_vm2, %v7327_v49  ;;  %6057 = vmatprep.mubr.msk.f32.mxu0 %vm702_vm2, %v7369_v55 }
  0x68   : > { %5944 = vmatmul.mubr.msk.f32.gmra.mrb[32].mxu1 %vm702_vm2, %v7338_v50  ;;  %6058 = vmatmul.mubr.msk.f32.gmra.mrb[32].mxu0 %vm702_vm2, %v7380_v56 }
  0x69   : > { %5946 = vmatprep.mubr.msk.f32.mxu1 %vm702_vm2, %v7341_v51  ;;  %6060 = vmatprep.mubr.msk.f32.mxu0 %vm702_vm2, %v7383_v57 }
  0x6c   : > { %5947 = vmatmul.mubr.msk.f32.gmra.mrb[34].mxu1 %vm702_vm2, %v7352_v52  ;;  %6061 = vmatmul.mubr.msk.f32.gmra.mrb[34].mxu0 %vm702_vm2, %v7394_v58 }
  0x6d   : > { %5949 = vmatprep.mubr.msk.f32.mxu1 %vm702_vm2, %v7355_v53  ;;  %6063 = vmatprep.mubr.msk.f32.mxu0 %vm702_vm2, %v7397_v59 }
  0x70   : > { %5950 = vmatmul.mubr.msk.f32.gmra.mrb[18].mxu1 %vm702_vm2, %v7366_v54  ;;  %6064 = vmatmul.mubr.msk.f32.gmra.mrb[18].mxu0 %vm702_vm2, %v7408_v60 }
  0x71   : > { %5952 = vmatprep.mubr.msk.f32.mxu1 %vm702_vm2, %v7369_v55  ;;  %6066 = vmatprep.mubr.msk.f32.mxu0 %vm702_vm2, %v7411_v61 }
  0x74   : > { %5953 = vmatmul.mubr.msk.f32.gmra.mrb[36].mxu1 %vm702_vm2, %v7380_v56  ;;  %6067 = vmatmul.mubr.msk.f32.gmra.mrb[36].mxu0 %vm702_vm2, %v7422_v62 }
  0x75   : > { %5955 = vmatprep.mubr.msk.f32.mxu1 %vm702_vm2, %v7383_v57  ;;  %6069 = vmatprep.mubr.msk.f32.mxu0 %vm702_vm2, %v7425_v63  ;;  %v7800_v63 = vld [vmem:[%s8421_s2 + $0x38] sm:$0xff] }
  0x78   : > { %5956 = vmatmul.mubr.msk.f32.gmra.mrb[38].mxu1 %vm702_vm2, %v7394_v58  ;;  %6070 = vmatmul.mubr.msk.f32.gmra.mrb[38].mxu0 %vm702_vm2, %v7436_v0 }
  0x79   : > { %5960 = vmatprep.mubr.msk.f32.mxu1 %vm702_vm2, %v7279_v41  ;;  %6074 = vmatprep.mubr.msk.f32.mxu0 %vm448_vm1, %v7079_v12 }
  0x7c   : > { %5961 = vmatmul.mubr.msk.f32.vlgmr.msra.gmra.mrb[0].mxu1 %vm702_vm2, %v7289_v43  ;;  %6075 = vmatmul.mubr.msk.f32.vlgmr.msra.gmra.mrb[0].mxu0 %vm448_vm1, %v7086_v13 }
  0x7d   : > { %6111 = vmatpush3.msk.msra.mxu1 %vm521_vm0, %v7268_v39  ;;  %6339 = vmatpush3.msk.msra.mxu0 %vm521_vm0, %v7273_v40  ;;  %v5174_v39 = vld [vmem:[%s8421_s2 + $0x20] sm:$0xff]  ;;  %v5327_v40 = vld [vmem:[%s8421_s2 + $0x28] sm:$0xff] }
  0x7e   : > { %5963 = vmatprep.mubr.msk.f32.mxu1 %vm702_vm2, %v7307_v45  ;;  %6077 = vmatprep.mubr.msk.f32.mxu0 %vm448_vm1, %v7100_v14 }
  0x7f   : > { %6148 = vmatprep.subr.mxu1 %v5123_v1  ;;  %6376 = vmatprep.subr.mxu0 %v5276_v2 }
  0x80   : > { %5964 = vmatmul.mubr.msk.f32.gmra.mrb[40].mxu1 %vm702_vm2, %v7239_v34  ;;  %6078 = vmatmul.mubr.msk.f32.gmra.mrb[40].mxu0 %vm448_vm1, %v7103_v15 }
  0x81   : > { %5966 = vmatprep.mubr.msk.f32.mxu1 %vm702_vm2, %v7253_v36  ;;  %6080 = vmatprep.mubr.msk.f32.mxu0 %vm448_vm1, %v7114_v16 }
  0x84   : > { %5967 = vmatmul.mubr.msk.f32.gmra.mrb[42].mxu1 %vm702_vm2, %v7259_v38  ;;  %6081 = vmatmul.mubr.msk.f32.gmra.mrb[42].mxu0 %vm448_vm1, %v7117_v17 }
  0x85   : > { %5969 = vmatprep.mubr.msk.f32.mxu1 %vm702_vm2, %v7282_v42  ;;  %6083 = vmatprep.mubr.msk.f32.mxu0 %vm448_vm1, %v7128_v18 }
  0x88   : > { %5970 = vmatmul.mubr.msk.f32.gmra.mrb[6].mxu1 %vm702_vm2, %v7292_v44  ;;  %6084 = vmatmul.mubr.msk.f32.gmra.mrb[6].mxu0 %vm448_vm1, %v7131_v19 }
  0x89   : > { %5972 = vmatprep.mubr.msk.f32.mxu1 %vm702_vm2, %v7310_v46  ;;  %6086 = vmatprep.mubr.msk.f32.mxu0 %vm448_vm1, %v7142_v20 }
  0x8c   : > { %5973 = vmatmul.mubr.msk.f32.gmra.mrb[44].mxu1 %vm702_vm2, %v7313_v47  ;;  %6087 = vmatmul.mubr.msk.f32.gmra.mrb[44].mxu0 %vm448_vm1, %v7145_v21 }
  0x8d   : > { %5975 = vmatprep.mubr.msk.f32.mxu1 %vm702_vm2, %v7324_v48  ;;  %6089 = vmatprep.mubr.msk.f32.mxu0 %vm448_vm1, %v7156_v22 }
  0x90   : > { %5976 = vmatmul.mubr.msk.f32.gmra.mrb[46].mxu1 %vm702_vm2, %v7327_v49  ;;  %6090 = vmatmul.mubr.msk.f32.gmra.mrb[46].mxu0 %vm448_vm1, %v7159_v23 }
  0x91   : > { %5978 = vmatprep.mubr.msk.f32.mxu1 %vm702_vm2, %v7338_v50  ;;  %6092 = vmatprep.mubr.msk.f32.mxu0 %vm448_vm1, %v7170_v24 }
  0x94   : > { %5979 = vmatmul.mubr.msk.f32.gmra.mrb[12].mxu1 %vm702_vm2, %v7341_v51  ;;  %6093 = vmatmul.mubr.msk.f32.gmra.mrb[12].mxu0 %vm448_vm1, %v7173_v25 }
  0x95   : > { %5981 = vmatprep.mubr.msk.f32.mxu1 %vm702_vm2, %v7352_v52  ;;  %6095 = vmatprep.mubr.msk.f32.mxu0 %vm448_vm1, %v7184_v26 }
  0x98   : > { %5982 = vmatmul.mubr.msk.f32.gmra.mrb[48].mxu1 %vm702_vm2, %v7355_v53  ;;  %6096 = vmatmul.mubr.msk.f32.gmra.mrb[48].mxu0 %vm448_vm1, %v7187_v27 }
  0x99   : > { %5984 = vmatprep.mubr.msk.f32.mxu1 %vm702_vm2, %v7366_v54  ;;  %6098 = vmatprep.mubr.msk.f32.mxu0 %vm448_vm1, %v7198_v28 }
  0x9c   : > { %5985 = vmatmul.mubr.msk.f32.gmra.mrb[50].mxu1 %vm702_vm2, %v7369_v55  ;;  %6099 = vmatmul.mubr.msk.f32.gmra.mrb[50].mxu0 %vm448_vm1, %v7201_v29 }
  0x9d   : > { %5987 = vmatprep.mubr.msk.f32.mxu1 %vm702_vm2, %v7380_v56  ;;  %6101 = vmatprep.mubr.msk.f32.mxu0 %vm448_vm1, %v7212_v30 }
  0xa0   : > { %5988 = vmatmul.mubr.msk.f32.gmra.mrb[18].mxu1 %vm702_vm2, %v7383_v57  ;;  %6102 = vmatmul.mubr.msk.f32.gmra.mrb[18].mxu0 %vm448_vm1, %v7215_v31 }
  0xa1   : > { %5990 = vmatprep.mubr.msk.f32.mxu1 %vm702_vm2, %v7394_v58  ;;  %6104 = vmatprep.mubr.msk.f32.mxu0 %vm448_vm1, %v7233_v32 }
  0xa4   : > { %5991 = vmatmul.mubr.msk.f32.gmra.mrb[52].mxu1 %vm702_vm2, %v7397_v59  ;;  %6105 = vmatmul.mubr.msk.f32.gmra.mrb[52].mxu0 %vm448_vm1, %v7537_v3 }
  0xa5   : > { %5993 = vmatprep.mubr.msk.f32.mxu1 %vm702_vm2, %v7408_v60  ;;  %6107 = vmatprep.mubr.msk.f32.mxu0 %vm448_vm1, %v7540_v10 }
  0xa8   : > { %5994 = vmatmul.mubr.msk.f32.gmra.mrb[54].mxu1 %vm702_vm2, %v7411_v61  ;;  %6108 = vmatmul.mubr.msk.f32.gmra.mrb[54].mxu0 %vm448_vm1, %v7551_v11 }
  0xa9   : > { %6112 = vmatprep.mubr.msk.f32.mxu1 %vm448_vm1, %v7043_v4  ;;  %6340 = vmatprep.mubr.msk.f32.mxu0 %vm448_vm1, %v7043_v4  ;;  %v7670_v4 = vld [vmem:[%s8422_s3 + $0x10] sm:$0xf] }
  0xac   : > { %6113 = vmatmul.mubr.msk.f32.vlgmr.msra.gmra.mrb[56].mxu1 %vm448_vm1, %v7049_v6  ;;  %6341 = vmatmul.mubr.msk.f32.vlgmr.msra.gmra.mrb[56].mxu0 %vm448_vm1, %v7049_v6  ;;  %v7675_v6 = vld [vmem:[%s8422_s3 + $0x14] sm:$0xf] }
  0xad   : > { %6149 = vmatpush3.msra.mxu1 %v5123_v1  ;;  %6377 = vmatpush3.msra.mxu0 %v5276_v2 }
  0xae   : > { %6115 = vmatprep.mubr.msk.f32.mxu1 %vm448_vm1, %v7059_v8  ;;  %6343 = vmatprep.mubr.msk.f32.mxu0 %vm448_vm1, %v7059_v8 }
  0xaf   : > { %6186 = vmatprep.subr.mxu1 %v5174_v39  ;;  %6414 = vmatprep.subr.mxu0 %v5327_v40 }
  0xb0   : > { %6116 = vmatmul.mubr.msk.f32.gmra.mrb[58].mxu1 %vm448_vm1, %v7046_v5  ;;  %6344 = vmatmul.mubr.msk.f32.gmra.mrb[58].mxu0 %vm448_vm1, %v7046_v5 }
  0xb1   : > { %6118 = vmatprep.mubr.msk.f32.mxu1 %vm448_vm1, %v7056_v7  ;;  %6346 = vmatprep.mubr.msk.f32.mxu0 %vm448_vm1, %v7056_v7 }
  0xb4   : > { %6119 = vmatmul.mubr.msk.f32.gmra.mrb[60].mxu1 %vm448_vm1, %v7062_v9  ;;  %6347 = vmatmul.mubr.msk.f32.gmra.mrb[60].mxu0 %vm448_vm1, %v7062_v9 }
  0xb5   : > { %6121 = vmatprep.mubr.msk.f32.mxu1 %vm448_vm1, %v7079_v12  ;;  %6349 = vmatprep.mubr.msk.f32.mxu0 %vm448_vm1, %v7079_v12 }
  0xb8   : > { %6122 = vmatmul.mubr.msk.f32.gmra.mrb[62].mxu1 %vm448_vm1, %v7086_v13  ;;  %6350 = vmatmul.mubr.msk.f32.gmra.mrb[62].mxu0 %vm448_vm1, %v7086_v13 }
  0xb9   : > { %6124 = vmatprep.mubr.msk.f32.mxu1 %vm448_vm1, %v7100_v14  ;;  %6352 = vmatprep.mubr.msk.f32.mxu0 %vm448_vm1, %v7100_v14 }
  0xbc   : > { %6125 = vmatmul.mubr.msk.f32.gmra.mrb[64].mxu1 %vm448_vm1, %v7103_v15  ;;  %6353 = vmatmul.mubr.msk.f32.gmra.mrb[64].mxu0 %vm448_vm1, %v7103_v15 }
  0xbd   : > { %6127 = vmatprep.mubr.msk.f32.mxu1 %vm448_vm1, %v7114_v16  ;;  %6355 = vmatprep.mubr.msk.f32.mxu0 %vm448_vm1, %v7114_v16 }
  0xc0   : > { %6128 = vmatmul.mubr.msk.f32.gmra.mrb[66].mxu1 %vm448_vm1, %v7117_v17  ;;  %6356 = vmatmul.mubr.msk.f32.gmra.mrb[66].mxu0 %vm448_vm1, %v7117_v17 }
  0xc1   : > { %6130 = vmatprep.mubr.msk.f32.mxu1 %vm448_vm1, %v7128_v18  ;;  %6358 = vmatprep.mubr.msk.f32.mxu0 %vm448_vm1, %v7128_v18 }
  0xc4   : > { %6131 = vmatmul.mubr.msk.f32.gmra.mrb[68].mxu1 %vm448_vm1, %v7131_v19  ;;  %6359 = vmatmul.mubr.msk.f32.gmra.mrb[68].mxu0 %vm448_vm1, %v7131_v19 }
  0xc5   : > { %6133 = vmatprep.mubr.msk.f32.mxu1 %vm448_vm1, %v7142_v20  ;;  %6361 = vmatprep.mubr.msk.f32.mxu0 %vm448_vm1, %v7142_v20 }
  0xc8   : > { %6134 = vmatmul.mubr.msk.f32.gmra.mrb[70].mxu1 %vm448_vm1, %v7145_v21  ;;  %6362 = vmatmul.mubr.msk.f32.gmra.mrb[70].mxu0 %vm448_vm1, %v7145_v21 }
  0xc9   : > { %6136 = vmatprep.mubr.msk.f32.mxu1 %vm448_vm1, %v7156_v22  ;;  %6364 = vmatprep.mubr.msk.f32.mxu0 %vm448_vm1, %v7156_v22 }
  0xcc   : > { %6137 = vmatmul.mubr.msk.f32.gmra.mrb[72].mxu1 %vm448_vm1, %v7159_v23  ;;  %6365 = vmatmul.mubr.msk.f32.gmra.mrb[72].mxu0 %vm448_vm1, %v7159_v23 }
  0xcd   : > { %6139 = vmatprep.mubr.msk.f32.mxu1 %vm448_vm1, %v7170_v24  ;;  %6367 = vmatprep.mubr.msk.f32.mxu0 %vm448_vm1, %v7170_v24 }
  0xd0   : > { %6140 = vmatmul.mubr.msk.f32.gmra.mrb[74].mxu1 %vm448_vm1, %v7173_v25  ;;  %6368 = vmatmul.mubr.msk.f32.gmra.mrb[74].mxu0 %vm448_vm1, %v7173_v25 }
  0xd1   : > { %6142 = vmatprep.mubr.msk.f32.mxu1 %vm448_vm1, %v7184_v26  ;;  %6370 = vmatprep.mubr.msk.f32.mxu0 %vm448_vm1, %v7184_v26 }
  0xd4   : > { %6143 = vmatmul.mubr.msk.f32.gmra.mrb[76].mxu1 %vm448_vm1, %v7187_v27  ;;  %6371 = vmatmul.mubr.msk.f32.gmra.mrb[76].mxu0 %vm448_vm1, %v7187_v27 }
  0xd5   : > { %6145 = vmatprep.mubr.msk.f32.mxu1 %vm448_vm1, %v7198_v28  ;;  %6373 = vmatprep.mubr.msk.f32.mxu0 %vm448_vm1, %v7198_v28 }
  0xd8   : > { %6146 = vmatmul.mubr.msk.f32.gmra.mrb[78].mxu1 %vm448_vm1, %v7201_v29  ;;  %6374 = vmatmul.mubr.msk.f32.gmra.mrb[78].mxu0 %vm448_vm1, %v7201_v29 }
  0xd9   : > { %6150 = vmatprep.mubr.msk.f32.mxu1 %vm702_vm2, %v7236_v33  ;;  %6378 = vmatprep.mubr.msk.f32.mxu0 %vm702_vm2, %v7236_v33 }
  0xdc   : > { %6151 = vmatmul.mubr.msk.f32.vlgmr.msra.gmra.mrb[56].mxu1 %vm702_vm2, %v7250_v35  ;;  %6379 = vmatmul.mubr.msk.f32.vlgmr.msra.gmra.mrb[56].mxu0 %vm702_vm2, %v7250_v35 }
  0xdd   : > { %6187 = vmatpush3.msra.mxu1 %v5174_v39  ;;  %6415 = vmatpush3.msra.mxu0 %v5327_v40 }
  0xde   : > { %6153 = vmatprep.mubr.msk.f32.mxu1 %vm702_vm2, %v7256_v37  ;;  %6381 = vmatprep.mubr.msk.f32.mxu0 %vm702_vm2, %v7256_v37 }
  0xdf   : > { %6224 = vmatprep.subr.msk.mxu1 %vm521_vm0, %v7670_v4  ;;  %6452 = vmatprep.subr.msk.mxu0 %vm521_vm0, %v7675_v6 }
  0xe0   : > { %6154 = vmatmul.mubr.msk.f32.gmra.mrb[58].mxu1 %vm702_vm2, %v7279_v41  ;;  %6382 = vmatmul.mubr.msk.f32.gmra.mrb[58].mxu0 %vm702_vm2, %v7279_v41 }
  0xe1   : > { %6156 = vmatprep.mubr.msk.f32.mxu1 %vm702_vm2, %v7289_v43  ;;  %6384 = vmatprep.mubr.msk.f32.mxu0 %vm702_vm2, %v7289_v43 }
  0xe4   : > { %6157 = vmatmul.mubr.msk.f32.gmra.mrb[60].mxu1 %vm702_vm2, %v7307_v45  ;;  %6385 = vmatmul.mubr.msk.f32.gmra.mrb[60].mxu0 %vm702_vm2, %v7307_v45 }
  0xe5   : > { %6159 = vmatprep.mubr.msk.f32.mxu1 %vm702_vm2, %v7239_v34  ;;  %6387 = vmatprep.mubr.msk.f32.mxu0 %vm702_vm2, %v7239_v34 }
  0xe8   : > { %6160 = vmatmul.mubr.msk.f32.gmra.mrb[62].mxu1 %vm702_vm2, %v7253_v36  ;;  %6388 = vmatmul.mubr.msk.f32.gmra.mrb[62].mxu0 %vm702_vm2, %v7253_v36 }
  0xe9   : > { %6162 = vmatprep.mubr.msk.f32.mxu1 %vm702_vm2, %v7259_v38  ;;  %6390 = vmatprep.mubr.msk.f32.mxu0 %vm702_vm2, %v7259_v38 }
  0xec   : > { %6163 = vmatmul.mubr.msk.f32.gmra.mrb[64].mxu1 %vm702_vm2, %v7282_v42  ;;  %6391 = vmatmul.mubr.msk.f32.gmra.mrb[64].mxu0 %vm702_vm2, %v7282_v42 }
  0xed   : > { %6165 = vmatprep.mubr.msk.f32.mxu1 %vm702_vm2, %v7292_v44  ;;  %6393 = vmatprep.mubr.msk.f32.mxu0 %vm702_vm2, %v7292_v44 }
  0xf0   : > { %6166 = vmatmul.mubr.msk.f32.gmra.mrb[66].mxu1 %vm702_vm2, %v7310_v46  ;;  %6394 = vmatmul.mubr.msk.f32.gmra.mrb[66].mxu0 %vm702_vm2, %v7310_v46 }
  0xf1   : > { %6168 = vmatprep.mubr.msk.f32.mxu1 %vm702_vm2, %v7313_v47  ;;  %6396 = vmatprep.mubr.msk.f32.mxu0 %vm702_vm2, %v7313_v47 }
  0xf3   : > { %v7725_v8 = vpop.f32.mrb[2].mxu1  ;;  %v7727_v33 = vpop.f32.mrb[2].mxu0 }
  0xf4   : > { %v601_v35 = vpop.f32.mrb[3].mxu1  ;;  %6169 = vmatmul.mubr.msk.f32.gmra.mrb[68].mxu1 %vm702_vm2, %v7324_v48  ;;  %6397 = vmatmul.mubr.msk.f32.gmra.mrb[68].mxu0 %vm702_vm2, %v7324_v48  ;;  %v1372_v37 = vpop.f32.mrb[3].mxu0 }
  0xf5   : > { %6171 = vmatprep.mubr.msk.f32.mxu1 %vm702_vm2, %v7327_v49  ;;  %6399 = vmatprep.mubr.msk.f32.mxu0 %vm702_vm2, %v7327_v49 }
  0xf7   : > { %v5892_v1 = vpop.f32.mrb[4].mxu1  ;;  %v6006_v2 = vpop.f32.mrb[4].mxu0 }
  0xf8   : > { %v7737_v39 = vpop.f32.mrb[5].mxu1  ;;  %6172 = vmatmul.mubr.msk.f32.gmra.mrb[70].mxu1 %vm702_vm2, %v7338_v50  ;;  %6400 = vmatmul.mubr.msk.f32.gmra.mrb[70].mxu0 %vm702_vm2, %v7338_v50  ;;  %v7743_v40 = vpop.f32.mrb[5].mxu0 }
  0xf9   : > { %6174 = vmatprep.mubr.msk.f32.mxu1 %vm702_vm2, %v7341_v51  ;;  %6402 = vmatprep.mubr.msk.f32.mxu0 %vm702_vm2, %v7341_v51 }
  0xfc   : > { %6175 = vmatmul.mubr.msk.f32.gmra.mrb[72].mxu1 %vm702_vm2, %v7352_v52  ;;  %6403 = vmatmul.mubr.msk.f32.gmra.mrb[72].mxu0 %vm702_vm2, %v7352_v52 }
  0xfd   : > { %6177 = vmatprep.mubr.msk.f32.mxu1 %vm702_vm2, %v7355_v53  ;;  %6405 = vmatprep.mubr.msk.f32.mxu0 %vm702_vm2, %v7355_v53 }
  0xff   : > { %v7757_v35 = vpop.f32.mrb[8].mxu1  ;;  %v7759_v37 = vpop.f32.mrb[8].mxu0 }
 0x100   : > { %v629_v1 = vpop.f32.mrb[9].mxu1  ;;  %6178 = vmatmul.mubr.msk.f32.gmra.mrb[74].mxu1 %vm702_vm2, %v7366_v54  ;;  %6406 = vmatmul.mubr.msk.f32.gmra.mrb[74].mxu0 %vm702_vm2, %v7366_v54  ;;  %v1400_v2 = vpop.f32.mrb[9].mxu0 }
 0x101   : > { %6180 = vmatprep.mubr.msk.f32.mxu1 %vm702_vm2, %v7369_v55  ;;  %6408 = vmatprep.mubr.msk.f32.mxu0 %vm702_vm2, %v7369_v55 }
 0x103   : > { %v5901_v11 = vpop.f32.mrb[10].mxu1  ;;  %v6015_v10 = vpop.f32.mrb[10].mxu0 }
 0x104   : > { %v7769_v3 = vpop.f32.mrb[11].mxu1  ;;  %6181 = vmatmul.mubr.msk.f32.gmra.mrb[76].mxu1 %vm702_vm2, %v7380_v56  ;;  %6409 = vmatmul.mubr.msk.f32.gmra.mrb[76].mxu0 %vm702_vm2, %v7380_v56  ;;  %v7775_v1 = vpop.f32.mrb[11].mxu0 }
 0x105   : > { %6183 = vmatprep.mubr.msk.f32.mxu1 %vm702_vm2, %v7383_v57  ;;  %6411 = vmatprep.mubr.msk.f32.mxu0 %vm702_vm2, %v7383_v57 }
 0x108   : > { %6184 = vmatmul.mubr.msk.f32.gmra.mrb[78].mxu1 %vm702_vm2, %v7394_v58  ;;  %6412 = vmatmul.mubr.msk.f32.gmra.mrb[78].mxu0 %vm702_vm2, %v7394_v58 }
 0x109   : > { %6188 = vmatprep.mubr.msk.f32.mxu1 %vm702_vm2, %v7279_v41  ;;  %6416 = vmatprep.mubr.msk.f32.mxu0 %vm702_vm2, %v7279_v41  ;;  %v7805_v41 = vld [vmem:[%s8421_s2 + $0x40] sm:$0xff] }
 0x10b   : > { %v7789_v10 = vpop.f32.mrb[14].mxu1  ;;  %v7791_v11 = vpop.f32.mrb[14].mxu0 }
 0x10c   : > { %v657_v2 = vpop.f32.mrb[15].mxu1  ;;  %6189 = vmatmul.mubr.msk.f32.vlgmr.msra.gmra.mrb[56].mxu1 %vm702_vm2, %v7289_v43  ;;  %6417 = vmatmul.mubr.msk.f32.vlgmr.msra.gmra.mrb[56].mxu0 %vm702_vm2, %v7289_v43  ;;  %v1428_v0 = vpop.f32.mrb[15].mxu0 }
 0x10d   : > { %6225 = vmatpush3.msk.msra.mxu1 %vm521_vm0, %v7670_v4  ;;  %6453 = vmatpush3.msk.msra.mxu0 %vm521_vm0, %v7675_v6 }
 0x10e   : > { %6191 = vmatprep.mubr.msk.f32.mxu1 %vm702_vm2, %v7307_v45  ;;  %6419 = vmatprep.mubr.msk.f32.mxu0 %vm702_vm2, %v7307_v45 }
 0x10f   : > { %v5910_v43 = vpop.f32.mrb[16].mxu1  ;;  %v6024_v0 = vpop.f32.mrb[16].mxu0  ;;  %6262 = vmatprep.subr.mxu1 %v7800_v63  ;;  %6490 = vmatprep.subr.mxu0 %v7805_v41 }
 0x110   : > { %v7817_v2 = vpop.f32.mrb[17].mxu1  ;;  %6192 = vmatmul.mubr.msk.f32.gmra.mrb[58].mxu1 %vm702_vm2, %v7239_v34  ;;  %6420 = vmatmul.mubr.msk.f32.gmra.mrb[58].mxu0 %vm702_vm2, %v7239_v34  ;;  %v7823_v4 = vpop.f32.mrb[17].mxu0 }
 0x111   : > { %8461 = vst [vmem:[#allocation14_spill] sm:$0xff] %v7823_v4  ;;  %6194 = vmatprep.mubr.msk.f32.mxu1 %vm702_vm2, %v7253_v36  ;;  %6422 = vmatprep.mubr.msk.f32.mxu0 %vm702_vm2, %v7253_v36 }
 0x114   : > { %6195 = vmatmul.mubr.msk.f32.gmra.mrb[60].mxu1 %vm702_vm2, %v7259_v38  ;;  %6423 = vmatmul.mubr.msk.f32.gmra.mrb[60].mxu0 %vm702_vm2, %v7259_v38 }
 0x115   : > { %6197 = vmatprep.mubr.msk.f32.mxu1 %vm702_vm2, %v7282_v42  ;;  %6425 = vmatprep.mubr.msk.f32.mxu0 %vm702_vm2, %v7282_v42 }
 0x117   : > { %v7837_v45 = vpop.f32.mrb[20].mxu1  ;;  %v7839_v6 = vpop.f32.mrb[20].mxu0 }
 0x118   : > { %8462 = vst [vmem:[#allocation15_spill] sm:$0xff] %v7839_v6  ;;  %v685_v43 = vpop.f32.mrb[21].mxu1  ;;  %6198 = vmatmul.mubr.msk.f32.gmra.mrb[62].mxu1 %vm702_vm2, %v7292_v44  ;;  %6426 = vmatmul.mubr.msk.f32.gmra.mrb[62].mxu0 %vm702_vm2, %v7292_v44  ;;  %v1456_v0 = vpop.f32.mrb[21].mxu0 }
 0x119   : > { %6200 = vmatprep.mubr.msk.f32.mxu1 %vm702_vm2, %v7310_v46  ;;  %6428 = vmatprep.mubr.msk.f32.mxu0 %vm702_vm2, %v7310_v46 }
 0x11b   : > { %v5919_v62 = vpop.f32.mrb[22].mxu1  ;;  %v6033_v4 = vpop.f32.mrb[22].mxu0 }
 0x11c   : > { %v7849_v42 = vpop.f32.mrb[23].mxu1  ;;  %6201 = vmatmul.mubr.msk.f32.gmra.mrb[64].mxu1 %vm702_vm2, %v7313_v47  ;;  %6429 = vmatmul.mubr.msk.f32.gmra.mrb[64].mxu0 %vm702_vm2, %v7313_v47  ;;  %v7855_v43 = vpop.f32.mrb[23].mxu0 }
 0x11d   : > { %8463 = vst [vmem:[#allocation16_spill] sm:$0xff] %v7855_v43  ;;  %6203 = vmatprep.mubr.msk.f32.mxu1 %vm702_vm2, %v7324_v48  ;;  %6431 = vmatprep.mubr.msk.f32.mxu0 %vm702_vm2, %v7324_v48 }
 0x120   : > { %6204 = vmatmul.mubr.msk.f32.gmra.mrb[66].mxu1 %vm702_vm2, %v7327_v49  ;;  %6432 = vmatmul.mubr.msk.f32.gmra.mrb[66].mxu0 %vm702_vm2, %v7327_v49 }
 0x121   : > { %6206 = vmatprep.mubr.msk.f32.mxu1 %vm702_vm2, %v7338_v50  ;;  %6434 = vmatprep.mubr.msk.f32.mxu0 %vm702_vm2, %v7338_v50 }
 0x123   : > { %v5927_v62 = vpop.f32.mrb[24].mxu1  ;;  %v7869_v4 = vpop.f32.mrb[24].mxu0 }
 0x124   : > { %v7872_v0 = vadd.f32 %v5927_v62, %v7725_v8  ;;  %v851_v43 = vpop.f32.mrb[25].mxu1  ;;  %6207 = vmatmul.mubr.msk.f32.gmra.mrb[68].mxu1 %vm702_vm2, %v7341_v51  ;;  %6435 = vmatmul.mubr.msk.f32.gmra.mrb[68].mxu0 %vm702_vm2, %v7341_v51  ;;  %v1639_v6 = vpop.f32.mrb[25].mxu0 }
 0x125   : > { %6209 = vmatprep.mubr.msk.f32.mxu1 %vm702_vm2, %v7352_v52  ;;  %6437 = vmatprep.mubr.msk.f32.mxu0 %vm702_vm2, %v7352_v52 }
 0x127   : > { %v5930_v50 = vpop.f32.mrb[26].mxu1  ;;  %v6044_v49 = vpop.f32.mrb[26].mxu0 }
 0x128   : > { %v860_v48 = vpop.f32.mrb[27].mxu1  ;;  %6210 = vmatmul.mubr.msk.f32.gmra.mrb[70].mxu1 %vm702_vm2, %v7355_v53  ;;  %6438 = vmatmul.mubr.msk.f32.gmra.mrb[70].mxu0 %vm702_vm2, %v7355_v53  ;;  %v7886_v8 = vpop.f32.mrb[27].mxu0 }
 0x129   : > { %v7889_v43 = vadd.f32 %v860_v48, %v7737_v39  ;;  %6212 = vmatprep.mubr.msk.f32.mxu1 %vm702_vm2, %v7366_v54  ;;  %6440 = vmatprep.mubr.msk.f32.mxu0 %vm702_vm2, %v7366_v54 }
 0x12c   : > { %6213 = vmatmul.mubr.msk.f32.gmra.mrb[72].mxu1 %vm702_vm2, %v7369_v55  ;;  %6441 = vmatmul.mubr.msk.f32.gmra.mrb[72].mxu0 %vm702_vm2, %v7369_v55 }
 0x12d   : > { %6215 = vmatprep.mubr.msk.f32.mxu1 %vm702_vm2, %v7380_v56  ;;  %6443 = vmatprep.mubr.msk.f32.mxu0 %vm702_vm2, %v7380_v56 }
 0x12f   : > { %v5936_v48 = vpop.f32.mrb[28].mxu1  ;;  %v7903_v49 = vpop.f32.mrb[28].mxu0 }
 0x130   : > { %v7906_v50 = vadd.f32 %v5936_v48, %v7757_v35  ;;  %v879_v39 = vpop.f32.mrb[29].mxu1  ;;  %6216 = vmatmul.mubr.msk.f32.gmra.mrb[74].mxu1 %vm702_vm2, %v7383_v57  ;;  %6444 = vmatmul.mubr.msk.f32.gmra.mrb[74].mxu0 %vm702_vm2, %v7383_v57  ;;  %v1667_v6 = vpop.f32.mrb[29].mxu0 }
 0x131   : > { %6218 = vmatprep.mubr.msk.f32.mxu1 %vm702_vm2, %v7394_v58  ;;  %6446 = vmatprep.mubr.msk.f32.mxu0 %vm702_vm2, %v7394_v58 }
 0x133   : > { %v5939_v62 = vpop.f32.mrb[30].mxu1  ;;  %v6053_v56 = vpop.f32.mrb[30].mxu0 }
 0x134   : > { %v888_v55 = vpop.f32.mrb[31].mxu1  ;;  %6219 = vmatmul.mubr.msk.f32.gmra.mrb[76].mxu1 %vm702_vm2, %v7397_v59  ;;  %6447 = vmatmul.mubr.msk.f32.gmra.mrb[76].mxu0 %vm702_vm2, %v7397_v59  ;;  %v7920_v35 = vpop.f32.mrb[31].mxu0  ;;  %v7949_v62 = vld [vmem:[%s8422_s3 + $0x1c] sm:$0xf] }
 0x135   : > { %v7923_v48 = vadd.f32 %v888_v55, %v7769_v3  ;;  %6221 = vmatprep.mubr.msk.f32.mxu1 %vm702_vm2, %v7408_v60  ;;  %6449 = vmatprep.mubr.msk.f32.mxu0 %vm702_vm2, %v7408_v60 }
 0x138   : > { %6222 = vmatmul.mubr.msk.f32.gmra.mrb[78].mxu1 %vm702_vm2, %v7411_v61  ;;  %6450 = vmatmul.mubr.msk.f32.gmra.mrb[78].mxu0 %vm702_vm2, %v7411_v61 }
 0x139   : > { %6226 = vmatprep.mubr.msk.f32.mxu1 %vm448_vm1, %v7046_v5  ;;  %6454 = vmatprep.mubr.msk.f32.mxu0 %vm448_vm1, %v7046_v5  ;;  %v7954_v5 = vld [vmem:[%s8422_s3 + $0x20] sm:$0xf] }
 0x13b   : > { %v5945_v55 = vpop.f32.mrb[32].mxu1  ;;  %v7937_v56 = vpop.f32.mrb[32].mxu0 }
 0x13c   : > { %v7940_v3 = vadd.f32 %v5945_v55, %v7789_v10  ;;  %v907_v39 = vpop.f32.mrb[33].mxu1  ;;  %6227 = vmatmul.mubr.msk.f32.vlgmr.msra.gmra.mrb[56].mxu1 %vm448_vm1, %v7056_v7  ;;  %6455 = vmatmul.mubr.msk.f32.vlgmr.msra.gmra.mrb[56].mxu0 %vm448_vm1, %v7056_v7  ;;  %v1695_v6 = vpop.f32.mrb[33].mxu0 }
 0x13d   : > { %6263 = vmatpush3.msra.mxu1 %v7800_v63  ;;  %6491 = vmatpush3.msra.mxu0 %v7805_v41 }
 0x13e   : > { %6229 = vmatprep.mubr.msk.f32.mxu1 %vm448_vm1, %v7062_v9  ;;  %6457 = vmatprep.mubr.msk.f32.mxu0 %vm448_vm1, %v7062_v9 }
 0x13f   : > { %v5948_v7 = vpop.f32.mrb[34].mxu1  ;;  %v6062_v10 = vpop.f32.mrb[34].mxu0  ;;  %6300 = vmatprep.subr.msk.mxu1 %vm521_vm0, %v7949_v62  ;;  %6528 = vmatprep.subr.msk.mxu0 %vm521_vm0, %v7954_v5 }
 0x140   : > { %v916_v55 = vpop.f32.mrb[35].mxu1  ;;  %6230 = vmatmul.mubr.msk.f32.gmra.mrb[58].mxu1 %vm448_vm1, %v7079_v12  ;;  %6458 = vmatmul.mubr.msk.f32.gmra.mrb[58].mxu0 %vm448_vm1, %v7079_v12  ;;  %v7970_v63 = vpop.f32.mrb[35].mxu0 }
 0x141   : > { %v7973_v41 = vadd.f32 %v916_v55, %v7817_v2  ;;  %6232 = vmatprep.mubr.msk.f32.mxu1 %vm448_vm1, %v7086_v13  ;;  %6460 = vmatprep.mubr.msk.f32.mxu0 %vm448_vm1, %v7086_v13 }
 0x144   : > { %6233 = vmatmul.mubr.msk.f32.gmra.mrb[60].mxu1 %vm448_vm1, %v7100_v14  ;;  %6461 = vmatmul.mubr.msk.f32.gmra.mrb[60].mxu0 %vm448_vm1, %v7100_v14 }
 0x145   : > { %6235 = vmatprep.mubr.msk.f32.mxu1 %vm448_vm1, %v7103_v15  ;;  %6463 = vmatprep.mubr.msk.f32.mxu0 %vm448_vm1, %v7103_v15 }
 0x147   : > { %v5954_v9 = vpop.f32.mrb[36].mxu1  ;;  %v7987_v12 = vpop.f32.mrb[36].mxu0 }
 0x148   : > { %v7990_v2 = vadd.f32 %v5954_v9, %v7837_v45  ;;  %v935_v39 = vpop.f32.mrb[37].mxu1  ;;  %6236 = vmatmul.mubr.msk.f32.gmra.mrb[62].mxu1 %vm448_vm1, %v7114_v16  ;;  %6464 = vmatmul.mubr.msk.f32.gmra.mrb[62].mxu0 %vm448_vm1, %v7114_v16  ;;  %v1723_v13 = vpop.f32.mrb[37].mxu0 }
 0x149   : > { %6238 = vmatprep.mubr.msk.f32.mxu1 %vm448_vm1, %v7117_v17  ;;  %6466 = vmatprep.mubr.msk.f32.mxu0 %vm448_vm1, %v7117_v17 }
 0x14b   : > { %v5957_v14 = vpop.f32.mrb[38].mxu1  ;;  %v6071_v15 = vpop.f32.mrb[38].mxu0 }
 0x14c   : > { %v944_v6 = vpop.f32.mrb[39].mxu1  ;;  %6239 = vmatmul.mubr.msk.f32.gmra.mrb[64].mxu1 %vm448_vm1, %v7128_v18  ;;  %6467 = vmatmul.mubr.msk.f32.gmra.mrb[64].mxu0 %vm448_vm1, %v7128_v18  ;;  %v8004_v45 = vpop.f32.mrb[39].mxu0 }
 0x14d   : > { %v8007_v16 = vadd.f32 %v944_v6, %v7849_v42  ;;  %6241 = vmatprep.mubr.msk.f32.mxu1 %vm448_vm1, %v7131_v19  ;;  %6469 = vmatprep.mubr.msk.f32.mxu0 %vm448_vm1, %v7131_v19 }
 0x14f   : > { %v5962_v17 = vpop.f32.mrb[0].mxu1  ;;  %v6076_v7 = vpop.f32.mrb[0].mxu0 }
 0x150   : > { %v8013_v10 = vadd.f32 %v6076_v7, %v5962_v17  ;;  %v1092_v55 = vpop.f32.mrb[1].mxu1  ;;  %v1899_v9 = vpop.f32.mrb[1].mxu0  ;;  %6242 = vmatmul.mubr.msk.f32.gmra.mrb[66].mxu1 %vm448_vm1, %v7142_v20  ;;  %6470 = vmatmul.mubr.msk.f32.gmra.mrb[66].mxu0 %vm448_vm1, %v7142_v20 }
 0x151   : > { %v8019_v18 = vadd.f32 %v1899_v9, %v1092_v55  ;;  %6244 = vmatprep.mubr.msk.f32.mxu1 %vm448_vm1, %v7145_v21  ;;  %6472 = vmatprep.mubr.msk.f32.mxu0 %vm448_vm1, %v7145_v21 }
 0x153   : > { %v5965_v19 = vpop.f32.mrb[40].mxu1  ;;  %v6079_v42 = vpop.f32.mrb[40].mxu0 }
 0x154   : > { %v1205_v39 = vadd.f32 %v5965_v19, %v7872_v0  ;;  %v1102_v13 = vpop.f32.mrb[41].mxu1  ;;  %6245 = vmatmul.mubr.msk.f32.gmra.mrb[68].mxu1 %vm448_vm1, %v7156_v22  ;;  %6473 = vmatmul.mubr.msk.f32.gmra.mrb[68].mxu0 %vm448_vm1, %v7156_v22  ;;  %v1909_v20 = vpop.f32.mrb[41].mxu0 }
 0x155   : > { %6247 = vmatprep.mubr.msk.f32.mxu1 %vm448_vm1, %v7159_v23  ;;  %6475 = vmatprep.mubr.msk.f32.mxu0 %vm448_vm1, %v7159_v23 }
 0x156   : > { %v1475_v21 = vadd.f32 %v7727_v33, %v1205_v39 }
 0x157   : > { %v5968_v14 = vpop.f32.mrb[42].mxu1  ;;  %v6082_v15 = vpop.f32.mrb[42].mxu0 }
 0x158   : > { %v1742_v0 = vadd.f32 %v7869_v4, %v1475_v21  ;;  %v1111_v6 = vpop.f32.mrb[43].mxu1  ;;  %6248 = vmatmul.mubr.msk.f32.gmra.mrb[70].mxu1 %vm448_vm1, %v7170_v24  ;;  %6476 = vmatmul.mubr.msk.f32.gmra.mrb[70].mxu0 %vm448_vm1, %v7170_v24  ;;  %v1918_v22 = vpop.f32.mrb[43].mxu0 }
 0x159   : > { %v1206_v17 = vadd.f32 %v1111_v6, %v7889_v43  ;;  %6250 = vmatprep.mubr.msk.f32.mxu1 %vm448_vm1, %v7173_v25  ;;  %6478 = vmatprep.mubr.msk.f32.mxu0 %vm448_vm1, %v7173_v25 }
 0x15a   : > { %v8045_v23 = vadd.f32 %v6079_v42, %v1742_v0 }
 0x15b   : > { %v1476_v33 = vadd.f32 %v7743_v40, %v1206_v17  ;;  %v5971_v4 = vpop.f32.mrb[6].mxu1  ;;  %v6085_v7 = vpop.f32.mrb[6].mxu0 }
 0x15c   : > { %v8048_v55 = vadd.f32 %v6085_v7, %v5971_v4  ;;  %v1120_v9 = vpop.f32.mrb[7].mxu1  ;;  %v1927_v19 = vpop.f32.mrb[7].mxu0  ;;  %6251 = vmatmul.mubr.msk.f32.gmra.mrb[72].mxu1 %vm448_vm1, %v7184_v26  ;;  %6479 = vmatmul.mubr.msk.f32.gmra.mrb[72].mxu0 %vm448_vm1, %v7184_v26 }
 0x15d   : > { %v1743_v24 = vadd.f32 %v7886_v8, %v1476_v33  ;;  %v8055_v43 = vadd.f32 %v1927_v19, %v1120_v9  ;;  %6253 = vmatprep.mubr.msk.f32.mxu1 %vm448_vm1, %v7187_v27  ;;  %6481 = vmatprep.mubr.msk.f32.mxu0 %vm448_vm1, %v7187_v27  ;;  %v8464_v9 = vld [vmem:[#allocation2_spill] sm:$0xff] }
 0x15f   : > { %v8061_v25 = vadd.f32 %v1918_v22, %v1743_v24  ;;  %v5974_v40 = vpop.f32.mrb[44].mxu1  ;;  %v6088_v42 = vpop.f32.mrb[44].mxu0 }
 0x160   : > { %v1209_v39 = vadd.f32 %v5974_v40, %v7906_v50  ;;  %v1130_v13 = vpop.f32.mrb[45].mxu1  ;;  %6254 = vmatmul.mubr.msk.f32.gmra.mrb[74].mxu1 %vm448_vm1, %v7198_v28  ;;  %6482 = vmatmul.mubr.msk.f32.gmra.mrb[74].mxu0 %vm448_vm1, %v7198_v28  ;;  %v1937_v26 = vpop.f32.mrb[45].mxu0 }
 0x161   : > { %6256 = vmatprep.mubr.msk.f32.mxu1 %vm448_vm1, %v7201_v29  ;;  %6484 = vmatprep.mubr.msk.f32.mxu0 %vm448_vm1, %v7201_v29 }
 0x162   : > { %v1479_v27 = vadd.f32 %v7759_v37, %v1209_v39 }
 0x163   : > { %v5977_v8 = vpop.f32.mrb[46].mxu1  ;;  %v6091_v20 = vpop.f32.mrb[46].mxu0 }
 0x164   : > { %v1746_v50 = vadd.f32 %v7903_v49, %v1479_v27  ;;  %v1139_v21 = vpop.f32.mrb[47].mxu1  ;;  %6257 = vmatmul.mubr.msk.f32.gmra.mrb[76].mxu1 %vm448_vm1, %v7212_v30  ;;  %6485 = vmatmul.mubr.msk.f32.gmra.mrb[76].mxu0 %vm448_vm1, %v7212_v30  ;;  %v1946_v28 = vpop.f32.mrb[47].mxu0 }
 0x165   : > { %v1210_v14 = vadd.f32 %v1139_v21, %v7923_v48  ;;  %6259 = vmatprep.mubr.msk.f32.mxu1 %vm448_vm1, %v7215_v31  ;;  %6487 = vmatprep.mubr.msk.f32.mxu0 %vm448_vm1, %v7215_v31 }
 0x166   : > { %v8083_v29 = vadd.f32 %v6088_v42, %v1746_v50  ;;  %v8466_v50 = vld [vmem:[#allocation3_spill] sm:$0xff] }
 0x167   : > { %v1480_v37 = vadd.f32 %v7775_v1, %v1210_v14  ;;  %v5980_v49 = vpop.f32.mrb[12].mxu1  ;;  %v6094_v15 = vpop.f32.mrb[12].mxu0 }
 0x168   : > { %v8086_v0 = vadd.f32 %v6094_v15, %v5980_v49  ;;  %v1148_v6 = vpop.f32.mrb[13].mxu1  ;;  %v1955_v22 = vpop.f32.mrb[13].mxu0  ;;  %6260 = vmatmul.mubr.msk.f32.gmra.mrb[78].mxu1 %vm448_vm1, %v7233_v32  ;;  %6488 = vmatmul.mubr.msk.f32.gmra.mrb[78].mxu0 %vm448_vm1, %v7233_v32  ;;  %v8469_v49 = vld [vmem:[#allocation5_spill] sm:$0xff] }
 0x169   : > { %v1747_v30 = vadd.f32 %v7920_v35, %v1480_v37  ;;  %v8093_v48 = vadd.f32 %v1955_v22, %v1148_v6  ;;  %6264 = vmatprep.mubr.msk.f32.mxu1 %vm702_vm2, %v7239_v34  ;;  %6492 = vmatprep.mubr.msk.f32.mxu0 %vm702_vm2, %v7239_v34 }
 0x16b   : > { %v8099_v31 = vadd.f32 %v1946_v28, %v1747_v30  ;;  %v5983_v1 = vpop.f32.mrb[48].mxu1  ;;  %v6097_v17 = vpop.f32.mrb[48].mxu0  ;;  %v8470_v30 = vld [vmem:[#allocation16_spill] sm:$0xff] }
 0x16c   : > { %v1213_v33 = vadd.f32 %v5983_v1, %v7940_v3  ;;  %v1158_v4 = vpop.f32.mrb[49].mxu1  ;;  %6265 = vmatmul.mubr.msk.f32.vlgmr.msra.gmra.mrb[56].mxu1 %vm702_vm2, %v7253_v36  ;;  %6493 = vmatmul.mubr.msk.f32.vlgmr.msra.gmra.mrb[56].mxu0 %vm702_vm2, %v7253_v36  ;;  %v1965_v32 = vpop.f32.mrb[49].mxu0 }
 0x16d   : > { %6301 = vmatpush3.msk.msra.mxu1 %vm521_vm0, %v7949_v62  ;;  %6529 = vmatpush3.msk.msra.mxu0 %vm521_vm0, %v7954_v5  ;;  %v8465_v5 = vld [vmem:[#allocation14_spill] sm:$0xff]  ;;  %v6895_v4 = vld [vmem:[%s7040_s15 + $0x68] sm:$0xff]  ;;  %v6896_v32 = vld [vmem:[%s7040_s15 + $0x70] sm:$0xff] }
 0x16e   : > { %v1483_v34 = vadd.f32 %v7791_v11, %v1213_v33  ;;  %6267 = vmatprep.mubr.msk.f32.mxu1 %vm702_vm2, %v7259_v38  ;;  %6495 = vmatprep.mubr.msk.f32.mxu0 %vm702_vm2, %v7259_v38  ;;  %v6894_v33 = vld [vmem:[%s7040_s15 + $0x60] sm:$0xff] }
 0x16f   : > { %v5986_v35 = vpop.f32.mrb[50].mxu1  ;;  %v6100_v3 = vpop.f32.mrb[50].mxu0 }
 0x170   : > { %v1750_v7 = vadd.f32 %v7937_v56, %v1483_v34  ;;  %v1167_v36 = vpop.f32.mrb[51].mxu1  ;;  %6268 = vmatmul.mubr.msk.f32.gmra.mrb[58].mxu1 %vm702_vm2, %v8464_v9  ;;  %6496 = vmatmul.mubr.msk.f32.gmra.mrb[58].mxu0 %vm702_vm2, %v8464_v9  ;;  %v1974_v62 = vpop.f32.mrb[51].mxu0  ;;  %v6897_v34 = vld [vmem:[%s7040_s15 + $0x78] sm:$0xff]  ;;  %v6898_v35 = vld [vmem:[%s7040_s15 + $0x80] sm:$0xff]  ;;  %v6899_v3 = vld [vmem:[%s7040_s15 + $0x88] sm:$0xff] }
 0x171   : > { %v1214_v11 = vadd.f32 %v1167_v36, %v7973_v41  ;;  %6270 = vmatprep.mubr.msk.f32.mxu1 %vm702_vm2, %v7292_v44  ;;  %6498 = vmatprep.mubr.msk.f32.mxu0 %vm702_vm2, %v7292_v44  ;;  %v6901_v36 = vld [vmem:[%s7040_s15 + $0x98] sm:$0xff]  ;;  %v6902_v9 = vld [vmem:[%s7040_s15 + $0xa0] sm:$0xff] }
 0x172   : > { %v8125_v38 = vadd.f32 %v6097_v17, %v1750_v7  ;;  %v6893_v17 = vld [vmem:[%s7040_s15 + $0x58] sm:$0xff]  ;;  %v6900_v7 = vld [vmem:[%s7040_s15 + $0x90] sm:$0xff] }
 0x173   : > { %v1484_v56 = vadd.f32 %v8465_v5, %v1214_v11  ;;  %v5989_v19 = vpop.f32.mrb[18].mxu1  ;;  %v6103_v24 = vpop.f32.mrb[18].mxu0  ;;  %v6904_v11 = vld [vmem:[%s7040_s15 + $0xb0] sm:$0xff]  ;;  %v6905_v5 = vld [vmem:[%s7040_s15 + $0xb8] sm:$0xff] }
 0x174   : > { %v8128_v40 = vadd.f32 %v6103_v24, %v5989_v19  ;;  %v1176_v42 = vpop.f32.mrb[19].mxu1  ;;  %v1983_v39 = vpop.f32.mrb[19].mxu0  ;;  %6271 = vmatmul.mubr.msk.f32.gmra.mrb[60].mxu1 %vm702_vm2, %v7310_v46  ;;  %6499 = vmatmul.mubr.msk.f32.gmra.mrb[60].mxu0 %vm702_vm2, %v7310_v46  ;;  %v6907_v19 = vld [vmem:[%s7040_s15 + $0xc8] sm:$0xff]  ;;  %v6908_v24 = vld [vmem:[%s7040_s15 + $0xd0] sm:$0xff] }
 0x175   : > { %v1751_v41 = vadd.f32 %v7970_v63, %v1484_v56  ;;  %v8135_v13 = vadd.f32 %v1983_v39, %v1176_v42  ;;  %6273 = vmatprep.mubr.msk.f32.mxu1 %vm702_vm2, %v7313_v47  ;;  %6501 = vmatprep.mubr.msk.f32.mxu0 %vm702_vm2, %v7313_v47  ;;  %v8467_v63 = vld [vmem:[#allocation4_spill] sm:$0xff]  ;;  %v8468_v47 = vld [vmem:[#allocation15_spill] sm:$0xff]  ;;  %v6906_v56 = vld [vmem:[%s7040_s15 + $0xc0] sm:$0xff] }
 0x176   : > { %v8476_v42 = vld [vmem:[#allocation11_spill] sm:$0xff]  ;;  %v8477_v39 = vld [vmem:[#allocation12_spill] sm:$0xff] }
 0x177   : > { %v8141_v44 = vadd.f32 %v1974_v62, %v1751_v41  ;;  %v5992_v26 = vpop.f32.mrb[52].mxu1  ;;  %v6106_v27 = vpop.f32.mrb[52].mxu0  ;;  %v6903_v62 = vld [vmem:[%s7040_s15 + $0xa8] sm:$0xff]  ;;  %v8478_v41 = vld [vmem:[#allocation13_spill] sm:$0xff] }
 0x178   : > { %v1217_v8 = vadd.f32 %v5992_v26, %v7990_v2  ;;  %v1186_v20 = vpop.f32.mrb[53].mxu1  ;;  %6274 = vmatmul.mubr.msk.f32.gmra.mrb[62].mxu1 %vm702_vm2, %v8466_v50  ;;  %6502 = vmatmul.mubr.msk.f32.gmra.mrb[62].mxu0 %vm702_vm2, %v8466_v50  ;;  %v1993_v46 = vpop.f32.mrb[53].mxu0 }
 0x179   : > { %6276 = vmatprep.mubr.msk.f32.mxu1 %vm702_vm2, %v8467_v63  ;;  %6504 = vmatprep.mubr.msk.f32.mxu0 %vm702_vm2, %v8467_v63 }
 0x17a   : > { %v1487_v21 = vadd.f32 %v8468_v47, %v1217_v8 }
 0x17b   : > { %v5995_v28 = vpop.f32.mrb[54].mxu1  ;;  %v6109_v14 = vpop.f32.mrb[54].mxu0 }
 0x17c   : > { %v1754_v2 = vadd.f32 %v7987_v12, %v1487_v21  ;;  %v1195_v37 = vpop.f32.mrb[55].mxu1  ;;  %6277 = vmatmul.mubr.msk.f32.gmra.mrb[64].mxu1 %vm702_vm2, %v8469_v49  ;;  %6505 = vmatmul.mubr.msk.f32.gmra.mrb[64].mxu0 %vm702_vm2, %v8469_v49  ;;  %v2002_v15 = vpop.f32.mrb[55].mxu0 }
 0x17d   : > { %v1218_v6 = vadd.f32 %v1195_v37, %v8007_v16  ;;  %6279 = vmatprep.mubr.msk.f32.mxu1 %vm702_vm2, %v7341_v51  ;;  %6507 = vmatprep.mubr.msk.f32.mxu0 %vm702_vm2, %v7341_v51  ;;  %v8471_v51 = vld [vmem:[#allocation6_spill] sm:$0xff] }
 0x17e   : > { %v8163_v22 = vadd.f32 %v6106_v27, %v1754_v2 }
 0x17f   : > { %v1488_v12 = vadd.f32 %v8470_v30, %v1218_v6  ;;  %v8304_v6 = vld [vmem:[%s8423_s4] ss:$0 sm:$0xff] }
 0x180   : > { %6280 = vmatmul.mubr.msk.f32.gmra.mrb[66].mxu1 %vm702_vm2, %v7352_v52  ;;  %6508 = vmatmul.mubr.msk.f32.gmra.mrb[66].mxu0 %vm702_vm2, %v7352_v52  ;;  %v8472_v52 = vld [vmem:[#allocation7_spill] sm:$0xff] }
 0x181   : > { %v1755_v1 = vadd.f32 %v8004_v45, %v1488_v12  ;;  %6282 = vmatprep.mubr.msk.f32.mxu1 %vm702_vm2, %v7355_v53  ;;  %6510 = vmatprep.mubr.msk.f32.mxu0 %vm702_vm2, %v7355_v53  ;;  %v8473_v53 = vld [vmem:[#allocation8_spill] sm:$0xff] }
 0x182   : > { %v6892_v45 = vld [vmem:[%s7040_s15 + $0x50] sm:$0xff] }
 0x183   : > { %v8175_v16 = vadd.f32 %v2002_v15, %v1755_v1 }
 0x184   : > { %6283 = vmatmul.mubr.msk.f32.gmra.mrb[68].mxu1 %vm702_vm2, %v7366_v54  ;;  %6511 = vmatmul.mubr.msk.f32.gmra.mrb[68].mxu0 %vm702_vm2, %v7366_v54  ;;  %v8474_v54 = vld [vmem:[#allocation9_spill] sm:$0xff] }
 0x185   : > { %6285 = vmatprep.mubr.msk.f32.mxu1 %vm702_vm2, %v8471_v51  ;;  %6513 = vmatprep.mubr.msk.f32.mxu0 %vm702_vm2, %v8471_v51 }
 0x188   : > { %6286 = vmatmul.mubr.msk.f32.gmra.mrb[70].mxu1 %vm702_vm2, %v8472_v52  ;;  %6514 = vmatmul.mubr.msk.f32.gmra.mrb[70].mxu0 %vm702_vm2, %v8472_v52 }
 0x189   : > { %6288 = vmatprep.mubr.msk.f32.mxu1 %vm702_vm2, %v7383_v57  ;;  %6516 = vmatprep.mubr.msk.f32.mxu0 %vm702_vm2, %v7383_v57  ;;  %v8475_v57 = vld [vmem:[#allocation10_spill] sm:$0xff] }
 0x18c   : > { %6289 = vmatmul.mubr.msk.f32.gmra.mrb[72].mxu1 %vm702_vm2, %v7394_v58  ;;  %6517 = vmatmul.mubr.msk.f32.gmra.mrb[72].mxu0 %vm702_vm2, %v7394_v58  ;;  %v6888_v58 = vld [vmem:[%s7040_s15 + $0x30] sm:$0xff] }
 0x18d   : > { %6291 = vmatprep.mubr.msk.f32.mxu1 %vm702_vm2, %v7397_v59  ;;  %6519 = vmatprep.mubr.msk.f32.mxu0 %vm702_vm2, %v7397_v59  ;;  %v6889_v59 = vld [vmem:[%s7040_s15 + $0x38] sm:$0xff] }
 0x190   : > { %6292 = vmatmul.mubr.msk.f32.gmra.mrb[74].mxu1 %vm702_vm2, %v7408_v60  ;;  %6520 = vmatmul.mubr.msk.f32.gmra.mrb[74].mxu0 %vm702_vm2, %v7408_v60  ;;  %v6890_v60 = vld [vmem:[%s7040_s15 + $0x40] sm:$0xff] }
 0x191   : > { %6294 = vmatprep.mubr.msk.f32.mxu1 %vm702_vm2, %v7411_v61  ;;  %6522 = vmatprep.mubr.msk.f32.mxu0 %vm702_vm2, %v7411_v61  ;;  %v6891_v61 = vld [vmem:[%s7040_s15 + $0x48] sm:$0xff]  ;;  %s4872_s15 = sshll.u32 %s6931_s18, 3 }
 0x192   : > { %p290_p7 = scmp.lt.s32.totalorder %s4872_s15, 15 }
 0x194   : > { %6295 = vmatmul.mubr.msk.f32.gmra.mrb[76].mxu1 %vm702_vm2, %v8473_v53  ;;  %6523 = vmatmul.mubr.msk.f32.gmra.mrb[76].mxu0 %vm702_vm2, %v8473_v53  ;;  %s8492_s15 = smov (!%p290_p7, %s4872_s15), 15 }
 0x195   : > { %6297 = vmatprep.mubr.msk.f32.mxu1 %vm702_vm2, %v8474_v54  ;;  %6525 = vmatprep.mubr.msk.f32.mxu0 %vm702_vm2, %v8474_v54  ;;  %s4873_s12 = sshll.u32 %s8492_s15, 1 }
 0x196   : > { %s294_s14 = sadd.s32 %s4874_s13, %s4873_s12 }
 0x197   : > { %s4875_s19 = sshll.u32 %s294_s14, 3 }
 0x198   : > { %6298 = vmatmul.mubr.msk.f32.gmra.mrb[78].mxu1 %vm702_vm2, %v8475_v57  ;;  %6526 = vmatmul.mubr.msk.f32.gmra.mrb[78].mxu0 %vm702_vm2, %v8475_v57  ;;  %s8313_s26 = scalar_lea.vmem %s8424_s5, %s4875_s19 }
 0x199   : > { %6302 = vmatprep.mubr.msk.f32.mxu1 %vm448_vm1, %v6888_v58  ;;  %6530 = vmatprep.mubr.msk.f32.mxu0 %vm448_vm1, %v6888_v58 }
 0x19c   : > { %6303 = vmatmul.mubr.msk.f32.vlgmr.msra.gmra.mrb[56].mxu1 %vm448_vm1, %v6889_v59  ;;  %6531 = vmatmul.mubr.msk.f32.vlgmr.msra.gmra.mrb[56].mxu0 %vm448_vm1, %v6889_v59 }
 0x19d   : > { %6305 = vmatprep.mubr.msk.f32.mxu1 %vm448_vm1, %v6890_v60  ;;  %6533 = vmatprep.mubr.msk.f32.mxu0 %vm448_vm1, %v6890_v60 }
 0x1a0   : > { %6306 = vmatmul.mubr.msk.f32.gmra.mrb[58].mxu1 %vm448_vm1, %v6891_v61  ;;  %6534 = vmatmul.mubr.msk.f32.gmra.mrb[58].mxu0 %vm448_vm1, %v6891_v61 }
 0x1a1   : > { %6308 = vmatprep.mubr.msk.f32.mxu1 %vm448_vm1, %v6892_v45  ;;  %6536 = vmatprep.mubr.msk.f32.mxu0 %vm448_vm1, %v6892_v45 }
 0x1a4   : > { %6309 = vmatmul.mubr.msk.f32.gmra.mrb[60].mxu1 %vm448_vm1, %v6893_v17  ;;  %6537 = vmatmul.mubr.msk.f32.gmra.mrb[60].mxu0 %vm448_vm1, %v6893_v17 }
 0x1a5   : > { %6311 = vmatprep.mubr.msk.f32.mxu1 %vm448_vm1, %v6894_v33  ;;  %6539 = vmatprep.mubr.msk.f32.mxu0 %vm448_vm1, %v6894_v33 }
 0x1a8   : > { %6312 = vmatmul.mubr.msk.f32.gmra.mrb[62].mxu1 %vm448_vm1, %v6895_v4  ;;  %6540 = vmatmul.mubr.msk.f32.gmra.mrb[62].mxu0 %vm448_vm1, %v6895_v4 }
 0x1a9   : > { %6314 = vmatprep.mubr.msk.f32.mxu1 %vm448_vm1, %v6896_v32  ;;  %6542 = vmatprep.mubr.msk.f32.mxu0 %vm448_vm1, %v6896_v32 }
 0x1ac   : > { %6315 = vmatmul.mubr.msk.f32.gmra.mrb[64].mxu1 %vm448_vm1, %v6897_v34  ;;  %6543 = vmatmul.mubr.msk.f32.gmra.mrb[64].mxu0 %vm448_vm1, %v6897_v34 }
 0x1ad   : > { %6317 = vmatprep.mubr.msk.f32.mxu1 %vm448_vm1, %v6898_v35  ;;  %6545 = vmatprep.mubr.msk.f32.mxu0 %vm448_vm1, %v6898_v35 }
 0x1b0   : > { %6318 = vmatmul.mubr.msk.f32.gmra.mrb[66].mxu1 %vm448_vm1, %v6899_v3  ;;  %6546 = vmatmul.mubr.msk.f32.gmra.mrb[66].mxu0 %vm448_vm1, %v6899_v3 }
 0x1b1   : > { %6320 = vmatprep.mubr.msk.f32.mxu1 %vm448_vm1, %v6900_v7  ;;  %6548 = vmatprep.mubr.msk.f32.mxu0 %vm448_vm1, %v6900_v7 }
 0x1b4   : > { %6321 = vmatmul.mubr.msk.f32.gmra.mrb[68].mxu1 %vm448_vm1, %v6901_v36  ;;  %6549 = vmatmul.mubr.msk.f32.gmra.mrb[68].mxu0 %vm448_vm1, %v6901_v36 }
 0x1b5   : > { %6323 = vmatprep.mubr.msk.f32.mxu1 %vm448_vm1, %v6902_v9  ;;  %6551 = vmatprep.mubr.msk.f32.mxu0 %vm448_vm1, %v6902_v9 }
 0x1b8   : > { %6324 = vmatmul.mubr.msk.f32.gmra.mrb[70].mxu1 %vm448_vm1, %v6903_v62  ;;  %6552 = vmatmul.mubr.msk.f32.gmra.mrb[70].mxu0 %vm448_vm1, %v6903_v62 }
 0x1b9   : > { %6326 = vmatprep.mubr.msk.f32.mxu1 %vm448_vm1, %v6904_v11  ;;  %6554 = vmatprep.mubr.msk.f32.mxu0 %vm448_vm1, %v6904_v11 }
 0x1bc   : > { %6327 = vmatmul.mubr.msk.f32.gmra.mrb[72].mxu1 %vm448_vm1, %v6905_v5  ;;  %6555 = vmatmul.mubr.msk.f32.gmra.mrb[72].mxu0 %vm448_vm1, %v6905_v5 }
 0x1bd   : > { %6329 = vmatprep.mubr.msk.f32.mxu1 %vm448_vm1, %v6906_v56  ;;  %6557 = vmatprep.mubr.msk.f32.mxu0 %vm448_vm1, %v6906_v56 }
 0x1c0   : > { %6330 = vmatmul.mubr.msk.f32.gmra.mrb[74].mxu1 %vm448_vm1, %v6907_v19  ;;  %6558 = vmatmul.mubr.msk.f32.gmra.mrb[74].mxu0 %vm448_vm1, %v6907_v19 }
 0x1c1   : > { %6332 = vmatprep.mubr.msk.f32.mxu1 %vm448_vm1, %v6908_v24  ;;  %6560 = vmatprep.mubr.msk.f32.mxu0 %vm448_vm1, %v6908_v24 }
 0x1c4   : > { %6333 = vmatmul.mubr.msk.f32.gmra.mrb[76].mxu1 %vm448_vm1, %v8476_v42  ;;  %6561 = vmatmul.mubr.msk.f32.gmra.mrb[76].mxu0 %vm448_vm1, %v8476_v42 }
 0x1c5   : > { %6335 = vmatprep.mubr.msk.f32.mxu1 %vm448_vm1, %v8477_v39  ;;  %6563 = vmatprep.mubr.msk.f32.mxu0 %vm448_vm1, %v8477_v39 }
 0x1c8   : > { %6336 = vmatmul.mubr.msk.f32.gmra.mrb[78].mxu1 %vm448_vm1, %v8478_v41  ;;  %6564 = vmatmul.mubr.msk.f32.gmra.mrb[78].mxu0 %vm448_vm1, %v8478_v41 }
 0x26f   : > { %v6304_v26 = vpop.f32.mrb[56].mxu1  ;;  %v6532_v27 = vpop.f32.mrb[56].mxu0 }
 0x270   : > { %v3295_v8 = vrot.slane %v6304_v26, 1  ;;  %v4619_v20 = vrot.slane %v6532_v27, 2  ;;  %v3126_v50 = vpop.f32.mrb[57].mxu1  ;;  %v4450_v46 = vpop.f32.mrb[57].mxu0 }
 0x271   : > { %v3294_v63 = vrot.slane %v3126_v50, 1  ;;  %v4618_v47 = vrot.slane %v4450_v46, 2 }
 0x273   : > { %v3296_v21 = vsel %vm3293_vm3, %v3294_v63, %v3295_v8  ;;  %v4620_v28 = vsel %vm4617_vm4, %v4618_v47, %v4619_v20  ;;  %v6307_v14 = vpop.f32.mrb[58].mxu1  ;;  %v6535_v2 = vpop.f32.mrb[58].mxu0 }
 0x274   : > { %v3350_v37 = vadd.f32 %v8019_v18, %v3296_v21  ;;  %v3136_v49 = vpop.f32.mrb[59].mxu1  ;;  %v4460_v15 = vpop.f32.mrb[59].mxu0  ;;  %v3299_v45 = vrot.slane %v6307_v14, 1  ;;  %v4623_v17 = vrot.slane %v6535_v2, 2 }
 0x275   : > { %v3297_v30 = vrot.slane %v3136_v49, 1  ;;  %v4621_v12 = vrot.slane %v4460_v15, 2 }
 0x276   : > { %v4674_v1 = vadd.f32 %v4620_v28, %v3350_v37 }
 0x277   : > { %v3298_v51 = vsel %vm3293_vm3, %v3295_v8, %v3297_v30  ;;  %v4622_v52 = vsel %vm4617_vm4, %v4619_v20, %v4621_v12  ;;  %v6310_v53 = vpop.f32.mrb[60].mxu1  ;;  %v6538_v54 = vpop.f32.mrb[60].mxu0 }
 0x278   : > { %v4697_v57 = vadd.f32 %v8304_v6, %v4674_v1  ;;  %v3351_v18 = vadd.f32 %v8013_v10, %v3298_v51  ;;  %v3302_v58 = vrot.slane %v6310_v53, 1  ;;  %v4626_v59 = vrot.slane %v6538_v54, 2  ;;  %v3146_v60 = vpop.f32.mrb[61].mxu1  ;;  %v4470_v61 = vpop.f32.mrb[61].mxu0 }
 0x279   : > { %v3300_v33 = vrot.slane %v3146_v60, 1  ;;  %v4624_v4 = vrot.slane %v4470_v61, 2 }
 0x27a   : > { %v4713_v32 = vmax.f32 %v4697_v57, 0.0  ;;  %v4675_v34 = vadd.f32 %v4622_v52, %v3351_v18 }
 0x27b   : > { %v3301_v35 = vsel %vm3293_vm3, %v3299_v45, %v3300_v33  ;;  %v3303_v10 = vsel %vm3293_vm3, %v3300_v33, %v3302_v58  ;;  %v4625_v3 = vsel %vm4617_vm4, %v4623_v17, %v4624_v4  ;;  %v4627_v7 = vsel %vm4617_vm4, %v4624_v4, %v4626_v59  ;;  %v6313_v36 = vpop.f32.mrb[62].mxu1  ;;  %v6541_v9 = vpop.f32.mrb[62].mxu0 }
 0x27c   : > { %4729 = vst.msk [vmem:[%s8313_s26] sm:$0xff] %vm702_vm2, %v4713_v32  ;;  %v4698_v62 = vadd.f32 %v8304_v6, %v4675_v34  ;;  %v3352_v11 = vadd.f32 %v3301_v35, %v8045_v23  ;;  %v3353_v5 = vadd.f32 %v3303_v10, %v8061_v25  ;;  %v3305_v56 = vrot.slane %v6313_v36, 1  ;;  %v3156_v19 = vpop.f32.mrb[63].mxu1  ;;  %v4480_v24 = vpop.f32.mrb[63].mxu0 }
 0x27d   : > { %v4629_v42 = vrot.slane %v6541_v9, 2  ;;  %v3304_v39 = vrot.slane %v3156_v19, 1  ;;  %v4628_v41 = vrot.slane %v4480_v24, 2 }
 0x27e   : > { %v4714_v26 = vmax.f32 %v4698_v62, 0.0  ;;  %v4676_v27 = vadd.f32 %v4625_v3, %v3352_v11  ;;  %v4677_v8 = vadd.f32 %v4627_v7, %v3353_v5 }
 0x27f   : > { %v3306_v20 = vsel %vm3293_vm3, %v3304_v39, %v3305_v56  ;;  %v4630_v50 = vsel %vm4617_vm4, %v4628_v41, %v4629_v42  ;;  %v6316_v46 = vpop.f32.mrb[64].mxu1  ;;  %v6544_v63 = vpop.f32.mrb[64].mxu0 }
 0x280   : > { %4730 = vst.msk [vmem:[%s8313_s26 + $0x8] sm:$0xff] %vm702_vm2, %v4714_v26  ;;  %v4699_v23 = vadd.f32 %v8304_v6, %v4676_v27  ;;  %v4700_v25 = vadd.f32 %v8304_v6, %v4677_v8  ;;  %v3354_v47 = vadd.f32 %v8055_v43, %v3306_v20  ;;  %v3166_v21 = vpop.f32.mrb[65].mxu1  ;;  %v4490_v28 = vpop.f32.mrb[65].mxu0  ;;  %v3309_v58 = vrot.slane %v6316_v46, 1 }
 0x281   : > { %v3307_v14 = vrot.slane %v3166_v21, 1  ;;  %v4631_v2 = vrot.slane %v4490_v28, 2  ;;  %v4633_v59 = vrot.slane %v6544_v63, 2 }
 0x282   : > { %v4715_v37 = vmax.f32 %v4699_v23, 0.0  ;;  %v4716_v49 = vmax.f32 %v4700_v25, 0.0  ;;  %v4678_v15 = vadd.f32 %v4630_v50, %v3354_v47 }
 0x283   : > { %v3308_v30 = vsel %vm3293_vm3, %v3305_v56, %v3307_v14  ;;  %v4632_v12 = vsel %vm4617_vm4, %v4629_v42, %v4631_v2  ;;  %v6319_v1 = vpop.f32.mrb[66].mxu1  ;;  %v6547_v51 = vpop.f32.mrb[66].mxu0 }
 0x284   : > { %4731 = vst.msk [vmem:[%s8313_s26 + $0x10] sm:$0xff] %vm702_vm2, %v4715_v37  ;;  %4732 = vst.msk [vmem:[%s8313_s26 + $0x18] sm:$0xff] %vm702_vm2, %v4716_v49  ;;  %v4701_v52 = vadd.f32 %v8304_v6, %v4678_v15  ;;  %v3355_v43 = vadd.f32 %v8048_v55, %v3308_v30  ;;  %v3312_v53 = vrot.slane %v6319_v1, 1  ;;  %v4636_v54 = vrot.slane %v6547_v51, 2  ;;  %v3176_v57 = vpop.f32.mrb[67].mxu1  ;;  %v4500_v18 = vpop.f32.mrb[67].mxu0 }
 0x285   : > { %v3310_v60 = vrot.slane %v3176_v57, 1  ;;  %v4634_v61 = vrot.slane %v4500_v18, 2 }
 0x286   : > { %v4717_v45 = vmax.f32 %v4701_v52, 0.0  ;;  %v4679_v17 = vadd.f32 %v4632_v12, %v3355_v43 }
 0x287   : > { %v3311_v33 = vsel %vm3293_vm3, %v3309_v58, %v3310_v60  ;;  %v3313_v4 = vsel %vm3293_vm3, %v3310_v60, %v3312_v53  ;;  %v4635_v32 = vsel %vm4617_vm4, %v4633_v59, %v4634_v61  ;;  %v4637_v34 = vsel %vm4617_vm4, %v4634_v61, %v4636_v54  ;;  %v6322_v55 = vpop.f32.mrb[68].mxu1  ;;  %v6550_v35 = vpop.f32.mrb[68].mxu0 }
 0x288   : > { %4733 = vst.msk [vmem:[%s8313_s26 + $0x20] sm:$0xff] %vm702_vm2, %v4717_v45  ;;  %v4702_v10 = vadd.f32 %v8304_v6, %v4679_v17  ;;  %v3356_v3 = vadd.f32 %v3311_v33, %v8083_v29  ;;  %v3357_v7 = vadd.f32 %v3313_v4, %v8099_v31  ;;  %v3315_v36 = vrot.slane %v6322_v55, 1  ;;  %v3186_v9 = vpop.f32.mrb[69].mxu1  ;;  %v4510_v62 = vpop.f32.mrb[69].mxu0 }
 0x289   : > { %v4639_v11 = vrot.slane %v6550_v35, 2  ;;  %v3314_v5 = vrot.slane %v3186_v9, 1  ;;  %v4638_v56 = vrot.slane %v4510_v62, 2 }
 0x28a   : > { %v4718_v19 = vmax.f32 %v4702_v10, 0.0  ;;  %v4680_v24 = vadd.f32 %v4635_v32, %v3356_v3  ;;  %v4681_v42 = vadd.f32 %v4637_v34, %v3357_v7 }
 0x28b   : > { %v3316_v39 = vsel %vm3293_vm3, %v3314_v5, %v3315_v36  ;;  %v4640_v41 = vsel %vm4617_vm4, %v4638_v56, %v4639_v11  ;;  %v6325_v26 = vpop.f32.mrb[70].mxu1  ;;  %v6553_v27 = vpop.f32.mrb[70].mxu0 }
 0x28c   : > { %4734 = vst.msk [vmem:[%s8313_s26 + $0x28] sm:$0xff] %vm702_vm2, %v4718_v19  ;;  %v4703_v29 = vadd.f32 %v8304_v6, %v4680_v24  ;;  %v4704_v31 = vadd.f32 %v8304_v6, %v4681_v42  ;;  %v3358_v8 = vadd.f32 %v8093_v48, %v3316_v39  ;;  %v3196_v20 = vpop.f32.mrb[71].mxu1  ;;  %v4520_v50 = vpop.f32.mrb[71].mxu0  ;;  %v3319_v1 = vrot.slane %v6325_v26, 1 }
 0x28d   : > { %v3317_v46 = vrot.slane %v3196_v20, 1  ;;  %v4641_v63 = vrot.slane %v4520_v50, 2  ;;  %v4643_v51 = vrot.slane %v6553_v27, 2 }
 0x28e   : > { %v4719_v23 = vmax.f32 %v4703_v29, 0.0  ;;  %v4720_v25 = vmax.f32 %v4704_v31, 0.0  ;;  %v4682_v47 = vadd.f32 %v4640_v41, %v3358_v8 }
 0x28f   : > { %v3318_v21 = vsel %vm3293_vm3, %v3315_v36, %v3317_v46  ;;  %v4642_v28 = vsel %vm4617_vm4, %v4639_v11, %v4641_v63  ;;  %v6328_v14 = vpop.f32.mrb[72].mxu1  ;;  %v6556_v2 = vpop.f32.mrb[72].mxu0 }
 0x290   : > { %4735 = vst.msk [vmem:[%s8313_s26 + $0x30] sm:$0xff] %vm702_vm2, %v4719_v23  ;;  %4736 = vst.msk [vmem:[%s8313_s26 + $0x38] sm:$0xff] %vm702_vm2, %v4720_v25  ;;  %v4705_v37 = vadd.f32 %v8304_v6, %v4682_v47  ;;  %v3359_v48 = vadd.f32 %v8086_v0, %v3318_v21  ;;  %v3322_v49 = vrot.slane %v6328_v14, 1  ;;  %v4646_v15 = vrot.slane %v6556_v2, 2  ;;  %v3206_v30 = vpop.f32.mrb[73].mxu1  ;;  %v4530_v12 = vpop.f32.mrb[73].mxu0 }
 0x291   : > { %v3320_v52 = vrot.slane %v3206_v30, 1  ;;  %v4644_v43 = vrot.slane %v4530_v12, 2 }
 0x292   : > { %v4721_v53 = vmax.f32 %v4705_v37, 0.0  ;;  %v4683_v54 = vadd.f32 %v4642_v28, %v3359_v48 }
 0x293   : > { %v3321_v57 = vsel %vm3293_vm3, %v3319_v1, %v3320_v52  ;;  %v3323_v18 = vsel %vm3293_vm3, %v3320_v52, %v3322_v49  ;;  %v4645_v58 = vsel %vm4617_vm4, %v4643_v51, %v4644_v43  ;;  %v4647_v59 = vsel %vm4617_vm4, %v4644_v43, %v4646_v15  ;;  %v6331_v0 = vpop.f32.mrb[74].mxu1  ;;  %v6559_v60 = vpop.f32.mrb[74].mxu0 }
 0x294   : > { %4737 = vst.msk [vmem:[%s8313_s26 + $0x40] sm:$0xff] %vm702_vm2, %v4721_v53  ;;  %v4706_v61 = vadd.f32 %v8304_v6, %v4683_v54  ;;  %v3360_v45 = vadd.f32 %v3321_v57, %v8125_v38  ;;  %v3361_v17 = vadd.f32 %v3323_v18, %v8141_v44  ;;  %v3325_v33 = vrot.slane %v6331_v0, 1  ;;  %v3216_v4 = vpop.f32.mrb[75].mxu1  ;;  %v4540_v32 = vpop.f32.mrb[75].mxu0 }
 0x295   : > { %v4649_v34 = vrot.slane %v6559_v60, 2  ;;  %v3324_v55 = vrot.slane %v3216_v4, 1  ;;  %v4648_v35 = vrot.slane %v4540_v32, 2 }
 0x296   : > { %v4722_v10 = vmax.f32 %v4706_v61, 0.0  ;;  %v4684_v3 = vadd.f32 %v4645_v58, %v3360_v45  ;;  %v4685_v7 = vadd.f32 %v4647_v59, %v3361_v17 }
 0x297   : > { %v3326_v36 = vsel %vm3293_vm3, %v3324_v55, %v3325_v33  ;;  %v4650_v9 = vsel %vm4617_vm4, %v4648_v35, %v4649_v34  ;;  %v6334_v62 = vpop.f32.mrb[76].mxu1  ;;  %v6562_v11 = vpop.f32.mrb[76].mxu0 }
 0x298   : > { %4738 = vst.msk [vmem:[%s8313_s26 + $0x48] sm:$0xff] %vm702_vm2, %v4722_v10  ;;  %v4707_v38 = vadd.f32 %v8304_v6, %v4684_v3  ;;  %v4708_v44 = vadd.f32 %v8304_v6, %v4685_v7  ;;  %v3362_v5 = vadd.f32 %v8135_v13, %v3326_v36  ;;  %v3226_v56 = vpop.f32.mrb[77].mxu1  ;;  %v4550_v19 = vpop.f32.mrb[77].mxu0  ;;  %v3329_v25 = vrot.slane %v6334_v62, 1 }
 0x299   : > { %v3327_v24 = vrot.slane %v3226_v56, 1  ;;  %v4651_v42 = vrot.slane %v4550_v19, 2  ;;  %v4653_v47 = vrot.slane %v6562_v11, 2 }
 0x29a   : > { %v4723_v39 = vmax.f32 %v4707_v38, 0.0  ;;  %v4724_v41 = vmax.f32 %v4708_v44, 0.0  ;;  %v4686_v26 = vadd.f32 %v4650_v9, %v3362_v5 }
 0x29b   : > { %v3328_v27 = vsel %vm3293_vm3, %v3325_v33, %v3327_v24  ;;  %v4652_v29 = vsel %vm4617_vm4, %v4649_v34, %v4651_v42  ;;  %v6337_v31 = vpop.f32.mrb[78].mxu1  ;;  %v6565_v8 = vpop.f32.mrb[78].mxu0 }
 0x29c   : > { %4739 = vst.msk [vmem:[%s8313_s26 + $0x50] sm:$0xff] %vm702_vm2, %v4723_v39  ;;  %4740 = vst.msk [vmem:[%s8313_s26 + $0x58] sm:$0xff] %vm702_vm2, %v4724_v41  ;;  %v4709_v20 = vadd.f32 %v8304_v6, %v4686_v26  ;;  %v3363_v13 = vadd.f32 %v8128_v40, %v3328_v27  ;;  %v3332_v50 = vrot.slane %v6337_v31, 1  ;;  %v4656_v46 = vrot.slane %v6565_v8, 2  ;;  %v3236_v63 = vpop.f32.mrb[79].mxu1  ;;  %v4560_v23 = vpop.f32.mrb[79].mxu0 }
 0x29d   : > { %v3330_v21 = vrot.slane %v3236_v63, 1  ;;  %v4654_v28 = vrot.slane %v4560_v23, 2 }
 0x29e   : > { %v4725_v14 = vmax.f32 %v4709_v20, 0.0  ;;  %v4687_v2 = vadd.f32 %v4652_v29, %v3363_v13 }
 0x29f   : > { %v3331_v37 = vsel %vm3293_vm3, %v3329_v25, %v3330_v21  ;;  %v3333_v48 = vsel %vm3293_vm3, %v3330_v21, %v3332_v50  ;;  %v4655_v49 = vsel %vm4617_vm4, %v4653_v47, %v4654_v28  ;;  %v4657_v40 = vsel %vm4617_vm4, %v4654_v28, %v4656_v46 }
 0x2a0   : > { %4741 = vst.msk [vmem:[%s8313_s26 + $0x60] sm:$0xff] %vm702_vm2, %v4725_v14  ;;  %v4710_v15 = vadd.f32 %v8304_v6, %v4687_v2  ;;  %v3364_v30 = vadd.f32 %v3331_v37, %v8163_v22  ;;  %v3365_v12 = vadd.f32 %v3333_v48, %v8175_v16 }
 0x2a2   : > { %v4726_v1 = vmax.f32 %v4710_v15, 0.0  ;;  %v4688_v51 = vadd.f32 %v4655_v49, %v3364_v30  ;;  %v4689_v52 = vadd.f32 %v4657_v40, %v3365_v12 }
 0x2a4   : > { %4742 = vst.msk [vmem:[%s8313_s26 + $0x68] sm:$0xff] %vm702_vm2, %v4726_v1  ;;  %v4711_v43 = vadd.f32 %v8304_v6, %v4688_v51  ;;  %v4712_v53 = vadd.f32 %v8304_v6, %v4689_v52 }
 0x2a6   : > { %v4727_v54 = vmax.f32 %v4711_v43, 0.0  ;;  %v4728_v57 = vmax.f32 %v4712_v53, 0.0 }
 0x2a8   : > { %4743 = vst.msk [vmem:[%s8313_s26 + $0x70] sm:$0xff] %vm702_vm2, %v4727_v54  ;;  %4744 = vst.msk [vmem:[%s8313_s26 + $0x78] sm:$0xff] %vm702_vm2, %v4728_v57 }
 0x2a9 PF: > { %s15_s22 = sadd.s32 1, %s6947_s22   ;;  %s8479_s18 = smov %s6939_s20 }
 0x2aa   : > { %p12_p8 = scmp.ge.s32.totalorder %s15_s22, 6   ;;  %s8480_s19 = smov %s6943_s21 }
 0x2ab   : > { %s8481_s20 = smov %s8484_s23  ;;  %s8482_s21 = smov %s8488_s24 }
 0x2ac   :  { %14 = sbr.rel (!%p12_p8) target bundleno = 3 (0x3), region = 93 }

</bundles_post_ra>
